<compile_context>
chip_gen: v7x
topology: tpu7x:2x2x1
jax: 0.10.0
libtpu: 0.0.40
codegen_flags: <defaults>
</compile_context>

<pallas_src>
import functools

import jax
import jax.numpy as jnp
from jax.experimental import pallas as pl
from jax.experimental.pallas import tpu as pltpu


CPAD = 128   # channel dimension padded to the lane width
SUB = 16     # bf16 sublane packing unit (16 rows per vreg)


def _round_up(n, m):
    return (n + m - 1) // m * m


# ----------------------------- fused Pallas kernel ---------------------------


def _resnet_kernel(*refs, TB, L, C, P, rows, ks, block_cfg, inv_l):
    """Whole ResNetBaseline forward for one batch tile of TB examples.

    refs (inputs):  x_ref (TB, L, C) bf16,
                    per block: 3x [w (K*C, C) bf16, scale (1, C) f32, shift (1, C) f32],
                               then if residual: [wr (C, C) bf16, sr (1, C) f32, br (1, C) f32],
                    then head: wfc (C, C) bf16, bfc (1, C) f32.
    refs (output):  o_ref (TB, C) f32 logits.
    refs (scratch): hbuf (TB, rows, C) bf16 zero-padded time buffer, live rows [P, P+L).
    """
    it = iter(refs)
    x_ref = next(it)
    blocks = []
    for has_res in block_cfg:
        convs = [(next(it), next(it), next(it)) for _ in range(3)]
        res = (next(it), next(it), next(it)) if has_res else None
        blocks.append((convs, res))
    wfc_ref = next(it)
    bfc_ref = next(it)
    o_ref = next(it)
    hbuf = next(it)

    # Zero only the pad rows, once.  Live rows [P, P+L) are always fully overwritten,
    # so the pad rows stay exactly zero for every conv of every block.
    hbuf[:, :P, :] = jnp.zeros((TB, P, C), hbuf.dtype)
    if rows > P + L:
        hbuf[:, P + L:, :] = jnp.zeros((TB, rows - P - L, C), hbuf.dtype)
    hbuf[:, P:P + L, :] = x_ref[...]

    def im2col(K):
        # Lane-concatenated (TB*L, K*C) bf16 view -> a single MXU matmul per conv.
        # "Same" padding: left pad (K-1)//2, right pad K-1-(K-1)//2 (matches PyTorch
        # Conv1dSamePadding's right-pad-then-symmetric behavior for even K).
        pad_l = (K - 1) // 2
        s0 = P - pad_l
        taps = [hbuf[:, s0 + j:s0 + j + L, :] for j in range(K)]   # slice straight from ref
        a = taps[0] if K == 1 else jnp.concatenate(taps, axis=-1)  # (TB, L, K*C)
        return a.reshape(TB * L, K * C)

    def conv_bn_relu(a, w_ref, s_ref, b_ref):
        y = jnp.dot(a, w_ref[...], preferred_element_type=jnp.float32)   # (TB*L, C) f32
        y = y * s_ref[...] + b_ref[...]                                   # folded BN (f32)
        return jnp.maximum(y, 0.0)

    n_blocks = len(blocks)
    h = None
    for bi, (convs, res) in enumerate(blocks):
        if res is not None:
            # Residual branch (1x1 conv + BN, no ReLU) uses the block INPUT: read it from
            # the live rows *before* conv1 overwrites them.
            wr, sr, br = res
            xin = hbuf[:, P:P + L, :].reshape(TB * L, C)
            r = jnp.dot(xin, wr[...], preferred_element_type=jnp.float32)
            r = r * sr[...] + br[...]
        else:
            r = None

        for ci, (w, s, b) in enumerate(convs):
            h = conv_bn_relu(im2col(ks[ci]), w, s, b)
            if ci < len(convs) - 1:
                hbuf[:, P:P + L, :] = h.reshape(TB, L, C).astype(hbuf.dtype)

        if r is not None:
            h = h + r
        if bi < n_blocks - 1:
            hbuf[:, P:P + L, :] = h.reshape(TB, L, C).astype(hbuf.dtype)

    # Head: mean over time as an in-kernel sublane reduction (XLU), then the Linear layer.
    pooled = jnp.sum(h.reshape(TB, L, C), axis=1) * inv_l                 # (TB, C) f32
    logits = jnp.dot(pooled.astype(jnp.bfloat16), wfc_ref[...],
                     preferred_element_type=jnp.float32) + bfc_ref[...]
    o_ref[...] = logits.astype(o_ref.dtype)


# --------------------------------- wrapper ------------------------------------


def resnet_forward(x_ncl, params, *, target_rows=1024):
    """x_ncl: (B, C_in, L) float32 (PyTorch Conv1d NCL layout) -> (B, num_classes) f32."""
    B, cin, L = x_ncl.shape
    blocks = params["blocks"]
    ks = tuple(blocks[0]["ks"])
    kmax = max(ks)
    pad_l_max = (kmax - 1) // 2
    pad_r_max = (kmax - 1) - pad_l_max
    P = _round_up(max(pad_l_max, 1), SUB)              # 16-aligned offset of the live rows
    rows = _round_up(P + L + pad_r_max, SUB)           # padded time length of the scratch

    # One-time layout change: NCL -> channels-last, channel-padded to 128 lanes, bf16.
    x = jnp.transpose(x_ncl, (0, 2, 1)).astype(jnp.float32)
    x = jnp.zeros((B, L, CPAD), jnp.float32).at[:, :, :cin].set(x).astype(jnp.bfloat16)

    # Batch tile: target ~target_rows im2col rows per grid step (MXU M-dim utilization),
    # keep the tile a multiple of 8 when the batch is actually split across grid steps.
    tb = max(1, min(B, target_rows // max(L, 1)))
    if tb < B:
        tb = min(_round_up(tb, 8), _round_up(B, 8))
    b_pad = _round_up(B, tb)
    if b_pad > B:
        x = jnp.concatenate([x, jnp.zeros((b_pad - B, L, CPAD), x.dtype)], axis=0)
    grid = (b_pad // tb,)

    # Flatten parameters + specs (weights use constant index_maps -> DMA'd once, stay in VMEM).
    args = [x]
    in_specs = [pl.BlockSpec((tb, L, CPAD), lambda b: (b, 0, 0))]
    block_cfg = []

    def _const_specs(arrs):
        for a in arrs:
            args.append(a)
            in_specs.append(pl.BlockSpec(a.shape, lambda b: (0, 0)))

    for bp in blocks:
        block_cfg.append(bool(bp["match"]))
        for (w, s, b) in bp["convs"]:
            _const_specs([w, s, b])
        if bp["match"]:
            _const_specs(list(bp["res"]))
    w_fc, b_fc = params["fc"]
    _const_specs([w_fc, b_fc])

    out_shape = jax.ShapeDtypeStruct((b_pad, CPAD), jnp.float32)
    out_spec = pl.BlockSpec((tb, CPAD), lambda b: (b, 0))

    # Advisory cost estimate for XLA's scheduler.
    flops = 0
    for bp in blocks:
        for ksz in bp["ks"]:
            flops += 2 * b_pad * L * (ksz * CPAD) * CPAD
        if bp["match"]:
            flops += 2 * b_pad * L * CPAD * CPAD
    flops += 2 * b_pad * CPAD * CPAD
    param_bytes = sum(int(a.size) * a.dtype.itemsize for a in args[1:])
    bytes_accessed = int(x.size) * 2 + param_bytes + b_pad * CPAD * 4

    kernel = functools.partial(
        _resnet_kernel, TB=tb, L=L, C=CPAD, P=P, rows=rows,
        ks=ks, block_cfg=tuple(block_cfg), inv_l=1.0 / float(L))

    out = pl.pallas_call(
        kernel,
        out_shape=out_shape,
        grid_spec=pltpu.PrefetchScalarGridSpec(
            num_scalar_prefetch=0,
            grid=grid,
            in_specs=in_specs,
            out_specs=out_spec,
            scratch_shapes=[pltpu.VMEM((tb, rows, CPAD), jnp.bfloat16)]),
        compiler_params=pltpu.CompilerParams(
            dimension_semantics=("parallel",),          # batch grid -> both TCs on v7x
            vmem_limit_bytes=32 * 1024 * 1024),         # per-tile set is <4 MiB; safe on v5e/v6e/v7x
        cost_estimate=pl.CostEstimate(
            flops=flops, transcendentals=0, bytes_accessed=bytes_accessed),
    )(*args)

    return out[:B, :params["num_classes"]]


# --------------------------- parameter creation ------------------------------


def make_conv_bn_params(key, cin, cout, k):
    """Conv1d + eval-mode BatchNorm1d, folded and padded to the 128-lane im2col layout."""
    k1, k2, k3, k4, k5, k6 = jax.random.split(key, 6)
    w = 0.1 * jax.random.normal(k1, (k, cin, cout), jnp.float32)   # (K, Cin, Cout)
    bias = 0.1 * jax.random.normal(k2, (cout,), jnp.float32)
    gamma = 1.0 + 0.1 * jax.random.normal(k3, (cout,), jnp.float32)
    beta = 0.1 * jax.random.normal(k4, (cout,), jnp.float32)
    rmean = 0.1 * jax.random.normal(k5, (cout,), jnp.float32)
    rvar = 1.0 + 0.1 * jnp.abs(jax.random.normal(k6, (cout,), jnp.float32))
    eps = 1e-5
    scale = gamma / jnp.sqrt(rvar + eps)
    shift = scale * (bias - rmean) + beta
    # im2col weight layout: w_im2col[j*CPAD + c, co] = w[j, c, co], zeros elsewhere.
    # (Porting note: PyTorch Conv1d weights are (Cout, Cin, K) -> transpose, no flip.)
    w_pad = jnp.zeros((k, CPAD, CPAD), jnp.float32).at[:, :cin, :cout].set(w)
    w_im2col = w_pad.reshape(k * CPAD, CPAD).astype(jnp.bfloat16)
    # Padded lanes use scale=1 / shift=0 so they stay exactly zero through BN/ReLU.
    scale_pad = jnp.ones((1, CPAD), jnp.float32).at[0, :cout].set(scale)
    shift_pad = jnp.zeros((1, CPAD), jnp.float32).at[0, :cout].set(shift)
    return w_im2col, scale_pad, shift_pad


def make_params(key, in_channels, mid_channels, num_pred_classes):
    blocks = []
    chan_pairs = [(in_channels, mid_channels),
                  (mid_channels, 2 * mid_channels),
                  (2 * mid_channels, 2 * mid_channels)]
    kernel_sizes = (8, 5, 3)
    for cin, cout in chan_pairs:
        widths = [cin, cout, cout, cout]
        convs = []
        for i, ksz in enumerate(kernel_sizes):
            key, sub = jax.random.split(key)
            convs.append(make_conv_bn_params(sub, widths[i], widths[i + 1], ksz))
        bp = {"convs": convs, "ks": kernel_sizes, "match": cin != cout}
        if bp["match"]:
            key, sub = jax.random.split(key)
            bp["res"] = make_conv_bn_params(sub, cin, cout, 1)
        blocks.append(bp)

    key, k1, k2 = jax.random.split(key, 3)
    c_feat = 2 * mid_channels
    w_fc = 0.1 * jax.random.normal(k1, (c_feat, num_pred_classes), jnp.float32)
    b_fc = 0.1 * jax.random.normal(k2, (num_pred_classes,), jnp.float32)
    w_fc_pad = (jnp.zeros((CPAD, CPAD), jnp.float32)
                .at[:c_feat, :num_pred_classes].set(w_fc).astype(jnp.bfloat16))
    b_fc_pad = jnp.zeros((1, CPAD), jnp.float32).at[0, :num_pred_classes].set(b_fc)
    return {"blocks": blocks, "fc": (w_fc_pad, b_fc_pad), "num_classes": num_pred_classes}


# --------------------------------- main ---------------------------------------


if __name__ == "__main__":
    B, C_IN, L = 2, 4, 16
    MID, NUM_CLASSES = 16, 3

    key = jax.random.PRNGKey(0)
    k_params, k_input = jax.random.split(key)

    params = make_params(k_params, C_IN, MID, NUM_CLASSES)
    x = jax.random.normal(k_input, (B, C_IN, L), jnp.float32)  # PyTorch-style NCL input

    out = resnet_forward(x, params)
    out = jax.block_until_ready(out)
    assert out.shape == (B, NUM_CLASSES), out.shape
    assert bool(jnp.all(jnp.isfinite(out)))
    print("KERNEL_OK")
</pallas_src>

<mosaic_0001>
module attributes {stable_mosaic.version = 11 : i64} {
  func.func @_resnet_kernel(%arg0: i32, %arg1: memref<2x16x128xbf16, #tpu.memory_space<vmem>>, %arg2: memref<1024x128xbf16, #tpu.memory_space<vmem>>, %arg3: memref<1x128xf32, #tpu.memory_space<vmem>>, %arg4: memref<1x128xf32, #tpu.memory_space<vmem>>, %arg5: memref<640x128xbf16, #tpu.memory_space<vmem>>, %arg6: memref<1x128xf32, #tpu.memory_space<vmem>>, %arg7: memref<1x128xf32, #tpu.memory_space<vmem>>, %arg8: memref<384x128xbf16, #tpu.memory_space<vmem>>, %arg9: memref<1x128xf32, #tpu.memory_space<vmem>>, %arg10: memref<1x128xf32, #tpu.memory_space<vmem>>, %arg11: memref<128x128xbf16, #tpu.memory_space<vmem>>, %arg12: memref<1x128xf32, #tpu.memory_space<vmem>>, %arg13: memref<1x128xf32, #tpu.memory_space<vmem>>, %arg14: memref<1024x128xbf16, #tpu.memory_space<vmem>>, %arg15: memref<1x128xf32, #tpu.memory_space<vmem>>, %arg16: memref<1x128xf32, #tpu.memory_space<vmem>>, %arg17: memref<640x128xbf16, #tpu.memory_space<vmem>>, %arg18: memref<1x128xf32, #tpu.memory_space<vmem>>, %arg19: memref<1x128xf32, #tpu.memory_space<vmem>>, %arg20: memref<384x128xbf16, #tpu.memory_space<vmem>>, %arg21: memref<1x128xf32, #tpu.memory_space<vmem>>, %arg22: memref<1x128xf32, #tpu.memory_space<vmem>>, %arg23: memref<128x128xbf16, #tpu.memory_space<vmem>>, %arg24: memref<1x128xf32, #tpu.memory_space<vmem>>, %arg25: memref<1x128xf32, #tpu.memory_space<vmem>>, %arg26: memref<1024x128xbf16, #tpu.memory_space<vmem>>, %arg27: memref<1x128xf32, #tpu.memory_space<vmem>>, %arg28: memref<1x128xf32, #tpu.memory_space<vmem>>, %arg29: memref<640x128xbf16, #tpu.memory_space<vmem>>, %arg30: memref<1x128xf32, #tpu.memory_space<vmem>>, %arg31: memref<1x128xf32, #tpu.memory_space<vmem>>, %arg32: memref<384x128xbf16, #tpu.memory_space<vmem>>, %arg33: memref<1x128xf32, #tpu.memory_space<vmem>>, %arg34: memref<1x128xf32, #tpu.memory_space<vmem>>, %arg35: memref<128x128xbf16, #tpu.memory_space<vmem>>, %arg36: memref<1x128xf32, #tpu.memory_space<vmem>>, %arg37: memref<2x128xf32, #tpu.memory_space<vmem>>, %arg38: memref<2x48x128xbf16, #tpu.memory_space<vmem>>) attributes {dimension_semantics = [#tpu.dimension_semantics<parallel>], iteration_bounds = array<i64: 1>, scalar_prefetch = 0 : i64, scratch_operands = 1 : i64, tpu.core_type = #tpu.core_type<tc>, window_params = [{transform_indices = @transform_0, window_bounds = array<i64: 2, 16, 128>}, {pipeline_mode = #tpu.pipeline_mode<synchronous>, transform_indices = @transform_1, window_bounds = array<i64: 1024, 128>}, {pipeline_mode = #tpu.pipeline_mode<synchronous>, transform_indices = @transform_2, window_bounds = array<i64: 1, 128>}, {pipeline_mode = #tpu.pipeline_mode<synchronous>, transform_indices = @transform_3, window_bounds = array<i64: 1, 128>}, {pipeline_mode = #tpu.pipeline_mode<synchronous>, transform_indices = @transform_4, window_bounds = array<i64: 640, 128>}, {pipeline_mode = #tpu.pipeline_mode<synchronous>, transform_indices = @transform_5, window_bounds = array<i64: 1, 128>}, {pipeline_mode = #tpu.pipeline_mode<synchronous>, transform_indices = @transform_6, window_bounds = array<i64: 1, 128>}, {pipeline_mode = #tpu.pipeline_mode<synchronous>, transform_indices = @transform_7, window_bounds = array<i64: 384, 128>}, {pipeline_mode = #tpu.pipeline_mode<synchronous>, transform_indices = @transform_8, window_bounds = array<i64: 1, 128>}, {pipeline_mode = #tpu.pipeline_mode<synchronous>, transform_indices = @transform_9, window_bounds = array<i64: 1, 128>}, {pipeline_mode = #tpu.pipeline_mode<synchronous>, transform_indices = @transform_10, window_bounds = array<i64: 128, 128>}, {pipeline_mode = #tpu.pipeline_mode<synchronous>, transform_indices = @transform_11, window_bounds = array<i64: 1, 128>}, {pipeline_mode = #tpu.pipeline_mode<synchronous>, transform_indices = @transform_12, window_bounds = array<i64: 1, 128>}, {pipeline_mode = #tpu.pipeline_mode<synchronous>, transform_indices = @transform_13, window_bounds = array<i64: 1024, 128>}, {pipeline_mode = #tpu.pipeline_mode<synchronous>, transform_indices = @transform_14, window_bounds = array<i64: 1, 128>}, {pipeline_mode = #tpu.pipeline_mode<synchronous>, transform_indices = @transform_15, window_bounds = array<i64: 1, 128>}, {pipeline_mode = #tpu.pipeline_mode<synchronous>, transform_indices = @transform_16, window_bounds = array<i64: 640, 128>}, {pipeline_mode = #tpu.pipeline_mode<synchronous>, transform_indices = @transform_17, window_bounds = array<i64: 1, 128>}, {pipeline_mode = #tpu.pipeline_mode<synchronous>, transform_indices = @transform_18, window_bounds = array<i64: 1, 128>}, {pipeline_mode = #tpu.pipeline_mode<synchronous>, transform_indices = @transform_19, window_bounds = array<i64: 384, 128>}, {pipeline_mode = #tpu.pipeline_mode<synchronous>, transform_indices = @transform_20, window_bounds = array<i64: 1, 128>}, {pipeline_mode = #tpu.pipeline_mode<synchronous>, transform_indices = @transform_21, window_bounds = array<i64: 1, 128>}, {pipeline_mode = #tpu.pipeline_mode<synchronous>, transform_indices = @transform_22, window_bounds = array<i64: 128, 128>}, {pipeline_mode = #tpu.pipeline_mode<synchronous>, transform_indices = @transform_23, window_bounds = array<i64: 1, 128>}, {pipeline_mode = #tpu.pipeline_mode<synchronous>, transform_indices = @transform_24, window_bounds = array<i64: 1, 128>}, {pipeline_mode = #tpu.pipeline_mode<synchronous>, transform_indices = @transform_25, window_bounds = array<i64: 1024, 128>}, {pipeline_mode = #tpu.pipeline_mode<synchronous>, transform_indices = @transform_26, window_bounds = array<i64: 1, 128>}, {pipeline_mode = #tpu.pipeline_mode<synchronous>, transform_indices = @transform_27, window_bounds = array<i64: 1, 128>}, {pipeline_mode = #tpu.pipeline_mode<synchronous>, transform_indices = @transform_28, window_bounds = array<i64: 640, 128>}, {pipeline_mode = #tpu.pipeline_mode<synchronous>, transform_indices = @transform_29, window_bounds = array<i64: 1, 128>}, {pipeline_mode = #tpu.pipeline_mode<synchronous>, transform_indices = @transform_30, window_bounds = array<i64: 1, 128>}, {pipeline_mode = #tpu.pipeline_mode<synchronous>, transform_indices = @transform_31, window_bounds = array<i64: 384, 128>}, {pipeline_mode = #tpu.pipeline_mode<synchronous>, transform_indices = @transform_32, window_bounds = array<i64: 1, 128>}, {pipeline_mode = #tpu.pipeline_mode<synchronous>, transform_indices = @transform_33, window_bounds = array<i64: 1, 128>}, {pipeline_mode = #tpu.pipeline_mode<synchronous>, transform_indices = @transform_34, window_bounds = array<i64: 128, 128>}, {pipeline_mode = #tpu.pipeline_mode<synchronous>, transform_indices = @transform_35, window_bounds = array<i64: 1, 128>}, {transform_indices = @transform_36, window_bounds = array<i64: 2, 128>}]} {
    %cst = arith.constant 0.000000e+00 : bf16
    %0 = vector.broadcast %cst : bf16 to vector<2x16x128xbf16>
    %c0 = arith.constant 0 : index
    %c0_0 = arith.constant 0 : index
    %c0_1 = arith.constant 0 : index
    %1 = vector.load %arg38[%c0, %c0_0, %c0_1] : memref<2x48x128xbf16, #tpu.memory_space<vmem>>, vector<2x16x128xbf16>
    tpu.vector_store %arg38[%c0, %c0_0, %c0_1], %0 {strides = array<i32>} : memref<2x48x128xbf16, #tpu.memory_space<vmem>>, vector<2x16x128xbf16>,
    %cst_2 = arith.constant 0.000000e+00 : bf16
    %2 = vector.broadcast %cst_2 : bf16 to vector<2x16x128xbf16>
    %c0_3 = arith.constant 0 : index
    %c32 = arith.constant 32 : index
    %c0_4 = arith.constant 0 : index
    %3 = vector.load %arg38[%c0_3, %c32, %c0_4] : memref<2x48x128xbf16, #tpu.memory_space<vmem>>, vector<2x16x128xbf16>
    tpu.vector_store %arg38[%c0_3, %c32, %c0_4], %2 {strides = array<i32>} : memref<2x48x128xbf16, #tpu.memory_space<vmem>>, vector<2x16x128xbf16>,
    %c0_5 = arith.constant 0 : index
    %c0_6 = arith.constant 0 : index
    %c0_7 = arith.constant 0 : index
    %4 = vector.load %arg1[%c0_5, %c0_6, %c0_7] : memref<2x16x128xbf16, #tpu.memory_space<vmem>>, vector<2x16x128xbf16>
    %c0_8 = arith.constant 0 : index
    %c16 = arith.constant 16 : index
    %c0_9 = arith.constant 0 : index
    %5 = vector.load %arg38[%c0_8, %c16, %c0_9] : memref<2x48x128xbf16, #tpu.memory_space<vmem>>, vector<2x16x128xbf16>
    tpu.vector_store %arg38[%c0_8, %c16, %c0_9], %4 {strides = array<i32>} : memref<2x48x128xbf16, #tpu.memory_space<vmem>>, vector<2x16x128xbf16>,
    %c0_10 = arith.constant 0 : index
    %c16_11 = arith.constant 16 : index
    %c0_12 = arith.constant 0 : index
    %6 = vector.load %arg38[%c0_10, %c16_11, %c0_12] : memref<2x48x128xbf16, #tpu.memory_space<vmem>>, vector<2x16x128xbf16>
    %7 = vector.shape_cast %6 : vector<2x16x128xbf16> to vector<32x128xbf16>
    %c0_13 = arith.constant 0 : index
    %c0_14 = arith.constant 0 : index
    %8 = vector.load %arg11[%c0_13, %c0_14] : memref<128x128xbf16, #tpu.memory_space<vmem>>, vector<128x128xbf16>
    %cst_15 = arith.constant dense<0.000000e+00> : vector<32x128xf32>
    %9 = tpu.matmul %7, %8, %cst_15 {dimension_numbers = #tpu.dot_dimension_numbers<[1], [0], [0], [1], [0, 0, 1, 1], [], []>} : vector<32x128xbf16>, vector<128x128xbf16>, vector<32x128xf32> -> vector<32x128xf32>
    %c0_16 = arith.constant 0 : index
    %c0_17 = arith.constant 0 : index
    %10 = vector.load %arg12[%c0_16, %c0_17] : memref<1x128xf32, #tpu.memory_space<vmem>>, vector<1x128xf32>
    %11 = vector.broadcast %10 : vector<1x128xf32> to vector<32x128xf32>
    %12 = arith.mulf %9, %11 : vector<32x128xf32>
    %c0_18 = arith.constant 0 : index
    %c0_19 = arith.constant 0 : index
    %13 = vector.load %arg13[%c0_18, %c0_19] : memref<1x128xf32, #tpu.memory_space<vmem>>, vector<1x128xf32>
    %14 = vector.broadcast %13 : vector<1x128xf32> to vector<32x128xf32>
    %15 = arith.addf %12, %14 : vector<32x128xf32>
    %c0_20 = arith.constant 0 : index
    %c13 = arith.constant 13 : index
    %c0_21 = arith.constant 0 : index
    %16 = vector.load %arg38[%c0_20, %c13, %c0_21] : memref<2x48x128xbf16, #tpu.memory_space<vmem>>, vector<2x16x128xbf16>
    %c0_22 = arith.constant 0 : index
    %c14 = arith.constant 14 : index
    %c0_23 = arith.constant 0 : index
    %17 = vector.load %arg38[%c0_22, %c14, %c0_23] : memref<2x48x128xbf16, #tpu.memory_space<vmem>>, vector<2x16x128xbf16>
    %c0_24 = arith.constant 0 : index
    %c15 = arith.constant 15 : index
    %c0_25 = arith.constant 0 : index
    %18 = vector.load %arg38[%c0_24, %c15, %c0_25] : memref<2x48x128xbf16, #tpu.memory_space<vmem>>, vector<2x16x128xbf16>
    %c0_26 = arith.constant 0 : index
    %c16_27 = arith.constant 16 : index
    %c0_28 = arith.constant 0 : index
    %19 = vector.load %arg38[%c0_26, %c16_27, %c0_28] : memref<2x48x128xbf16, #tpu.memory_space<vmem>>, vector<2x16x128xbf16>
    %c0_29 = arith.constant 0 : index
    %c17 = arith.constant 17 : index
    %c0_30 = arith.constant 0 : index
    %20 = vector.load %arg38[%c0_29, %c17, %c0_30] : memref<2x48x128xbf16, #tpu.memory_space<vmem>>, vector<2x16x128xbf16>
    %c0_31 = arith.constant 0 : index
    %c18 = arith.constant 18 : index
    %c0_32 = arith.constant 0 : index
    %21 = vector.load %arg38[%c0_31, %c18, %c0_32] : memref<2x48x128xbf16, #tpu.memory_space<vmem>>, vector<2x16x128xbf16>
    %c0_33 = arith.constant 0 : index
    %c19 = arith.constant 19 : index
    %c0_34 = arith.constant 0 : index
    %22 = vector.load %arg38[%c0_33, %c19, %c0_34] : memref<2x48x128xbf16, #tpu.memory_space<vmem>>, vector<2x16x128xbf16>
    %c0_35 = arith.constant 0 : index
    %c20 = arith.constant 20 : index
    %c0_36 = arith.constant 0 : index
    %23 = vector.load %arg38[%c0_35, %c20, %c0_36] : memref<2x48x128xbf16, #tpu.memory_space<vmem>>, vector<2x16x128xbf16>
    %24 = tpu.concatenate %16, %17, %18, %19, %20, %21, %22, %23 in 2 : vector<2x16x128xbf16>, vector<2x16x128xbf16>, vector<2x16x128xbf16>, vector<2x16x128xbf16>, vector<2x16x128xbf16>, vector<2x16x128xbf16>, vector<2x16x128xbf16>, vector<2x16x128xbf16> -> vector<2x16x1024xbf16>
    %25 = vector.shape_cast %24 : vector<2x16x1024xbf16> to vector<32x1024xbf16>
    %c0_37 = arith.constant 0 : index
    %c0_38 = arith.constant 0 : index
    %26 = vector.load %arg2[%c0_37, %c0_38] : memref<1024x128xbf16, #tpu.memory_space<vmem>>, vector<1024x128xbf16>
    %cst_39 = arith.constant dense<0.000000e+00> : vector<32x128xf32>
    %27 = tpu.matmul %25, %26, %cst_39 {dimension_numbers = #tpu.dot_dimension_numbers<[1], [0], [0], [1], [0, 0, 1, 1], [], []>} : vector<32x1024xbf16>, vector<1024x128xbf16>, vector<32x128xf32> -> vector<32x128xf32>
    %c0_40 = arith.constant 0 : index
    %c0_41 = arith.constant 0 : index
    %28 = vector.load %arg3[%c0_40, %c0_41] : memref<1x128xf32, #tpu.memory_space<vmem>>, vector<1x128xf32>
    %29 = vector.broadcast %28 : vector<1x128xf32> to vector<32x128xf32>
    %30 = arith.mulf %27, %29 : vector<32x128xf32>
    %c0_42 = arith.constant 0 : index
    %c0_43 = arith.constant 0 : index
    %31 = vector.load %arg4[%c0_42, %c0_43] : memref<1x128xf32, #tpu.memory_space<vmem>>, vector<1x128xf32>
    %32 = vector.broadcast %31 : vector<1x128xf32> to vector<32x128xf32>
    %33 = arith.addf %30, %32 : vector<32x128xf32>
    %cst_44 = arith.constant 0.000000e+00 : f32
    %34 = vector.broadcast %cst_44 : f32 to vector<32x128xf32>
    %35 = arith.maximumf %33, %34 : vector<32x128xf32>
    %36 = vector.shape_cast %35 : vector<32x128xf32> to vector<2x16x128xf32>
    %37 = arith.truncf %36 : vector<2x16x128xf32> to vector<2x16x128xbf16>
    %c0_45 = arith.constant 0 : index
    %c16_46 = arith.constant 16 : index
    %c0_47 = arith.constant 0 : index
    %38 = vector.load %arg38[%c0_45, %c16_46, %c0_47] : memref<2x48x128xbf16, #tpu.memory_space<vmem>>, vector<2x16x128xbf16>
    tpu.vector_store %arg38[%c0_45, %c16_46, %c0_47], %37 {strides = array<i32>} : memref<2x48x128xbf16, #tpu.memory_space<vmem>>, vector<2x16x128xbf16>,
    %c0_48 = arith.constant 0 : index
    %c14_49 = arith.constant 14 : index
    %c0_50 = arith.constant 0 : index
    %39 = vector.load %arg38[%c0_48, %c14_49, %c0_50] : memref<2x48x128xbf16, #tpu.memory_space<vmem>>, vector<2x16x128xbf16>
    %c0_51 = arith.constant 0 : index
    %c15_52 = arith.constant 15 : index
    %c0_53 = arith.constant 0 : index
    %40 = vector.load %arg38[%c0_51, %c15_52, %c0_53] : memref<2x48x128xbf16, #tpu.memory_space<vmem>>, vector<2x16x128xbf16>
    %c0_54 = arith.constant 0 : index
    %c16_55 = arith.constant 16 : index
    %c0_56 = arith.constant 0 : index
    %41 = vector.load %arg38[%c0_54, %c16_55, %c0_56] : memref<2x48x128xbf16, #tpu.memory_space<vmem>>, vector<2x16x128xbf16>
    %c0_57 = arith.constant 0 : index
    %c17_58 = arith.constant 17 : index
    %c0_59 = arith.constant 0 : index
    %42 = vector.load %arg38[%c0_57, %c17_58, %c0_59] : memref<2x48x128xbf16, #tpu.memory_space<vmem>>, vector<2x16x128xbf16>
    %c0_60 = arith.constant 0 : index
    %c18_61 = arith.constant 18 : index
    %c0_62 = arith.constant 0 : index
    %43 = vector.load %arg38[%c0_60, %c18_61, %c0_62] : memref<2x48x128xbf16, #tpu.memory_space<vmem>>, vector<2x16x128xbf16>
    %44 = tpu.concatenate %39, %40, %41, %42, %43 in 2 : vector<2x16x128xbf16>, vector<2x16x128xbf16>, vector<2x16x128xbf16>, vector<2x16x128xbf16>, vector<2x16x128xbf16> -> vector<2x16x640xbf16>
    %45 = vector.shape_cast %44 : vector<2x16x640xbf16> to vector<32x640xbf16>
    %c0_63 = arith.constant 0 : index
    %c0_64 = arith.constant 0 : index
    %46 = vector.load %arg5[%c0_63, %c0_64] : memref<640x128xbf16, #tpu.memory_space<vmem>>, vector<640x128xbf16>
    %cst_65 = arith.constant dense<0.000000e+00> : vector<32x128xf32>
    %47 = tpu.matmul %45, %46, %cst_65 {dimension_numbers = #tpu.dot_dimension_numbers<[1], [0], [0], [1], [0, 0, 1, 1], [], []>} : vector<32x640xbf16>, vector<640x128xbf16>, vector<32x128xf32> -> vector<32x128xf32>
    %c0_66 = arith.constant 0 : index
    %c0_67 = arith.constant 0 : index
    %48 = vector.load %arg6[%c0_66, %c0_67] : memref<1x128xf32, #tpu.memory_space<vmem>>, vector<1x128xf32>
    %49 = vector.broadcast %48 : vector<1x128xf32> to vector<32x128xf32>
    %50 = arith.mulf %47, %49 : vector<32x128xf32>
    %c0_68 = arith.constant 0 : index
    %c0_69 = arith.constant 0 : index
    %51 = vector.load %arg7[%c0_68, %c0_69] : memref<1x128xf32, #tpu.memory_space<vmem>>, vector<1x128xf32>
    %52 = vector.broadcast %51 : vector<1x128xf32> to vector<32x128xf32>
    %53 = arith.addf %50, %52 : vector<32x128xf32>
    %cst_70 = arith.constant 0.000000e+00 : f32
    %54 = vector.broadcast %cst_70 : f32 to vector<32x128xf32>
    %55 = arith.maximumf %53, %54 : vector<32x128xf32>
    %56 = vector.shape_cast %55 : vector<32x128xf32> to vector<2x16x128xf32>
    %57 = arith.truncf %56 : vector<2x16x128xf32> to vector<2x16x128xbf16>
    %c0_71 = arith.constant 0 : index
    %c16_72 = arith.constant 16 : index
    %c0_73 = arith.constant 0 : index
    %58 = vector.load %arg38[%c0_71, %c16_72, %c0_73] : memref<2x48x128xbf16, #tpu.memory_space<vmem>>, vector<2x16x128xbf16>
    tpu.vector_store %arg38[%c0_71, %c16_72, %c0_73], %57 {strides = array<i32>} : memref<2x48x128xbf16, #tpu.memory_space<vmem>>, vector<2x16x128xbf16>,
    %c0_74 = arith.constant 0 : index
    %c15_75 = arith.constant 15 : index
    %c0_76 = arith.constant 0 : index
    %59 = vector.load %arg38[%c0_74, %c15_75, %c0_76] : memref<2x48x128xbf16, #tpu.memory_space<vmem>>, vector<2x16x128xbf16>
    %c0_77 = arith.constant 0 : index
    %c16_78 = arith.constant 16 : index
    %c0_79 = arith.constant 0 : index
    %60 = vector.load %arg38[%c0_77, %c16_78, %c0_79] : memref<2x48x128xbf16, #tpu.memory_space<vmem>>, vector<2x16x128xbf16>
    %c0_80 = arith.constant 0 : index
    %c17_81 = arith.constant 17 : index
    %c0_82 = arith.constant 0 : index
    %61 = vector.load %arg38[%c0_80, %c17_81, %c0_82] : memref<2x48x128xbf16, #tpu.memory_space<vmem>>, vector<2x16x128xbf16>
    %62 = tpu.concatenate %59, %60, %61 in 2 : vector<2x16x128xbf16>, vector<2x16x128xbf16>, vector<2x16x128xbf16> -> vector<2x16x384xbf16>
    %63 = vector.shape_cast %62 : vector<2x16x384xbf16> to vector<32x384xbf16>
    %c0_83 = arith.constant 0 : index
    %c0_84 = arith.constant 0 : index
    %64 = vector.load %arg8[%c0_83, %c0_84] : memref<384x128xbf16, #tpu.memory_space<vmem>>, vector<384x128xbf16>
    %cst_85 = arith.constant dense<0.000000e+00> : vector<32x128xf32>
    %65 = tpu.matmul %63, %64, %cst_85 {dimension_numbers = #tpu.dot_dimension_numbers<[1], [0], [0], [1], [0, 0, 1, 1], [], []>} : vector<32x384xbf16>, vector<384x128xbf16>, vector<32x128xf32> -> vector<32x128xf32>
    %c0_86 = arith.constant 0 : index
    %c0_87 = arith.constant 0 : index
    %66 = vector.load %arg9[%c0_86, %c0_87] : memref<1x128xf32, #tpu.memory_space<vmem>>, vector<1x128xf32>
    %67 = vector.broadcast %66 : vector<1x128xf32> to vector<32x128xf32>
    %68 = arith.mulf %65, %67 : vector<32x128xf32>
    %c0_88 = arith.constant 0 : index
    %c0_89 = arith.constant 0 : index
    %69 = vector.load %arg10[%c0_88, %c0_89] : memref<1x128xf32, #tpu.memory_space<vmem>>, vector<1x128xf32>
    %70 = vector.broadcast %69 : vector<1x128xf32> to vector<32x128xf32>
    %71 = arith.addf %68, %70 : vector<32x128xf32>
    %cst_90 = arith.constant 0.000000e+00 : f32
    %72 = vector.broadcast %cst_90 : f32 to vector<32x128xf32>
    %73 = arith.maximumf %71, %72 : vector<32x128xf32>
    %74 = arith.addf %73, %15 : vector<32x128xf32>
    %75 = vector.shape_cast %74 : vector<32x128xf32> to vector<2x16x128xf32>
    %76 = arith.truncf %75 : vector<2x16x128xf32> to vector<2x16x128xbf16>
    %c0_91 = arith.constant 0 : index
    %c16_92 = arith.constant 16 : index
    %c0_93 = arith.constant 0 : index
    %77 = vector.load %arg38[%c0_91, %c16_92, %c0_93] : memref<2x48x128xbf16, #tpu.memory_space<vmem>>, vector<2x16x128xbf16>
    tpu.vector_store %arg38[%c0_91, %c16_92, %c0_93], %76 {strides = array<i32>} : memref<2x48x128xbf16, #tpu.memory_space<vmem>>, vector<2x16x128xbf16>,
    %c0_94 = arith.constant 0 : index
    %c16_95 = arith.constant 16 : index
    %c0_96 = arith.constant 0 : index
    %78 = vector.load %arg38[%c0_94, %c16_95, %c0_96] : memref<2x48x128xbf16, #tpu.memory_space<vmem>>, vector<2x16x128xbf16>
    %79 = vector.shape_cast %78 : vector<2x16x128xbf16> to vector<32x128xbf16>
    %c0_97 = arith.constant 0 : index
    %c0_98 = arith.constant 0 : index
    %80 = vector.load %arg23[%c0_97, %c0_98] : memref<128x128xbf16, #tpu.memory_space<vmem>>, vector<128x128xbf16>
    %cst_99 = arith.constant dense<0.000000e+00> : vector<32x128xf32>
    %81 = tpu.matmul %79, %80, %cst_99 {dimension_numbers = #tpu.dot_dimension_numbers<[1], [0], [0], [1], [0, 0, 1, 1], [], []>} : vector<32x128xbf16>, vector<128x128xbf16>, vector<32x128xf32> -> vector<32x128xf32>
    %c0_100 = arith.constant 0 : index
    %c0_101 = arith.constant 0 : index
    %82 = vector.load %arg24[%c0_100, %c0_101] : memref<1x128xf32, #tpu.memory_space<vmem>>, vector<1x128xf32>
    %83 = vector.broadcast %82 : vector<1x128xf32> to vector<32x128xf32>
    %84 = arith.mulf %81, %83 : vector<32x128xf32>
    %c0_102 = arith.constant 0 : index
    %c0_103 = arith.constant 0 : index
    %85 = vector.load %arg25[%c0_102, %c0_103] : memref<1x128xf32, #tpu.memory_space<vmem>>, vector<1x128xf32>
    %86 = vector.broadcast %85 : vector<1x128xf32> to vector<32x128xf32>
    %87 = arith.addf %84, %86 : vector<32x128xf32>
    %c0_104 = arith.constant 0 : index
    %c13_105 = arith.constant 13 : index
    %c0_106 = arith.constant 0 : index
    %88 = vector.load %arg38[%c0_104, %c13_105, %c0_106] : memref<2x48x128xbf16, #tpu.memory_space<vmem>>, vector<2x16x128xbf16>
    %c0_107 = arith.constant 0 : index
    %c14_108 = arith.constant 14 : index
    %c0_109 = arith.constant 0 : index
    %89 = vector.load %arg38[%c0_107, %c14_108, %c0_109] : memref<2x48x128xbf16, #tpu.memory_space<vmem>>, vector<2x16x128xbf16>
    %c0_110 = arith.constant 0 : index
    %c15_111 = arith.constant 15 : index
    %c0_112 = arith.constant 0 : index
    %90 = vector.load %arg38[%c0_110, %c15_111, %c0_112] : memref<2x48x128xbf16, #tpu.memory_space<vmem>>, vector<2x16x128xbf16>
    %c0_113 = arith.constant 0 : index
    %c16_114 = arith.constant 16 : index
    %c0_115 = arith.constant 0 : index
    %91 = vector.load %arg38[%c0_113, %c16_114, %c0_115] : memref<2x48x128xbf16, #tpu.memory_space<vmem>>, vector<2x16x128xbf16>
    %c0_116 = arith.constant 0 : index
    %c17_117 = arith.constant 17 : index
    %c0_118 = arith.constant 0 : index
    %92 = vector.load %arg38[%c0_116, %c17_117, %c0_118] : memref<2x48x128xbf16, #tpu.memory_space<vmem>>, vector<2x16x128xbf16>
    %c0_119 = arith.constant 0 : index
    %c18_120 = arith.constant 18 : index
    %c0_121 = arith.constant 0 : index
    %93 = vector.load %arg38[%c0_119, %c18_120, %c0_121] : memref<2x48x128xbf16, #tpu.memory_space<vmem>>, vector<2x16x128xbf16>
    %c0_122 = arith.constant 0 : index
    %c19_123 = arith.constant 19 : index
    %c0_124 = arith.constant 0 : index
    %94 = vector.load %arg38[%c0_122, %c19_123, %c0_124] : memref<2x48x128xbf16, #tpu.memory_space<vmem>>, vector<2x16x128xbf16>
    %c0_125 = arith.constant 0 : index
    %c20_126 = arith.constant 20 : index
    %c0_127 = arith.constant 0 : index
    %95 = vector.load %arg38[%c0_125, %c20_126, %c0_127] : memref<2x48x128xbf16, #tpu.memory_space<vmem>>, vector<2x16x128xbf16>
    %96 = tpu.concatenate %88, %89, %90, %91, %92, %93, %94, %95 in 2 : vector<2x16x128xbf16>, vector<2x16x128xbf16>, vector<2x16x128xbf16>, vector<2x16x128xbf16>, vector<2x16x128xbf16>, vector<2x16x128xbf16>, vector<2x16x128xbf16>, vector<2x16x128xbf16> -> vector<2x16x1024xbf16>
    %97 = vector.shape_cast %96 : vector<2x16x1024xbf16> to vector<32x1024xbf16>
    %c0_128 = arith.constant 0 : index
    %c0_129 = arith.constant 0 : index
    %98 = vector.load %arg14[%c0_128, %c0_129] : memref<1024x128xbf16, #tpu.memory_space<vmem>>, vector<1024x128xbf16>
    %cst_130 = arith.constant dense<0.000000e+00> : vector<32x128xf32>
    %99 = tpu.matmul %97, %98, %cst_130 {dimension_numbers = #tpu.dot_dimension_numbers<[1], [0], [0], [1], [0, 0, 1, 1], [], []>} : vector<32x1024xbf16>, vector<1024x128xbf16>, vector<32x128xf32> -> vector<32x128xf32>
    %c0_131 = arith.constant 0 : index
    %c0_132 = arith.constant 0 : index
    %100 = vector.load %arg15[%c0_131, %c0_132] : memref<1x128xf32, #tpu.memory_space<vmem>>, vector<1x128xf32>
    %101 = vector.broadcast %100 : vector<1x128xf32> to vector<32x128xf32>
    %102 = arith.mulf %99, %101 : vector<32x128xf32>
    %c0_133 = arith.constant 0 : index
    %c0_134 = arith.constant 0 : index
    %103 = vector.load %arg16[%c0_133, %c0_134] : memref<1x128xf32, #tpu.memory_space<vmem>>, vector<1x128xf32>
    %104 = vector.broadcast %103 : vector<1x128xf32> to vector<32x128xf32>
    %105 = arith.addf %102, %104 : vector<32x128xf32>
    %cst_135 = arith.constant 0.000000e+00 : f32
    %106 = vector.broadcast %cst_135 : f32 to vector<32x128xf32>
    %107 = arith.maximumf %105, %106 : vector<32x128xf32>
    %108 = vector.shape_cast %107 : vector<32x128xf32> to vector<2x16x128xf32>
    %109 = arith.truncf %108 : vector<2x16x128xf32> to vector<2x16x128xbf16>
    %c0_136 = arith.constant 0 : index
    %c16_137 = arith.constant 16 : index
    %c0_138 = arith.constant 0 : index
    %110 = vector.load %arg38[%c0_136, %c16_137, %c0_138] : memref<2x48x128xbf16, #tpu.memory_space<vmem>>, vector<2x16x128xbf16>
    tpu.vector_store %arg38[%c0_136, %c16_137, %c0_138], %109 {strides = array<i32>} : memref<2x48x128xbf16, #tpu.memory_space<vmem>>, vector<2x16x128xbf16>,
    %c0_139 = arith.constant 0 : index
    %c14_140 = arith.constant 14 : index
    %c0_141 = arith.constant 0 : index
    %111 = vector.load %arg38[%c0_139, %c14_140, %c0_141] : memref<2x48x128xbf16, #tpu.memory_space<vmem>>, vector<2x16x128xbf16>
    %c0_142 = arith.constant 0 : index
    %c15_143 = arith.constant 15 : index
    %c0_144 = arith.constant 0 : index
    %112 = vector.load %arg38[%c0_142, %c15_143, %c0_144] : memref<2x48x128xbf16, #tpu.memory_space<vmem>>, vector<2x16x128xbf16>
    %c0_145 = arith.constant 0 : index
    %c16_146 = arith.constant 16 : index
    %c0_147 = arith.constant 0 : index
    %113 = vector.load %arg38[%c0_145, %c16_146, %c0_147] : memref<2x48x128xbf16, #tpu.memory_space<vmem>>, vector<2x16x128xbf16>
    %c0_148 = arith.constant 0 : index
    %c17_149 = arith.constant 17 : index
    %c0_150 = arith.constant 0 : index
    %114 = vector.load %arg38[%c0_148, %c17_149, %c0_150] : memref<2x48x128xbf16, #tpu.memory_space<vmem>>, vector<2x16x128xbf16>
    %c0_151 = arith.constant 0 : index
    %c18_152 = arith.constant 18 : index
    %c0_153 = arith.constant 0 : index
    %115 = vector.load %arg38[%c0_151, %c18_152, %c0_153] : memref<2x48x128xbf16, #tpu.memory_space<vmem>>, vector<2x16x128xbf16>
    %116 = tpu.concatenate %111, %112, %113, %114, %115 in 2 : vector<2x16x128xbf16>, vector<2x16x128xbf16>, vector<2x16x128xbf16>, vector<2x16x128xbf16>, vector<2x16x128xbf16> -> vector<2x16x640xbf16>
    %117 = vector.shape_cast %116 : vector<2x16x640xbf16> to vector<32x640xbf16>
    %c0_154 = arith.constant 0 : index
    %c0_155 = arith.constant 0 : index
    %118 = vector.load %arg17[%c0_154, %c0_155] : memref<640x128xbf16, #tpu.memory_space<vmem>>, vector<640x128xbf16>
    %cst_156 = arith.constant dense<0.000000e+00> : vector<32x128xf32>
    %119 = tpu.matmul %117, %118, %cst_156 {dimension_numbers = #tpu.dot_dimension_numbers<[1], [0], [0], [1], [0, 0, 1, 1], [], []>} : vector<32x640xbf16>, vector<640x128xbf16>, vector<32x128xf32> -> vector<32x128xf32>
    %c0_157 = arith.constant 0 : index
    %c0_158 = arith.constant 0 : index
    %120 = vector.load %arg18[%c0_157, %c0_158] : memref<1x128xf32, #tpu.memory_space<vmem>>, vector<1x128xf32>
    %121 = vector.broadcast %120 : vector<1x128xf32> to vector<32x128xf32>
    %122 = arith.mulf %119, %121 : vector<32x128xf32>
    %c0_159 = arith.constant 0 : index
    %c0_160 = arith.constant 0 : index
    %123 = vector.load %arg19[%c0_159, %c0_160] : memref<1x128xf32, #tpu.memory_space<vmem>>, vector<1x128xf32>
    %124 = vector.broadcast %123 : vector<1x128xf32> to vector<32x128xf32>
    %125 = arith.addf %122, %124 : vector<32x128xf32>
    %cst_161 = arith.constant 0.000000e+00 : f32
    %126 = vector.broadcast %cst_161 : f32 to vector<32x128xf32>
    %127 = arith.maximumf %125, %126 : vector<32x128xf32>
    %128 = vector.shape_cast %127 : vector<32x128xf32> to vector<2x16x128xf32>
    %129 = arith.truncf %128 : vector<2x16x128xf32> to vector<2x16x128xbf16>
    %c0_162 = arith.constant 0 : index
    %c16_163 = arith.constant 16 : index
    %c0_164 = arith.constant 0 : index
    %130 = vector.load %arg38[%c0_162, %c16_163, %c0_164] : memref<2x48x128xbf16, #tpu.memory_space<vmem>>, vector<2x16x128xbf16>
    tpu.vector_store %arg38[%c0_162, %c16_163, %c0_164], %129 {strides = array<i32>} : memref<2x48x128xbf16, #tpu.memory_space<vmem>>, vector<2x16x128xbf16>,
    %c0_165 = arith.constant 0 : index
    %c15_166 = arith.constant 15 : index
    %c0_167 = arith.constant 0 : index
    %131 = vector.load %arg38[%c0_165, %c15_166, %c0_167] : memref<2x48x128xbf16, #tpu.memory_space<vmem>>, vector<2x16x128xbf16>
    %c0_168 = arith.constant 0 : index
    %c16_169 = arith.constant 16 : index
    %c0_170 = arith.constant 0 : index
    %132 = vector.load %arg38[%c0_168, %c16_169, %c0_170] : memref<2x48x128xbf16, #tpu.memory_space<vmem>>, vector<2x16x128xbf16>
    %c0_171 = arith.constant 0 : index
    %c17_172 = arith.constant 17 : index
    %c0_173 = arith.constant 0 : index
    %133 = vector.load %arg38[%c0_171, %c17_172, %c0_173] : memref<2x48x128xbf16, #tpu.memory_space<vmem>>, vector<2x16x128xbf16>
    %134 = tpu.concatenate %131, %132, %133 in 2 : vector<2x16x128xbf16>, vector<2x16x128xbf16>, vector<2x16x128xbf16> -> vector<2x16x384xbf16>
    %135 = vector.shape_cast %134 : vector<2x16x384xbf16> to vector<32x384xbf16>
    %c0_174 = arith.constant 0 : index
    %c0_175 = arith.constant 0 : index
    %136 = vector.load %arg20[%c0_174, %c0_175] : memref<384x128xbf16, #tpu.memory_space<vmem>>, vector<384x128xbf16>
    %cst_176 = arith.constant dense<0.000000e+00> : vector<32x128xf32>
    %137 = tpu.matmul %135, %136, %cst_176 {dimension_numbers = #tpu.dot_dimension_numbers<[1], [0], [0], [1], [0, 0, 1, 1], [], []>} : vector<32x384xbf16>, vector<384x128xbf16>, vector<32x128xf32> -> vector<32x128xf32>
    %c0_177 = arith.constant 0 : index
    %c0_178 = arith.constant 0 : index
    %138 = vector.load %arg21[%c0_177, %c0_178] : memref<1x128xf32, #tpu.memory_space<vmem>>, vector<1x128xf32>
    %139 = vector.broadcast %138 : vector<1x128xf32> to vector<32x128xf32>
    %140 = arith.mulf %137, %139 : vector<32x128xf32>
    %c0_179 = arith.constant 0 : index
    %c0_180 = arith.constant 0 : index
    %141 = vector.load %arg22[%c0_179, %c0_180] : memref<1x128xf32, #tpu.memory_space<vmem>>, vector<1x128xf32>
    %142 = vector.broadcast %141 : vector<1x128xf32> to vector<32x128xf32>
    %143 = arith.addf %140, %142 : vector<32x128xf32>
    %cst_181 = arith.constant 0.000000e+00 : f32
    %144 = vector.broadcast %cst_181 : f32 to vector<32x128xf32>
    %145 = arith.maximumf %143, %144 : vector<32x128xf32>
    %146 = arith.addf %145, %87 : vector<32x128xf32>
    %147 = vector.shape_cast %146 : vector<32x128xf32> to vector<2x16x128xf32>
    %148 = arith.truncf %147 : vector<2x16x128xf32> to vector<2x16x128xbf16>
    %c0_182 = arith.constant 0 : index
    %c16_183 = arith.constant 16 : index
    %c0_184 = arith.constant 0 : index
    %149 = vector.load %arg38[%c0_182, %c16_183, %c0_184] : memref<2x48x128xbf16, #tpu.memory_space<vmem>>, vector<2x16x128xbf16>
    tpu.vector_store %arg38[%c0_182, %c16_183, %c0_184], %148 {strides = array<i32>} : memref<2x48x128xbf16, #tpu.memory_space<vmem>>, vector<2x16x128xbf16>,
    %c0_185 = arith.constant 0 : index
    %c13_186 = arith.constant 13 : index
    %c0_187 = arith.constant 0 : index
    %150 = vector.load %arg38[%c0_185, %c13_186, %c0_187] : memref<2x48x128xbf16, #tpu.memory_space<vmem>>, vector<2x16x128xbf16>
    %c0_188 = arith.constant 0 : index
    %c14_189 = arith.constant 14 : index
    %c0_190 = arith.constant 0 : index
    %151 = vector.load %arg38[%c0_188, %c14_189, %c0_190] : memref<2x48x128xbf16, #tpu.memory_space<vmem>>, vector<2x16x128xbf16>
    %c0_191 = arith.constant 0 : index
    %c15_192 = arith.constant 15 : index
    %c0_193 = arith.constant 0 : index
    %152 = vector.load %arg38[%c0_191, %c15_192, %c0_193] : memref<2x48x128xbf16, #tpu.memory_space<vmem>>, vector<2x16x128xbf16>
    %c0_194 = arith.constant 0 : index
    %c16_195 = arith.constant 16 : index
    %c0_196 = arith.constant 0 : index
    %153 = vector.load %arg38[%c0_194, %c16_195, %c0_196] : memref<2x48x128xbf16, #tpu.memory_space<vmem>>, vector<2x16x128xbf16>
    %c0_197 = arith.constant 0 : index
    %c17_198 = arith.constant 17 : index
    %c0_199 = arith.constant 0 : index
    %154 = vector.load %arg38[%c0_197, %c17_198, %c0_199] : memref<2x48x128xbf16, #tpu.memory_space<vmem>>, vector<2x16x128xbf16>
    %c0_200 = arith.constant 0 : index
    %c18_201 = arith.constant 18 : index
    %c0_202 = arith.constant 0 : index
    %155 = vector.load %arg38[%c0_200, %c18_201, %c0_202] : memref<2x48x128xbf16, #tpu.memory_space<vmem>>, vector<2x16x128xbf16>
    %c0_203 = arith.constant 0 : index
    %c19_204 = arith.constant 19 : index
    %c0_205 = arith.constant 0 : index
    %156 = vector.load %arg38[%c0_203, %c19_204, %c0_205] : memref<2x48x128xbf16, #tpu.memory_space<vmem>>, vector<2x16x128xbf16>
    %c0_206 = arith.constant 0 : index
    %c20_207 = arith.constant 20 : index
    %c0_208 = arith.constant 0 : index
    %157 = vector.load %arg38[%c0_206, %c20_207, %c0_208] : memref<2x48x128xbf16, #tpu.memory_space<vmem>>, vector<2x16x128xbf16>
    %158 = tpu.concatenate %150, %151, %152, %153, %154, %155, %156, %157 in 2 : vector<2x16x128xbf16>, vector<2x16x128xbf16>, vector<2x16x128xbf16>, vector<2x16x128xbf16>, vector<2x16x128xbf16>, vector<2x16x128xbf16>, vector<2x16x128xbf16>, vector<2x16x128xbf16> -> vector<2x16x1024xbf16>
    %159 = vector.shape_cast %158 : vector<2x16x1024xbf16> to vector<32x1024xbf16>
    %c0_209 = arith.constant 0 : index
    %c0_210 = arith.constant 0 : index
    %160 = vector.load %arg26[%c0_209, %c0_210] : memref<1024x128xbf16, #tpu.memory_space<vmem>>, vector<1024x128xbf16>
    %cst_211 = arith.constant dense<0.000000e+00> : vector<32x128xf32>
    %161 = tpu.matmul %159, %160, %cst_211 {dimension_numbers = #tpu.dot_dimension_numbers<[1], [0], [0], [1], [0, 0, 1, 1], [], []>} : vector<32x1024xbf16>, vector<1024x128xbf16>, vector<32x128xf32> -> vector<32x128xf32>
    %c0_212 = arith.constant 0 : index
    %c0_213 = arith.constant 0 : index
    %162 = vector.load %arg27[%c0_212, %c0_213] : memref<1x128xf32, #tpu.memory_space<vmem>>, vector<1x128xf32>
    %163 = vector.broadcast %162 : vector<1x128xf32> to vector<32x128xf32>
    %164 = arith.mulf %161, %163 : vector<32x128xf32>
    %c0_214 = arith.constant 0 : index
    %c0_215 = arith.constant 0 : index
    %165 = vector.load %arg28[%c0_214, %c0_215] : memref<1x128xf32, #tpu.memory_space<vmem>>, vector<1x128xf32>
    %166 = vector.broadcast %165 : vector<1x128xf32> to vector<32x128xf32>
    %167 = arith.addf %164, %166 : vector<32x128xf32>
    %cst_216 = arith.constant 0.000000e+00 : f32
    %168 = vector.broadcast %cst_216 : f32 to vector<32x128xf32>
    %169 = arith.maximumf %167, %168 : vector<32x128xf32>
    %170 = vector.shape_cast %169 : vector<32x128xf32> to vector<2x16x128xf32>
    %171 = arith.truncf %170 : vector<2x16x128xf32> to vector<2x16x128xbf16>
    %c0_217 = arith.constant 0 : index
    %c16_218 = arith.constant 16 : index
    %c0_219 = arith.constant 0 : index
    %172 = vector.load %arg38[%c0_217, %c16_218, %c0_219] : memref<2x48x128xbf16, #tpu.memory_space<vmem>>, vector<2x16x128xbf16>
    tpu.vector_store %arg38[%c0_217, %c16_218, %c0_219], %171 {strides = array<i32>} : memref<2x48x128xbf16, #tpu.memory_space<vmem>>, vector<2x16x128xbf16>,
    %c0_220 = arith.constant 0 : index
    %c14_221 = arith.constant 14 : index
    %c0_222 = arith.constant 0 : index
    %173 = vector.load %arg38[%c0_220, %c14_221, %c0_222] : memref<2x48x128xbf16, #tpu.memory_space<vmem>>, vector<2x16x128xbf16>
    %c0_223 = arith.constant 0 : index
    %c15_224 = arith.constant 15 : index
    %c0_225 = arith.constant 0 : index
    %174 = vector.load %arg38[%c0_223, %c15_224, %c0_225] : memref<2x48x128xbf16, #tpu.memory_space<vmem>>, vector<2x16x128xbf16>
    %c0_226 = arith.constant 0 : index
    %c16_227 = arith.constant 16 : index
    %c0_228 = arith.constant 0 : index
    %175 = vector.load %arg38[%c0_226, %c16_227, %c0_228] : memref<2x48x128xbf16, #tpu.memory_space<vmem>>, vector<2x16x128xbf16>
    %c0_229 = arith.constant 0 : index
    %c17_230 = arith.constant 17 : index
    %c0_231 = arith.constant 0 : index
    %176 = vector.load %arg38[%c0_229, %c17_230, %c0_231] : memref<2x48x128xbf16, #tpu.memory_space<vmem>>, vector<2x16x128xbf16>
    %c0_232 = arith.constant 0 : index
    %c18_233 = arith.constant 18 : index
    %c0_234 = arith.constant 0 : index
    %177 = vector.load %arg38[%c0_232, %c18_233, %c0_234] : memref<2x48x128xbf16, #tpu.memory_space<vmem>>, vector<2x16x128xbf16>
    %178 = tpu.concatenate %173, %174, %175, %176, %177 in 2 : vector<2x16x128xbf16>, vector<2x16x128xbf16>, vector<2x16x128xbf16>, vector<2x16x128xbf16>, vector<2x16x128xbf16> -> vector<2x16x640xbf16>
    %179 = vector.shape_cast %178 : vector<2x16x640xbf16> to vector<32x640xbf16>
    %c0_235 = arith.constant 0 : index
    %c0_236 = arith.constant 0 : index
    %180 = vector.load %arg29[%c0_235, %c0_236] : memref<640x128xbf16, #tpu.memory_space<vmem>>, vector<640x128xbf16>
    %cst_237 = arith.constant dense<0.000000e+00> : vector<32x128xf32>
    %181 = tpu.matmul %179, %180, %cst_237 {dimension_numbers = #tpu.dot_dimension_numbers<[1], [0], [0], [1], [0, 0, 1, 1], [], []>} : vector<32x640xbf16>, vector<640x128xbf16>, vector<32x128xf32> -> vector<32x128xf32>
    %c0_238 = arith.constant 0 : index
    %c0_239 = arith.constant 0 : index
    %182 = vector.load %arg30[%c0_238, %c0_239] : memref<1x128xf32, #tpu.memory_space<vmem>>, vector<1x128xf32>
    %183 = vector.broadcast %182 : vector<1x128xf32> to vector<32x128xf32>
    %184 = arith.mulf %181, %183 : vector<32x128xf32>
    %c0_240 = arith.constant 0 : index
    %c0_241 = arith.constant 0 : index
    %185 = vector.load %arg31[%c0_240, %c0_241] : memref<1x128xf32, #tpu.memory_space<vmem>>, vector<1x128xf32>
    %186 = vector.broadcast %185 : vector<1x128xf32> to vector<32x128xf32>
    %187 = arith.addf %184, %186 : vector<32x128xf32>
    %cst_242 = arith.constant 0.000000e+00 : f32
    %188 = vector.broadcast %cst_242 : f32 to vector<32x128xf32>
    %189 = arith.maximumf %187, %188 : vector<32x128xf32>
    %190 = vector.shape_cast %189 : vector<32x128xf32> to vector<2x16x128xf32>
    %191 = arith.truncf %190 : vector<2x16x128xf32> to vector<2x16x128xbf16>
    %c0_243 = arith.constant 0 : index
    %c16_244 = arith.constant 16 : index
    %c0_245 = arith.constant 0 : index
    %192 = vector.load %arg38[%c0_243, %c16_244, %c0_245] : memref<2x48x128xbf16, #tpu.memory_space<vmem>>, vector<2x16x128xbf16>
    tpu.vector_store %arg38[%c0_243, %c16_244, %c0_245], %191 {strides = array<i32>} : memref<2x48x128xbf16, #tpu.memory_space<vmem>>, vector<2x16x128xbf16>,
    %c0_246 = arith.constant 0 : index
    %c15_247 = arith.constant 15 : index
    %c0_248 = arith.constant 0 : index
    %193 = vector.load %arg38[%c0_246, %c15_247, %c0_248] : memref<2x48x128xbf16, #tpu.memory_space<vmem>>, vector<2x16x128xbf16>
    %c0_249 = arith.constant 0 : index
    %c16_250 = arith.constant 16 : index
    %c0_251 = arith.constant 0 : index
    %194 = vector.load %arg38[%c0_249, %c16_250, %c0_251] : memref<2x48x128xbf16, #tpu.memory_space<vmem>>, vector<2x16x128xbf16>
    %c0_252 = arith.constant 0 : index
    %c17_253 = arith.constant 17 : index
    %c0_254 = arith.constant 0 : index
    %195 = vector.load %arg38[%c0_252, %c17_253, %c0_254] : memref<2x48x128xbf16, #tpu.memory_space<vmem>>, vector<2x16x128xbf16>
    %196 = tpu.concatenate %193, %194, %195 in 2 : vector<2x16x128xbf16>, vector<2x16x128xbf16>, vector<2x16x128xbf16> -> vector<2x16x384xbf16>
    %197 = vector.shape_cast %196 : vector<2x16x384xbf16> to vector<32x384xbf16>
    %c0_255 = arith.constant 0 : index
    %c0_256 = arith.constant 0 : index
    %198 = vector.load %arg32[%c0_255, %c0_256] : memref<384x128xbf16, #tpu.memory_space<vmem>>, vector<384x128xbf16>
    %cst_257 = arith.constant dense<0.000000e+00> : vector<32x128xf32>
    %199 = tpu.matmul %197, %198, %cst_257 {dimension_numbers = #tpu.dot_dimension_numbers<[1], [0], [0], [1], [0, 0, 1, 1], [], []>} : vector<32x384xbf16>, vector<384x128xbf16>, vector<32x128xf32> -> vector<32x128xf32>
    %c0_258 = arith.constant 0 : index
    %c0_259 = arith.constant 0 : index
    %200 = vector.load %arg33[%c0_258, %c0_259] : memref<1x128xf32, #tpu.memory_space<vmem>>, vector<1x128xf32>
    %201 = vector.broadcast %200 : vector<1x128xf32> to vector<32x128xf32>
    %202 = arith.mulf %199, %201 : vector<32x128xf32>
    %c0_260 = arith.constant 0 : index
    %c0_261 = arith.constant 0 : index
    %203 = vector.load %arg34[%c0_260, %c0_261] : memref<1x128xf32, #tpu.memory_space<vmem>>, vector<1x128xf32>
    %204 = vector.broadcast %203 : vector<1x128xf32> to vector<32x128xf32>
    %205 = arith.addf %202, %204 : vector<32x128xf32>
    %cst_262 = arith.constant 0.000000e+00 : f32
    %206 = vector.broadcast %cst_262 : f32 to vector<32x128xf32>
    %207 = arith.maximumf %205, %206 : vector<32x128xf32>
    %208 = vector.shape_cast %207 : vector<32x128xf32> to vector<2x16x128xf32>
    %cst_263 = arith.constant dense<0.000000e+00> : vector<2x128xf32>
    %209 = vector.multi_reduction <add>, %208, %cst_263 [1] : vector<2x16x128xf32> to vector<2x128xf32>
    %cst_264 = arith.constant 6.250000e-02 : f32
    %210 = vector.broadcast %cst_264 : f32 to vector<2x128xf32>
    %211 = arith.mulf %209, %210 : vector<2x128xf32>
    %212 = arith.truncf %211 : vector<2x128xf32> to vector<2x128xbf16>
    %c0_265 = arith.constant 0 : index
    %c0_266 = arith.constant 0 : index
    %213 = vector.load %arg35[%c0_265, %c0_266] : memref<128x128xbf16, #tpu.memory_space<vmem>>, vector<128x128xbf16>
    %cst_267 = arith.constant dense<0.000000e+00> : vector<2x128xf32>
    %214 = tpu.matmul %212, %213, %cst_267 {dimension_numbers = #tpu.dot_dimension_numbers<[1], [0], [0], [1], [0, 0, 1, 1], [], []>} : vector<2x128xbf16>, vector<128x128xbf16>, vector<2x128xf32> -> vector<2x128xf32>
    %c0_268 = arith.constant 0 : index
    %c0_269 = arith.constant 0 : index
    %215 = vector.load %arg36[%c0_268, %c0_269] : memref<1x128xf32, #tpu.memory_space<vmem>>, vector<1x128xf32>
    %216 = vector.broadcast %215 : vector<1x128xf32> to vector<2x128xf32>
    %217 = arith.addf %214, %216 : vector<2x128xf32>
    %c0_270 = arith.constant 0 : index
    %c0_271 = arith.constant 0 : index
    %218 = vector.load %arg37[%c0_270, %c0_271] : memref<2x128xf32, #tpu.memory_space<vmem>>, vector<2x128xf32>
    tpu.vector_store %arg37[%c0_270, %c0_271], %217 {strides = array<i32>} : memref<2x128xf32, #tpu.memory_space<vmem>>, vector<2x128xf32>,
    return
  }
  func.func @transform_0(%arg0: i32) -> (i32, i32, i32) {
    %c0_i32 = arith.constant 0 : i32
    %c0_i32_0 = arith.constant 0 : i32
    %c0_i32_1 = arith.constant 0 : i32
    return %arg0, %c0_i32, %c0_i32_0 : i32, i32, i32
  }
  func.func @transform_1(%arg0: i32) -> (i32, i32) {
    %c0_i32 = arith.constant 0 : i32
    %c0_i32_0 = arith.constant 0 : i32
    %c0_i32_1 = arith.constant 0 : i32
    return %c0_i32, %c0_i32_0 : i32, i32
  }
  func.func @transform_2(%arg0: i32) -> (i32, i32) {
    %c0_i32 = arith.constant 0 : i32
    %c0_i32_0 = arith.constant 0 : i32
    %c0_i32_1 = arith.constant 0 : i32
    return %c0_i32, %c0_i32_0 : i32, i32
  }
  func.func @transform_3(%arg0: i32) -> (i32, i32) {
    %c0_i32 = arith.constant 0 : i32
    %c0_i32_0 = arith.constant 0 : i32
    %c0_i32_1 = arith.constant 0 : i32
    return %c0_i32, %c0_i32_0 : i32, i32
  }
  func.func @transform_4(%arg0: i32) -> (i32, i32) {
    %c0_i32 = arith.constant 0 : i32
    %c0_i32_0 = arith.constant 0 : i32
    %c0_i32_1 = arith.constant 0 : i32
    return %c0_i32, %c0_i32_0 : i32, i32
  }
  func.func @transform_5(%arg0: i32) -> (i32, i32) {
    %c0_i32 = arith.constant 0 : i32
    %c0_i32_0 = arith.constant 0 : i32
    %c0_i32_1 = arith.constant 0 : i32
    return %c0_i32, %c0_i32_0 : i32, i32
  }
  func.func @transform_6(%arg0: i32) -> (i32, i32) {
    %c0_i32 = arith.constant 0 : i32
    %c0_i32_0 = arith.constant 0 : i32
    %c0_i32_1 = arith.constant 0 : i32
    return %c0_i32, %c0_i32_0 : i32, i32
  }
  func.func @transform_7(%arg0: i32) -> (i32, i32) {
    %c0_i32 = arith.constant 0 : i32
    %c0_i32_0 = arith.constant 0 : i32
    %c0_i32_1 = arith.constant 0 : i32
    return %c0_i32, %c0_i32_0 : i32, i32
  }
  func.func @transform_8(%arg0: i32) -> (i32, i32) {
    %c0_i32 = arith.constant 0 : i32
    %c0_i32_0 = arith.constant 0 : i32
    %c0_i32_1 = arith.constant 0 : i32
    return %c0_i32, %c0_i32_0 : i32, i32
  }
  func.func @transform_9(%arg0: i32) -> (i32, i32) {
    %c0_i32 = arith.constant 0 : i32
    %c0_i32_0 = arith.constant 0 : i32
    %c0_i32_1 = arith.constant 0 : i32
    return %c0_i32, %c0_i32_0 : i32, i32
  }
  func.func @transform_10(%arg0: i32) -> (i32, i32) {
    %c0_i32 = arith.constant 0 : i32
    %c0_i32_0 = arith.constant 0 : i32
    %c0_i32_1 = arith.constant 0 : i32
    return %c0_i32, %c0_i32_0 : i32, i32
  }
  func.func @transform_11(%arg0: i32) -> (i32, i32) {
    %c0_i32 = arith.constant 0 : i32
    %c0_i32_0 = arith.constant 0 : i32
    %c0_i32_1 = arith.constant 0 : i32
    return %c0_i32, %c0_i32_0 : i32, i32
  }
  func.func @transform_12(%arg0: i32) -> (i32, i32) {
    %c0_i32 = arith.constant 0 : i32
    %c0_i32_0 = arith.constant 0 : i32
    %c0_i32_1 = arith.constant 0 : i32
    return %c0_i32, %c0_i32_0 : i32, i32
  }
  func.func @transform_13(%arg0: i32) -> (i32, i32) {
    %c0_i32 = arith.constant 0 : i32
    %c0_i32_0 = arith.constant 0 : i32
    %c0_i32_1 = arith.constant 0 : i32
    return %c0_i32, %c0_i32_0 : i32, i32
  }
  func.func @transform_14(%arg0: i32) -> (i32, i32) {
    %c0_i32 = arith.constant 0 : i32
    %c0_i32_0 = arith.constant 0 : i32
    %c0_i32_1 = arith.constant 0 : i32
    return %c0_i32, %c0_i32_0 : i32, i32
  }
  func.func @transform_15(%arg0: i32) -> (i32, i32) {
    %c0_i32 = arith.constant 0 : i32
    %c0_i32_0 = arith.constant 0 : i32
    %c0_i32_1 = arith.constant 0 : i32
    return %c0_i32, %c0_i32_0 : i32, i32
  }
  func.func @transform_16(%arg0: i32) -> (i32, i32) {
    %c0_i32 = arith.constant 0 : i32
    %c0_i32_0 = arith.constant 0 : i32
    %c0_i32_1 = arith.constant 0 : i32
    return %c0_i32, %c0_i32_0 : i32, i32
  }
  func.func @transform_17(%arg0: i32) -> (i32, i32) {
    %c0_i32 = arith.constant 0 : i32
    %c0_i32_0 = arith.constant 0 : i32
    %c0_i32_1 = arith.constant 0 : i32
    return %c0_i32, %c0_i32_0 : i32, i32
  }
  func.func @transform_18(%arg0: i32) -> (i32, i32) {
    %c0_i32 = arith.constant 0 : i32
    %c0_i32_0 = arith.constant 0 : i32
    %c0_i32_1 = arith.constant 0 : i32
    return %c0_i32, %c0_i32_0 : i32, i32
  }
  func.func @transform_19(%arg0: i32) -> (i32, i32) {
    %c0_i32 = arith.constant 0 : i32
    %c0_i32_0 = arith.constant 0 : i32
    %c0_i32_1 = arith.constant 0 : i32
    return %c0_i32, %c0_i32_0 : i32, i32
  }
  func.func @transform_20(%arg0: i32) -> (i32, i32) {
    %c0_i32 = arith.constant 0 : i32
    %c0_i32_0 = arith.constant 0 : i32
    %c0_i32_1 = arith.constant 0 : i32
    return %c0_i32, %c0_i32_0 : i32, i32
  }
  func.func @transform_21(%arg0: i32) -> (i32, i32) {
    %c0_i32 = arith.constant 0 : i32
    %c0_i32_0 = arith.constant 0 : i32
    %c0_i32_1 = arith.constant 0 : i32
    return %c0_i32, %c0_i32_0 : i32, i32
  }
  func.func @transform_22(%arg0: i32) -> (i32, i32) {
    %c0_i32 = arith.constant 0 : i32
    %c0_i32_0 = arith.constant 0 : i32
    %c0_i32_1 = arith.constant 0 : i32
    return %c0_i32, %c0_i32_0 : i32, i32
  }
  func.func @transform_23(%arg0: i32) -> (i32, i32) {
    %c0_i32 = arith.constant 0 : i32
    %c0_i32_0 = arith.constant 0 : i32
    %c0_i32_1 = arith.constant 0 : i32
    return %c0_i32, %c0_i32_0 : i32, i32
  }
  func.func @transform_24(%arg0: i32) -> (i32, i32) {
    %c0_i32 = arith.constant 0 : i32
    %c0_i32_0 = arith.constant 0 : i32
    %c0_i32_1 = arith.constant 0 : i32
    return %c0_i32, %c0_i32_0 : i32, i32
  }
  func.func @transform_25(%arg0: i32) -> (i32, i32) {
    %c0_i32 = arith.constant 0 : i32
    %c0_i32_0 = arith.constant 0 : i32
    %c0_i32_1 = arith.constant 0 : i32
    return %c0_i32, %c0_i32_0 : i32, i32
  }
  func.func @transform_26(%arg0: i32) -> (i32, i32) {
    %c0_i32 = arith.constant 0 : i32
    %c0_i32_0 = arith.constant 0 : i32
    %c0_i32_1 = arith.constant 0 : i32
    return %c0_i32, %c0_i32_0 : i32, i32
  }
  func.func @transform_27(%arg0: i32) -> (i32, i32) {
    %c0_i32 = arith.constant 0 : i32
    %c0_i32_0 = arith.constant 0 : i32
    %c0_i32_1 = arith.constant 0 : i32
    return %c0_i32, %c0_i32_0 : i32, i32
  }
  func.func @transform_28(%arg0: i32) -> (i32, i32) {
    %c0_i32 = arith.constant 0 : i32
    %c0_i32_0 = arith.constant 0 : i32
    %c0_i32_1 = arith.constant 0 : i32
    return %c0_i32, %c0_i32_0 : i32, i32
  }
  func.func @transform_29(%arg0: i32) -> (i32, i32) {
    %c0_i32 = arith.constant 0 : i32
    %c0_i32_0 = arith.constant 0 : i32
    %c0_i32_1 = arith.constant 0 : i32
    return %c0_i32, %c0_i32_0 : i32, i32
  }
  func.func @transform_30(%arg0: i32) -> (i32, i32) {
    %c0_i32 = arith.constant 0 : i32
    %c0_i32_0 = arith.constant 0 : i32
    %c0_i32_1 = arith.constant 0 : i32
    return %c0_i32, %c0_i32_0 : i32, i32
  }
  func.func @transform_31(%arg0: i32) -> (i32, i32) {
    %c0_i32 = arith.constant 0 : i32
    %c0_i32_0 = arith.constant 0 : i32
    %c0_i32_1 = arith.constant 0 : i32
    return %c0_i32, %c0_i32_0 : i32, i32
  }
  func.func @transform_32(%arg0: i32) -> (i32, i32) {
    %c0_i32 = arith.constant 0 : i32
    %c0_i32_0 = arith.constant 0 : i32
    %c0_i32_1 = arith.constant 0 : i32
    return %c0_i32, %c0_i32_0 : i32, i32
  }
  func.func @transform_33(%arg0: i32) -> (i32, i32) {
    %c0_i32 = arith.constant 0 : i32
    %c0_i32_0 = arith.constant 0 : i32
    %c0_i32_1 = arith.constant 0 : i32
    return %c0_i32, %c0_i32_0 : i32, i32
  }
  func.func @transform_34(%arg0: i32) -> (i32, i32) {
    %c0_i32 = arith.constant 0 : i32
    %c0_i32_0 = arith.constant 0 : i32
    %c0_i32_1 = arith.constant 0 : i32
    return %c0_i32, %c0_i32_0 : i32, i32
  }
  func.func @transform_35(%arg0: i32) -> (i32, i32) {
    %c0_i32 = arith.constant 0 : i32
    %c0_i32_0 = arith.constant 0 : i32
    %c0_i32_1 = arith.constant 0 : i32
    return %c0_i32, %c0_i32_0 : i32, i32
  }
  func.func @transform_36(%arg0: i32) -> (i32, i32) {
    %c0_i32 = arith.constant 0 : i32
    %c0_i32_0 = arith.constant 0 : i32
    return %arg0, %c0_i32 : i32, i32
  }
}

</mosaic_0001>

<bundles_post_ra>
// kernel: tpu_custom_call.1
= control target key start
LH: loop header
LB: loop body
LE: loop exit
PB: predicated region body
PF: predicated region fallthrough
CT: control target
= control target key end

     0   :  { %s10215_s6 = smov 1   ;;  %s10216_s10 = smov 2   ;;  %s11235_s0 = inlined_call_operand.smem [shape: u32[37], index: -1, kind: input, shape index: {}] }
   0x1   :  { %s10298_s5 = sld [smem:[%s11235_s0]]   ;;  %s10217_s14 = smov 3  }
   0x2   :  { %s10303_s9 = sld [smem:[%s11235_s0 + %s10215_s6]]   ;;  %s10218_s18 = smov 4  }
   0x3   :  { %s10308_s13 = sld [smem:[%s11235_s0 + %s10216_s10]]   ;;  %s10219_s22 = smov 5  }
   0x4   :  { %s10313_s17 = sld [smem:[%s11235_s0 + %s10217_s14]]   ;;  %s10220_s26 = smov 6  }
   0x5   :  { %s10318_s21 = sld [smem:[%s11235_s0 + %s10218_s18]]   ;;  %s10221_s30 = smov 7  }
   0x6   :  { %s10323_s25 = sld [smem:[%s11235_s0 + %s10219_s22]]   ;;  %s10222_s4 = smov 8  }
   0x7   :  { %11255 = sst [smem:[#allocation73_spill]] %s10298_s5  ;;  %s10223_s10 = smov 9  }
   0x8   :  { %s10328_s29 = sld [smem:[%s11235_s0 + %s10220_s26]]   ;;  %s10224_s15 = smov 10  }
   0x9   :  { %11256 = sst [smem:[#allocation74_spill]] %s10308_s13  ;;  %s10225_s20 = smov 11  }
   0xa   :  { %s10333_s3 = sld [smem:[%s11235_s0 + %s10221_s30]]   ;;  %s10226_s26 = smov 12  }
   0xb   :  { %11257 = sst [smem:[#allocation75_spill]] %s10318_s21  ;;  %s10227_s1 = smov 13  }
   0xc   :  { %s10338_s8 = sld [smem:[%s11235_s0 + %s10222_s4]]   ;;  %s10228_s7 = smov 14  }
   0xd   :  { %s10343_s14 = sld [smem:[%s11235_s0 + %s10223_s10]]   ;;  %s10230_s22 = smov 16  }
   0xe   :  { %11258 = sst [smem:[#allocation76_spill]] %s10328_s29  ;;  %s10231_s28 = smov 17  }
   0xf   :  { %s10348_s19 = sld [smem:[%s11235_s0 + %s10224_s15]]   ;;  %s10229_s15 = smov 15  }
  0x10   :  { %s10353_s24 = sld [smem:[%s11235_s0 + %s10225_s20]]  }
  0x11   :  { %s10358_s30 = sld [smem:[%s11235_s0 + %s10226_s26]]  }
  0x12   :  { %11259 = sst [smem:[#allocation77_spill]] %s10338_s8 }
  0x13   :  { %s10363_s6 = sld [smem:[%s11235_s0 + %s10227_s1]]  }
  0x14   :  { %s10368_s12 = sld [smem:[%s11235_s0 + %s10228_s7]]   ;;  %s10232_s7 = smov 18  }
  0x15   :  { %11260 = sst [smem:[#allocation78_spill]] %s10348_s19 }
  0x16   :  { %s10373_s20 = sld [smem:[%s11235_s0 + %s10229_s15]]   ;;  %s10233_s15 = smov 19  }
  0x17   :  { %11261 = sst [smem:[#allocation79_spill]] %s10358_s30 }
  0x18   :  { %s10378_s27 = sld [smem:[%s11235_s0 + %s10230_s22]]   ;;  %s10234_s22 = smov 20  }
  0x19   :  { %s10383_s4 = sld [smem:[%s11235_s0 + %s10231_s28]]   ;;  %s10235_s28 = smov 21  }
  0x1a   :  { %11262 = sst [smem:[#allocation80_spill]] %s10368_s12 }
  0x1b   :  { %s10388_s12 = sld [smem:[%s11235_s0 + %s10232_s7]]   ;;  %s10236_s7 = smov 22  }
  0x1c   :  { %s10393_s30 = sld [smem:[%s11235_s0 + %s10233_s15]]   ;;  %s10237_s15 = smov 23  }
  0x1d   :  { %s10403_s19 = sld [smem:[%s11235_s0 + %s10235_s28]]   ;;  %s10239_s28 = smov 25  }
  0x1e   :  { %11263 = sst [smem:[#allocation81_spill]] %s10378_s27 }
  0x1f   :  { %s10398_s27 = sld [smem:[%s11235_s0 + %s10234_s22]]   ;;  %s10238_s22 = smov 24  }
  0x20   :  { %s10413_s8 = sld [smem:[%s11235_s0 + %s10237_s15]]   ;;  %s10241_s15 = smov 27  }
  0x21   :  { %11264 = sst [smem:[#allocation82_spill]] %s10388_s12 }
  0x22   :  { %s10408_s12 = sld [smem:[%s11235_s0 + %s10236_s7]]   ;;  %s10240_s7 = smov 26  }
  0x23   :  { %s10423_s29 = sld [smem:[%s11235_s0 + %s10239_s28]]   ;;  %s10243_s28 = smov 29  }
  0x25   :  { %11265 = sst [smem:[#allocation83_spill]] %s10398_s27 }
  0x26   :  { %11267 = sst [smem:[#allocation85_spill]] %s10413_s8 }
  0x27   :  { %s10418_s27 = sld [smem:[%s11235_s0 + %s10238_s22]]   ;;  %s10242_s22 = smov 28  }
  0x28   :  { %11266 = sst [smem:[#allocation84_spill]] %s10408_s12 }
  0x29   :  { %11268 = sst [smem:[#allocation86_spill]] %s10423_s29 }
  0x2a   :  { %s10428_s12 = sld [smem:[%s11235_s0 + %s10240_s7]]   ;;  %s10244_s7 = smov 30  }
  0x2b   :  { %s10433_s8 = sld [smem:[%s11235_s0 + %s10241_s15]]   ;;  %s10245_s15 = smov 31  }
  0x2c   :  { %s10438_s21 = sld [smem:[%s11235_s0 + %s10242_s22]]   ;;  %s10246_s22 = smov 32  }
  0x2d   :  { %s10443_s29 = sld [smem:[%s11235_s0 + %s10243_s28]]   ;;  %s10247_s28 = smov 33  }
  0x2e   :  { %s10448_s13 = sld [smem:[%s11235_s0 + %s10244_s7]]   ;;  %s10248_s7 = smov 34  }
  0x2f   :  { %s10458_s5 = sld [smem:[%s11235_s0 + %s10246_s22]]   ;;  %s10250_s22 = smov 36  }
  0x31   :  { %11269 = sst [smem:[#allocation87_spill]] %s10433_s8 }
  0x32   :  { %s10453_s8 = sld [smem:[%s11235_s0 + %s10245_s15]]   ;;  %s10249_s15 = smov 35  }
  0x33   :  { %11270 = sst [smem:[#allocation88_spill]] %s10443_s29 }
  0x34   :  { %11271 = sst [smem:[#allocation89_spill]] %s10448_s13 }
  0x35   :  { %11273 = sst [smem:[#allocation91_spill]] %s10458_s5 }
  0x36   :  { %s10463_s29 = sld [smem:[%s11235_s0 + %s10247_s28]]  }
  0x37   :  { %s10468_s13 = sld [smem:[%s11235_s0 + %s10248_s7]]  }
  0x38   :  { %11272 = sst [smem:[#allocation90_spill]] %s10453_s8 }
  0x39   :  { %s10473_s8 = sld [smem:[%s11235_s0 + %s10249_s15]]  }
  0x3a   :  { %s10478_s5 = sld [smem:[%s11235_s0 + %s10250_s22]]  }
  0x3b   :  { %78 = vsyncpa [#allocation4], 0 }
  0x3c   :  { %79 = vsyncpa [#allocation7], 0 }
  0x3d   :  { %80 = vsyncpa [#allocation10], 0 }
  0x3e   :  { %81 = vsyncpa [#allocation13], 0 }
  0x3f   :  { %82 = vsyncpa [#allocation16], 0 }
  0x40   :  { %83 = vsyncpa [#allocation19], 0 }
  0x41   :  { %84 = vsyncpa [#allocation22], 0 }
  0x42   :  { %85 = vsyncpa [#allocation25], 0 }
  0x43   :  { %86 = vsyncpa [#allocation28], 0 }
  0x44   :  { %87 = vsyncpa [#allocation31], 0 }
  0x45   :  { %88 = vsyncpa [#allocation34], 0 }
  0x46   :  { %89 = vsyncpa [#allocation37], 0 }
  0x47   :  { %90 = vsyncpa [#allocation40], 0 }
  0x48   :  { %91 = vsyncpa [#allocation43], 0 }
  0x49   :  { %92 = vsyncpa [#allocation46], 0 }
  0x4a   :  { %93 = vsyncpa [#allocation49], 0 }
  0x4b   :  { %94 = vsyncpa [#allocation52], 0 }
  0x4c   :  { %95 = vsyncpa [#allocation5], 0  ;;  %s10251_s0 = smov [#allocation6]   ;;  %s10252_s1 = smov [#allocation9]  }
  0x4d   :  { %s113_s28 = sshll.u32 %s10251_s0, 4  ;;  %s136_s2 = sshll.u32 %s10252_s1, 4  ;;  %s114_s28 = int_to_ptr.vmem [resolvable:$true] %s113_s28  ;;  %s10480_s2 = int_to_ptr.vmem [resolvable:$true] %s136_s2 }
  0x4e   :  { %s9431_s7 = scalar_lea.hbm %s10303_s9, 8192 }
  0x4f   :  { %p9432_p0 = scmp.ne.s32.totalorder %s10303_s9, %s9431_s7  ;;  %p9435_p1 = scmp.lt.u32.totalorder %s9431_s7, %s10303_s9 }
  0x51   :  { %p9437_p2 = pnand %p9435_p1, %p9432_p0 }
  0x53   :  { %9440 = shalt.err (!%p9437_p2)
}
  0x54   :  { %s9441_s10 = scalar_lea.vmem %s114_s28, 8192  ;;  %p9446_p4 = scmp.lt.s32.totalorder %s114_s28, %s114_s28 }
  0x55   :  { %p9442_p3 = scmp.ne.s32.totalorder %s114_s28, %s9441_s10  ;;  %p9447_p5 = scmp.lt.s32.totalorder %s9441_s10, %s9441_s10 }
  0x57   :  { %p9448_p6 = por %p9447_p5, %p9446_p4 }
  0x59   :  { %p9449_p7 = pnand %p9448_p6, %p9442_p3 }
  0x5b   :  { %9452 = shalt.err (!%p9449_p7)
}
  0x5c   :  { %s10253_s11 = smov 64   ;;  %s10254_s15 = smov 4  }
  0x5d   :  { %119 = dma.hbm_to_vmem [thread:$0]  %s10303_s9, 8192, %s114_s28, [#allocation7], %s10253_s11, %s10253_s11, %s10254_s15  }
  0x5e   :  { %s9453_s16 = scalar_lea.hbm %s10313_s17, 16 }
  0x5f   :  { %p9454_p8 = scmp.ne.s32.totalorder %s10313_s17, %s9453_s16  ;;  %p9457_p9 = scmp.lt.u32.totalorder %s9453_s16, %s10313_s17 }
  0x61   :  { %p9459_p10 = pnand %p9457_p9, %p9454_p8 }
  0x63   :  { %9462 = shalt.err (!%p9459_p10)
}
  0x64   :  { %s9463_s18 = scalar_lea.vmem %s10480_s2, 16  ;;  %s9467_s22 = scalar_lea.vmem %s10480_s2, 32 }
  0x65   :  { %p9464_p11 = scmp.ne.s32.totalorder %s10480_s2, %s9463_s18  ;;  %p9468_p12 = scmp.lt.s32.totalorder %s10480_s2, %s10480_s2 }
  0x66   :  { %p9469_p13 = scmp.lt.s32.totalorder %s9467_s22, %s9463_s18 }
  0x68   :  { %p9470_p0 = por %p9469_p13, %p9468_p12 }
  0x6a   :  { %p9471_p1 = pnand %p9470_p0, %p9464_p11 }
  0x6c   :  { %9474 = shalt.err (!%p9471_p1)
}
  0x6d   :  { %139 = dma.hbm_to_vmem [thread:$0]  %s10313_s17, 16, %s10480_s2, [#allocation10]  }
  0x6e   :  { %s10255_s9 = smov [#allocation12]   ;;  %s10256_s26 = smov [#allocation15]  }
  0x6f   :  { %s158_s23 = sshll.u32 %s10255_s9, 4  ;;  %s177_s0 = sshll.u32 %s10256_s26, 4  ;;  %s159_s23 = int_to_ptr.vmem [resolvable:$true] %s158_s23  ;;  %s10499_s0 = int_to_ptr.vmem [resolvable:$true] %s177_s0 }
  0x70   :  { %s9475_s28 = scalar_lea.hbm %s10323_s25, 16 }
  0x71   :  { %p9476_p2 = scmp.ne.s32.totalorder %s10323_s25, %s9475_s28  ;;  %p9479_p3 = scmp.lt.u32.totalorder %s9475_s28, %s10323_s25 }
  0x73   :  { %p9481_p4 = pnand %p9479_p3, %p9476_p2 }
  0x75   :  { %9484 = shalt.err (!%p9481_p4)
}
  0x76   :  { %s9485_s1 = scalar_lea.vmem %s159_s23, 16  ;;  %s9489_s7 = scalar_lea.vmem %s159_s23, 32 }
  0x77   :  { %p9486_p5 = scmp.ne.s32.totalorder %s159_s23, %s9485_s1  ;;  %p9490_p6 = scmp.lt.s32.totalorder %s159_s23, %s159_s23 }
  0x78   :  { %p9491_p7 = scmp.lt.s32.totalorder %s9489_s7, %s9485_s1 }
  0x7a   :  { %p9492_p8 = por %p9491_p7, %p9490_p6 }
  0x7c   :  { %p9493_p9 = pnand %p9492_p8, %p9486_p5 }
  0x7e   :  { %9496 = shalt.err (!%p9493_p9)
}
  0x7f   :  { %161 = dma.hbm_to_vmem [thread:$0]  %s10323_s25, 16, %s159_s23, [#allocation13]  }
  0x80   :  { %s9497_s17 = scalar_lea.hbm %s10333_s3, 3072 }
  0x81   :  { %p9498_p10 = scmp.ne.s32.totalorder %s10333_s3, %s9497_s17  ;;  %p9501_p11 = scmp.lt.u32.totalorder %s9497_s17, %s10333_s3 }
  0x83   :  { %p9503_p12 = pnand %p9501_p11, %p9498_p10 }
  0x85   :  { %9506 = shalt.err (!%p9503_p12)
}
  0x86   :  { %s9507_s2 = scalar_lea.vmem %s10499_s0, 3072  ;;  %p9512_p0 = scmp.lt.s32.totalorder %s10499_s0, %s10499_s0 }
  0x87   :  { %p9508_p13 = scmp.ne.s32.totalorder %s10499_s0, %s9507_s2  ;;  %p9513_p1 = scmp.lt.s32.totalorder %s9507_s2, %s9507_s2 }
  0x89   :  { %p9514_p2 = por %p9513_p1, %p9512_p0 }
  0x8b   :  { %p9515_p3 = pnand %p9514_p2, %p9508_p13 }
  0x8d   :  { %9518 = shalt.err (!%p9515_p3)
}
  0x8e   :  { %183 = dma.hbm_to_vmem [thread:$0]  %s10333_s3, 3072, %s10499_s0, [#allocation16], %s10253_s11, %s10253_s11, %s10254_s15  }
  0x8f   :  { %s10257_s25 = smov [#allocation18]   ;;  %s10258_s16 = smov [#allocation21]  }
  0x90   :  { %s200_s10 = sshll.u32 %s10257_s25, 4  ;;  %s222_s18 = sshll.u32 %s10258_s16, 4  ;;  %s201_s10 = int_to_ptr.vmem [resolvable:$true] %s200_s10  ;;  %s223_s18 = int_to_ptr.vmem [resolvable:$true] %s222_s18 }
  0x91   :  { %s9519_s22 = scalar_lea.hbm %s10343_s14, 16 }
  0x92   :  { %p9520_p4 = scmp.ne.s32.totalorder %s10343_s14, %s9519_s22  ;;  %p9523_p5 = scmp.lt.u32.totalorder %s9519_s22, %s10343_s14 }
  0x94   :  { %p9525_p6 = pnand %p9523_p5, %p9520_p4 }
  0x96   :  { %9528 = shalt.err (!%p9525_p6)
}
  0x97   :  { %s9529_s9 = scalar_lea.vmem %s201_s10, 16  ;;  %s9533_s23 = scalar_lea.vmem %s201_s10, 32 }
  0x98   :  { %p9530_p7 = scmp.ne.s32.totalorder %s201_s10, %s9529_s9  ;;  %p9534_p8 = scmp.lt.s32.totalorder %s201_s10, %s201_s10 }
  0x99   :  { %p9535_p9 = scmp.lt.s32.totalorder %s9533_s23, %s9529_s9 }
  0x9b   :  { %p9536_p10 = por %p9535_p9, %p9534_p8 }
  0x9d   :  { %p9537_p11 = pnand %p9536_p10, %p9530_p7 }
  0x9f   :  { %9540 = shalt.err (!%p9537_p11)
}
  0xa0   :  { %203 = dma.hbm_to_vmem [thread:$0]  %s10343_s14, 16, %s201_s10, [#allocation19]  }
  0xa1   :  { %s9541_s3 = scalar_lea.hbm %s10353_s24, 16 }
  0xa2   :  { %p9542_p12 = scmp.ne.s32.totalorder %s10353_s24, %s9541_s3  ;;  %p9545_p13 = scmp.lt.u32.totalorder %s9541_s3, %s10353_s24 }
  0xa4   :  { %p9547_p0 = pnand %p9545_p13, %p9542_p12 }
  0xa6   :  { %9550 = shalt.err (!%p9547_p0)
}
  0xa7   :  { %s9551_s26 = scalar_lea.vmem %s223_s18, 16  ;;  %s9555_s0 = scalar_lea.vmem %s223_s18, 32 }
  0xa8   :  { %p9552_p1 = scmp.ne.s32.totalorder %s223_s18, %s9551_s26  ;;  %p9556_p2 = scmp.lt.s32.totalorder %s223_s18, %s223_s18 }
  0xa9   :  { %p9557_p3 = scmp.lt.s32.totalorder %s9555_s0, %s9551_s26 }
  0xab   :  { %p9558_p4 = por %p9557_p3, %p9556_p2 }
  0xad   :  { %p9559_p5 = pnand %p9558_p4, %p9552_p1 }
  0xaf   :  { %9562 = shalt.err (!%p9559_p5)
}
  0xb0   :  { %225 = dma.hbm_to_vmem [thread:$0]  %s10353_s24, 16, %s223_s18, [#allocation22]  }
  0xb1   :  { %s10259_s28 = smov [#allocation24]   ;;  %s10260_s1 = smov [#allocation27]  }
  0xb2   :  { %s241_s14 = sshll.u32 %s10259_s28, 4  ;;  %s264_s7 = sshll.u32 %s10260_s1, 4  ;;  %s242_s14 = int_to_ptr.vmem [resolvable:$true] %s241_s14  ;;  %s265_s7 = int_to_ptr.vmem [resolvable:$true] %s264_s7 }
  0xb3   :  { %s9563_s17 = scalar_lea.hbm %s10363_s6, 8192 }
  0xb4   :  { %p9564_p6 = scmp.ne.s32.totalorder %s10363_s6, %s9563_s17  ;;  %p9567_p7 = scmp.lt.u32.totalorder %s9563_s17, %s10363_s6 }
  0xb6   :  { %p9569_p8 = pnand %p9567_p7, %p9564_p6 }
  0xb8   :  { %9572 = shalt.err (!%p9569_p8)
}
  0xb9   :  { %s9573_s2 = scalar_lea.vmem %s242_s14, 8192  ;;  %p9578_p10 = scmp.lt.s32.totalorder %s242_s14, %s242_s14 }
  0xba   :  { %p9574_p9 = scmp.ne.s32.totalorder %s242_s14, %s9573_s2  ;;  %p9579_p11 = scmp.lt.s32.totalorder %s9573_s2, %s9573_s2 }
  0xbc   :  { %p9580_p12 = por %p9579_p11, %p9578_p10 }
  0xbe   :  { %p9581_p13 = pnand %p9580_p12, %p9574_p9 }
  0xc0   :  { %9584 = shalt.err (!%p9581_p13)
}
  0xc1   :  { %247 = dma.hbm_to_vmem [thread:$0]  %s10363_s6, 8192, %s242_s14, [#allocation25], %s10253_s11, %s10253_s11, %s10254_s15  }
  0xc2   :  { %s9585_s24 = scalar_lea.hbm %s10373_s20, 16 }
  0xc3   :  { %p9586_p0 = scmp.ne.s32.totalorder %s10373_s20, %s9585_s24  ;;  %p9589_p1 = scmp.lt.u32.totalorder %s9585_s24, %s10373_s20 }
  0xc5   :  { %p9591_p2 = pnand %p9589_p1, %p9586_p0 }
  0xc7   :  { %9594 = shalt.err (!%p9591_p2)
}
  0xc8   :  { %s9595_s25 = scalar_lea.vmem %s265_s7, 16  ;;  %s9599_s10 = scalar_lea.vmem %s265_s7, 32 }
  0xc9   :  { %p9596_p3 = scmp.ne.s32.totalorder %s265_s7, %s9595_s25  ;;  %p9600_p4 = scmp.lt.s32.totalorder %s265_s7, %s265_s7 }
  0xca   :  { %p9601_p5 = scmp.lt.s32.totalorder %s9599_s10, %s9595_s25 }
  0xcc   :  { %p9602_p6 = por %p9601_p5, %p9600_p4 }
  0xce   :  { %p9603_p7 = pnand %p9602_p6, %p9596_p3 }
  0xd0   :  { %9606 = shalt.err (!%p9603_p7)
}
  0xd1   :  { %267 = dma.hbm_to_vmem [thread:$0]  %s10373_s20, 16, %s265_s7, [#allocation28]  }
  0xd2   :  { %s10261_s16 = smov [#allocation30]   ;;  %s10262_s18 = smov [#allocation33]  }
  0xd3   :  { %s286_s6 = sshll.u32 %s10261_s16, 4  ;;  %s305_s22 = sshll.u32 %s10262_s18, 4  ;;  %s287_s6 = int_to_ptr.vmem [resolvable:$true] %s286_s6  ;;  %s10536_s22 = int_to_ptr.vmem [resolvable:$true] %s305_s22 }
  0xd4   :  { %s9607_s9 = scalar_lea.hbm %s10383_s4, 16 }
  0xd5   :  { %p9608_p8 = scmp.ne.s32.totalorder %s10383_s4, %s9607_s9  ;;  %p9611_p9 = scmp.lt.u32.totalorder %s9607_s9, %s10383_s4 }
  0xd7   :  { %p9613_p10 = pnand %p9611_p9, %p9608_p8 }
  0xd9   :  { %9616 = shalt.err (!%p9613_p10)
}
  0xda   :  { %s9617_s23 = scalar_lea.vmem %s287_s6, 16  ;;  %s9621_s3 = scalar_lea.vmem %s287_s6, 32 }
  0xdb   :  { %p9618_p11 = scmp.ne.s32.totalorder %s287_s6, %s9617_s23  ;;  %p9622_p12 = scmp.lt.s32.totalorder %s287_s6, %s287_s6 }
  0xdc   :  { %p9623_p13 = scmp.lt.s32.totalorder %s9621_s3, %s9617_s23 }
  0xde   :  { %p9624_p0 = por %p9623_p13, %p9622_p12 }
  0xe0   :  { %p9625_p1 = pnand %p9624_p0, %p9618_p11 }
  0xe2   :  { %9628 = shalt.err (!%p9625_p1)
}
  0xe3   :  { %289 = dma.hbm_to_vmem [thread:$0]  %s10383_s4, 16, %s287_s6, [#allocation31]  }
  0xe4   :  { %s9629_s20 = scalar_lea.hbm %s10393_s30, 3072 }
  0xe5   :  { %p9630_p2 = scmp.ne.s32.totalorder %s10393_s30, %s9629_s20  ;;  %p9633_p3 = scmp.lt.u32.totalorder %s9629_s20, %s10393_s30 }
  0xe7   :  { %p9635_p4 = pnand %p9633_p3, %p9630_p2 }
  0xe9   :  { %9638 = shalt.err (!%p9635_p4)
}
  0xea   :  { %s9639_s26 = scalar_lea.vmem %s10536_s22, 3072  ;;  %p9644_p6 = scmp.lt.s32.totalorder %s10536_s22, %s10536_s22 }
  0xeb   :  { %p9640_p5 = scmp.ne.s32.totalorder %s10536_s22, %s9639_s26  ;;  %p9645_p7 = scmp.lt.s32.totalorder %s9639_s26, %s9639_s26 }
  0xed   :  { %p9646_p8 = por %p9645_p7, %p9644_p6 }
  0xef   :  { %p9647_p9 = pnand %p9646_p8, %p9640_p5 }
  0xf1   :  { %9650 = shalt.err (!%p9647_p9)
}
  0xf2   :  { %311 = dma.hbm_to_vmem [thread:$0]  %s10393_s30, 3072, %s10536_s22, [#allocation34], %s10253_s11, %s10253_s11, %s10254_s15  }
  0xf3   :  { %s10263_s4 = smov [#allocation36]   ;;  %s10264_s28 = smov [#allocation39]  }
  0xf4   :  { %s328_s0 = sshll.u32 %s10263_s4, 4  ;;  %s350_s14 = sshll.u32 %s10264_s28, 4  ;;  %s329_s0 = int_to_ptr.vmem [resolvable:$true] %s328_s0  ;;  %s351_s14 = int_to_ptr.vmem [resolvable:$true] %s350_s14 }
  0xf5   :  { %s9651_s1 = scalar_lea.hbm %s10403_s19, 16 }
  0xf6   :  { %p9652_p10 = scmp.ne.s32.totalorder %s10403_s19, %s9651_s1  ;;  %p9655_p11 = scmp.lt.u32.totalorder %s9651_s1, %s10403_s19 }
  0xf8   :  { %p9657_p12 = pnand %p9655_p11, %p9652_p10 }
  0xfa   :  { %9660 = shalt.err (!%p9657_p12)
}
  0xfb   :  { %s9661_s7 = scalar_lea.vmem %s329_s0, 16  ;;  %s9665_s17 = scalar_lea.vmem %s329_s0, 32 }
  0xfc   :  { %p9662_p13 = scmp.ne.s32.totalorder %s329_s0, %s9661_s7  ;;  %p9666_p0 = scmp.lt.s32.totalorder %s329_s0, %s329_s0 }
  0xfd   :  { %p9667_p1 = scmp.lt.s32.totalorder %s9665_s17, %s9661_s7 }
  0xff   :  { %p9668_p2 = por %p9667_p1, %p9666_p0 }
 0x101   :  { %p9669_p3 = pnand %p9668_p2, %p9662_p13 }
 0x103   :  { %9672 = shalt.err (!%p9669_p3)
}
 0x104   :  { %331 = dma.hbm_to_vmem [thread:$0]  %s10403_s19, 16, %s329_s0, [#allocation37]  }
 0x105   :  { %s9673_s30 = scalar_lea.hbm %s10418_s27, 16 }
 0x106   :  { %p9674_p4 = scmp.ne.s32.totalorder %s10418_s27, %s9673_s30  ;;  %p9677_p5 = scmp.lt.u32.totalorder %s9673_s30, %s10418_s27 }
 0x108   :  { %p9679_p6 = pnand %p9677_p5, %p9674_p4 }
 0x10a   :  { %9682 = shalt.err (!%p9679_p6)
}
 0x10b   :  { %s9683_s2 = scalar_lea.vmem %s351_s14, 16  ;;  %s9687_s24 = scalar_lea.vmem %s351_s14, 32 }
 0x10c   :  { %p9684_p7 = scmp.ne.s32.totalorder %s351_s14, %s9683_s2  ;;  %p9688_p8 = scmp.lt.s32.totalorder %s351_s14, %s351_s14 }
 0x10d   :  { %p9689_p9 = scmp.lt.s32.totalorder %s9687_s24, %s9683_s2 }
 0x10f   :  { %p9690_p10 = por %p9689_p9, %p9688_p8 }
 0x111   :  { %p9691_p11 = pnand %p9690_p10, %p9684_p7 }
 0x113   :  { %9694 = shalt.err (!%p9691_p11)
}
 0x114   :  { %353 = dma.hbm_to_vmem [thread:$0]  %s10418_s27, 16, %s351_s14, [#allocation40]  }
 0x115   :  { %s10265_s25 = smov [#allocation42]   ;;  %s10266_s10 = smov [#allocation45]  }
 0x116   :  { %s372_s19 = sshll.u32 %s10265_s25, 4  ;;  %s391_s16 = sshll.u32 %s10266_s10, 4  ;;  %s373_s19 = int_to_ptr.vmem [resolvable:$true] %s372_s19  ;;  %s10562_s16 = int_to_ptr.vmem [resolvable:$true] %s391_s16 }
 0x117   :  { %s9695_s6 = scalar_lea.hbm %s10428_s12, 16 }
 0x118   :  { %p9696_p12 = scmp.ne.s32.totalorder %s10428_s12, %s9695_s6  ;;  %p9699_p13 = scmp.lt.u32.totalorder %s9695_s6, %s10428_s12 }
 0x11a   :  { %p9701_p0 = pnand %p9699_p13, %p9696_p12 }
 0x11c   :  { %9704 = shalt.err (!%p9701_p0)
}
 0x11d   :  { %s9705_s18 = scalar_lea.vmem %s373_s19, 16  ;;  %s9709_s22 = scalar_lea.vmem %s373_s19, 32 }
 0x11e   :  { %p9706_p1 = scmp.ne.s32.totalorder %s373_s19, %s9705_s18  ;;  %p9710_p2 = scmp.lt.s32.totalorder %s373_s19, %s373_s19 }
 0x11f   :  { %p9711_p3 = scmp.lt.s32.totalorder %s9709_s22, %s9705_s18 }
 0x121   :  { %p9712_p4 = por %p9711_p3, %p9710_p2 }
 0x123   :  { %p9713_p5 = pnand %p9712_p4, %p9706_p1 }
 0x125   :  { %9716 = shalt.err (!%p9713_p5)
}
 0x126   :  { %375 = dma.hbm_to_vmem [thread:$0]  %s10428_s12, 16, %s373_s19, [#allocation43]  }
 0x127   :  { %s9717_s27 = scalar_lea.hbm %s10438_s21, 5120 }
 0x128   :  { %p9718_p6 = scmp.ne.s32.totalorder %s10438_s21, %s9717_s27  ;;  %p9721_p7 = scmp.lt.u32.totalorder %s9717_s27, %s10438_s21 }
 0x12a   :  { %p9723_p8 = pnand %p9721_p7, %p9718_p6 }
 0x12c   :  { %9726 = shalt.err (!%p9723_p8)
}
 0x12d   :  { %s9727_s9 = scalar_lea.vmem %s10562_s16, 5120  ;;  %p9732_p10 = scmp.lt.s32.totalorder %s10562_s16, %s10562_s16 }
 0x12e   :  { %p9728_p9 = scmp.ne.s32.totalorder %s10562_s16, %s9727_s9  ;;  %p9733_p11 = scmp.lt.s32.totalorder %s9727_s9, %s9727_s9 }
 0x130   :  { %p9734_p12 = por %p9733_p11, %p9732_p10 }
 0x132   :  { %p9735_p13 = pnand %p9734_p12, %p9728_p9 }
 0x134   :  { %9738 = shalt.err (!%p9735_p13)
}
 0x135   :  { %s11274_s12 = sld [smem:[#allocation89_spill]]  ;;  %s10267_s23 = smov [#allocation48]  }
 0x136   :  { %397 = dma.hbm_to_vmem [thread:$0]  %s10438_s21, 5120, %s10562_s16, [#allocation46], %s10253_s11, %s10253_s11, %s10254_s15  }
 0x137   :  { %s414_s3 = sshll.u32 %s10267_s23, 4  ;;  %s10268_s20 = smov [#allocation51]   ;;  %s415_s3 = int_to_ptr.vmem [resolvable:$true] %s414_s3 }
 0x138   :  { %s436_s26 = sshll.u32 %s10268_s20, 4  ;;  %s437_s26 = int_to_ptr.vmem [resolvable:$true] %s436_s26 }
 0x13b   :  { %s9739_s4 = scalar_lea.hbm %s11274_s12, 16 }
 0x13c   :  { %p9740_p0 = scmp.ne.s32.totalorder %s11274_s12, %s9739_s4  ;;  %p9743_p1 = scmp.lt.u32.totalorder %s9739_s4, %s11274_s12 }
 0x13e   :  { %p9745_p2 = pnand %p9743_p1, %p9740_p0 }
 0x140   :  { %9748 = shalt.err (!%p9745_p2)
}
 0x141   :  { %s9749_s0 = scalar_lea.vmem %s415_s3, 16  ;;  %s9753_s28 = scalar_lea.vmem %s415_s3, 32 }
 0x142   :  { %p9750_p3 = scmp.ne.s32.totalorder %s415_s3, %s9749_s0  ;;  %p9754_p4 = scmp.lt.s32.totalorder %s415_s3, %s415_s3 }
 0x143   :  { %p9755_p5 = scmp.lt.s32.totalorder %s9753_s28, %s9749_s0 }
 0x145   :  { %p9756_p6 = por %p9755_p5, %p9754_p4 }
 0x147   :  { %p9757_p7 = pnand %p9756_p6, %p9750_p3 }
 0x149   :  { %9760 = shalt.err (!%p9757_p7)
}
 0x14a   :  { %s11275_s21 = sld [smem:[#allocation91_spill]] }
 0x14b   :  { %417 = dma.hbm_to_vmem [thread:$0]  %s11274_s12, 16, %s415_s3, [#allocation49]  }
 0x150   :  { %s9761_s14 = scalar_lea.hbm %s11275_s21, 16 }
 0x151   :  { %p9762_p8 = scmp.ne.s32.totalorder %s11275_s21, %s9761_s14  ;;  %p9765_p9 = scmp.lt.u32.totalorder %s9761_s14, %s11275_s21 }
 0x153   :  { %p9767_p10 = pnand %p9765_p9, %p9762_p8 }
 0x155   :  { %9770 = shalt.err (!%p9767_p10)
}
 0x156   :  { %s9771_s1 = scalar_lea.vmem %s437_s26, 16  ;;  %s9775_s7 = scalar_lea.vmem %s437_s26, 32 }
 0x157   :  { %p9772_p11 = scmp.ne.s32.totalorder %s437_s26, %s9771_s1  ;;  %p9776_p12 = scmp.lt.s32.totalorder %s437_s26, %s437_s26 }
 0x158   :  { %p9777_p13 = scmp.lt.s32.totalorder %s9775_s7, %s9771_s1 }
 0x15a   :  { %p9778_p0 = por %p9777_p13, %p9776_p12 }
 0x15c   :  { %p9779_p1 = pnand %p9778_p0, %p9772_p11 }
 0x15e   :  { %9782 = shalt.err (!%p9779_p1)
}
 0x15f   :  { %s11276_s17 = sld [smem:[#allocation73_spill]]  ;;  %s10269_s30 = smov [#allocation3]  }
 0x160   :  { %439 = dma.hbm_to_vmem [thread:$0]  %s11275_s21, 16, %s437_s26, [#allocation52]  }
 0x161   :  { %s101_s2 = sshll.u32 %s10269_s30, 4  ;;  %s10270_s24 = smov [#allocation8]   ;;  %s102_s2 = int_to_ptr.vmem [resolvable:$true] %s101_s2 }
 0x162   :  { %s126_s25 = sshll.u32 %s10270_s24, 4  ;;  %s127_s25 = int_to_ptr.vmem [resolvable:$true] %s126_s25 }
 0x165   :  { %s9783_s19 = scalar_lea.hbm %s11276_s17, 256 }
 0x166   :  { %p9784_p2 = scmp.ne.s32.totalorder %s11276_s17, %s9783_s19  ;;  %p9787_p3 = scmp.lt.u32.totalorder %s9783_s19, %s11276_s17 }
 0x168   :  { %p9789_p4 = pnand %p9787_p3, %p9784_p2 }
 0x16a   :  { %9792 = shalt.err (!%p9789_p4)
}
 0x16b   :  { %s9793_s10 = scalar_lea.vmem %s102_s2, 256  ;;  %p9798_p6 = scmp.lt.s32.totalorder %s102_s2, %s102_s2 }
 0x16c   :  { %p9794_p5 = scmp.ne.s32.totalorder %s102_s2, %s9793_s10  ;;  %p9799_p7 = scmp.lt.s32.totalorder %s9793_s10, %s9793_s10 }
 0x16e   :  { %p9800_p8 = por %p9799_p7, %p9798_p6 }
 0x170   :  { %p9801_p9 = pnand %p9800_p8, %p9794_p5 }
 0x172   :  { %9804 = shalt.err (!%p9801_p9)
}
 0x173   :  { %s11277_s16 = sld [smem:[#allocation74_spill]] }
 0x174   :  { %107 = dma.hbm_to_vmem [thread:$0]  %s11276_s17, 256, %s102_s2, [#allocation4], %s10253_s11, %s10253_s11, %s10254_s15  }
 0x179   :  { %s9805_s6 = scalar_lea.hbm %s11277_s16, 16 }
 0x17a   :  { %p9806_p10 = scmp.ne.s32.totalorder %s11277_s16, %s9805_s6  ;;  %p9809_p11 = scmp.lt.u32.totalorder %s9805_s6, %s11277_s16 }
 0x17c   :  { %p9811_p12 = pnand %p9809_p11, %p9806_p10 }
 0x17e   :  { %9814 = shalt.err (!%p9811_p12)
}
 0x17f   :  { %s9815_s18 = scalar_lea.vmem %s127_s25, 16  ;;  %s9819_s22 = scalar_lea.vmem %s127_s25, 32 }
 0x180   :  { %p9816_p13 = scmp.ne.s32.totalorder %s127_s25, %s9815_s18  ;;  %p9820_p0 = scmp.lt.s32.totalorder %s127_s25, %s127_s25 }
 0x181   :  { %p9821_p1 = scmp.lt.s32.totalorder %s9819_s22, %s9815_s18 }
 0x183   :  { %p9822_p2 = por %p9821_p1, %p9820_p0 }
 0x185   :  { %p9823_p3 = pnand %p9822_p2, %p9816_p13 }
 0x187   :  { %9826 = shalt.err (!%p9823_p3)
}
 0x188   :  { %s11278_s27 = sld [smem:[#allocation75_spill]]  ;;  %s10271_s9 = smov [#allocation11]  }
 0x189   :  { %129 = dma.hbm_to_vmem [thread:$0]  %s11277_s16, 16, %s127_s25, [#allocation7]  }
 0x18a   :  { %s145_s12 = sshll.u32 %s10271_s9, 4  ;;  %s10272_s23 = smov [#allocation14]   ;;  %s146_s12 = int_to_ptr.vmem [resolvable:$true] %s145_s12 }
 0x18b   :  { %s168_s3 = sshll.u32 %s10272_s23, 4  ;;  %s169_s3 = int_to_ptr.vmem [resolvable:$true] %s168_s3 }
 0x18e   :  { %s9827_s20 = scalar_lea.hbm %s11278_s27, 5120 }
 0x18f   :  { %p9828_p4 = scmp.ne.s32.totalorder %s11278_s27, %s9827_s20  ;;  %p9831_p5 = scmp.lt.u32.totalorder %s9827_s20, %s11278_s27 }
 0x191   :  { %p9833_p6 = pnand %p9831_p5, %p9828_p4 }
 0x193   :  { %9836 = shalt.err (!%p9833_p6)
}
 0x194   :  { %s9837_s26 = scalar_lea.vmem %s146_s12, 5120  ;;  %p9842_p8 = scmp.lt.s32.totalorder %s146_s12, %s146_s12 }
 0x195   :  { %p9838_p7 = scmp.ne.s32.totalorder %s146_s12, %s9837_s26  ;;  %p9843_p9 = scmp.lt.s32.totalorder %s9837_s26, %s9837_s26 }
 0x197   :  { %p9844_p10 = por %p9843_p9, %p9842_p8 }
 0x199   :  { %p9845_p11 = pnand %p9844_p10, %p9838_p7 }
 0x19b   :  { %9848 = shalt.err (!%p9845_p11)
}
 0x19c   :  { %s11279_s4 = sld [smem:[#allocation76_spill]] }
 0x19d   :  { %151 = dma.hbm_to_vmem [thread:$0]  %s11278_s27, 5120, %s146_s12, [#allocation10], %s10253_s11, %s10253_s11, %s10254_s15  }
 0x1a2   :  { %s9849_s0 = scalar_lea.hbm %s11279_s4, 16 }
 0x1a3   :  { %p9850_p12 = scmp.ne.s32.totalorder %s11279_s4, %s9849_s0  ;;  %p9853_p13 = scmp.lt.u32.totalorder %s9849_s0, %s11279_s4 }
 0x1a5   :  { %p9855_p0 = pnand %p9853_p13, %p9850_p12 }
 0x1a7   :  { %9858 = shalt.err (!%p9855_p0)
}
 0x1a8   :  { %s9859_s28 = scalar_lea.vmem %s169_s3, 16  ;;  %s9863_s21 = scalar_lea.vmem %s169_s3, 32 }
 0x1a9   :  { %p9860_p1 = scmp.ne.s32.totalorder %s169_s3, %s9859_s28  ;;  %p9864_p2 = scmp.lt.s32.totalorder %s169_s3, %s169_s3 }
 0x1aa   :  { %p9865_p3 = scmp.lt.s32.totalorder %s9863_s21, %s9859_s28 }
 0x1ac   :  { %p9866_p4 = por %p9865_p3, %p9864_p2 }
 0x1ae   :  { %p9867_p5 = pnand %p9866_p4, %p9860_p1 }
 0x1b0   :  { %9870 = shalt.err (!%p9867_p5)
}
 0x1b1   :  { %s11280_s14 = sld [smem:[#allocation77_spill]]  ;;  %s10273_s1 = smov [#allocation17]  }
 0x1b2   :  { %171 = dma.hbm_to_vmem [thread:$0]  %s11279_s4, 16, %s169_s3, [#allocation13]  }
 0x1b3   :  { %s190_s7 = sshll.u32 %s10273_s1, 4  ;;  %s10274_s17 = smov [#allocation20]   ;;  %s191_s7 = int_to_ptr.vmem [resolvable:$true] %s190_s7 }
 0x1b4   :  { %s209_s30 = sshll.u32 %s10274_s17, 4  ;;  %s10610_s30 = int_to_ptr.vmem [resolvable:$true] %s209_s30 }
 0x1b7   :  { %s9871_s2 = scalar_lea.hbm %s11280_s14, 16 }
 0x1b8   :  { %p9872_p6 = scmp.ne.s32.totalorder %s11280_s14, %s9871_s2  ;;  %p9875_p7 = scmp.lt.u32.totalorder %s9871_s2, %s11280_s14 }
 0x1ba   :  { %p9877_p8 = pnand %p9875_p7, %p9872_p6 }
 0x1bc   :  { %9880 = shalt.err (!%p9877_p8)
}
 0x1bd   :  { %s9881_s24 = scalar_lea.vmem %s191_s7, 16  ;;  %s9885_s25 = scalar_lea.vmem %s191_s7, 32 }
 0x1be   :  { %p9882_p9 = scmp.ne.s32.totalorder %s191_s7, %s9881_s24  ;;  %p9886_p10 = scmp.lt.s32.totalorder %s191_s7, %s191_s7 }
 0x1bf   :  { %p9887_p11 = scmp.lt.s32.totalorder %s9885_s25, %s9881_s24 }
 0x1c1   :  { %p9888_p12 = por %p9887_p11, %p9886_p10 }
 0x1c3   :  { %p9889_p13 = pnand %p9888_p12, %p9882_p9 }
 0x1c5   :  { %9892 = shalt.err (!%p9889_p13)
}
 0x1c6   :  { %s11281_s19 = sld [smem:[#allocation78_spill]] }
 0x1c7   :  { %193 = dma.hbm_to_vmem [thread:$0]  %s11280_s14, 16, %s191_s7, [#allocation16]  }
 0x1cc   :  { %s9893_s10 = scalar_lea.hbm %s11281_s19, 1024 }
 0x1cd   :  { %p9894_p0 = scmp.ne.s32.totalorder %s11281_s19, %s9893_s10  ;;  %p9897_p1 = scmp.lt.u32.totalorder %s9893_s10, %s11281_s19 }
 0x1cf   :  { %p9899_p2 = pnand %p9897_p1, %p9894_p0 }
 0x1d1   :  { %9902 = shalt.err (!%p9899_p2)
}
 0x1d2   :  { %s9903_s16 = scalar_lea.vmem %s10610_s30, 1024  ;;  %p9908_p4 = scmp.lt.s32.totalorder %s10610_s30, %s10610_s30 }
 0x1d3   :  { %p9904_p3 = scmp.ne.s32.totalorder %s10610_s30, %s9903_s16  ;;  %p9909_p5 = scmp.lt.s32.totalorder %s9903_s16, %s9903_s16 }
 0x1d5   :  { %p9910_p6 = por %p9909_p5, %p9908_p4 }
 0x1d7   :  { %p9911_p7 = pnand %p9910_p6, %p9904_p3 }
 0x1d9   :  { %9914 = shalt.err (!%p9911_p7)
}
 0x1da   :  { %s11282_s6 = sld [smem:[#allocation79_spill]]  ;;  %s10275_s18 = smov [#allocation23]  }
 0x1db   :  { %215 = dma.hbm_to_vmem [thread:$0]  %s11281_s19, 1024, %s10610_s30, [#allocation19], %s10253_s11, %s10253_s11, %s10254_s15  }
 0x1dc   :  { %s232_s22 = sshll.u32 %s10275_s18, 4  ;;  %s10276_s27 = smov [#allocation26]   ;;  %s233_s22 = int_to_ptr.vmem [resolvable:$true] %s232_s22 }
 0x1dd   :  { %s254_s9 = sshll.u32 %s10276_s27, 4  ;;  %s255_s9 = int_to_ptr.vmem [resolvable:$true] %s254_s9 }
 0x1e0   :  { %s9915_s12 = scalar_lea.hbm %s11282_s6, 16 }
 0x1e1   :  { %p9916_p8 = scmp.ne.s32.totalorder %s11282_s6, %s9915_s12  ;;  %p9919_p9 = scmp.lt.u32.totalorder %s9915_s12, %s11282_s6 }
 0x1e3   :  { %p9921_p10 = pnand %p9919_p9, %p9916_p8 }
 0x1e5   :  { %9924 = shalt.err (!%p9921_p10)
}
 0x1e6   :  { %s9925_s23 = scalar_lea.vmem %s233_s22, 16  ;;  %s9929_s3 = scalar_lea.vmem %s233_s22, 32 }
 0x1e7   :  { %p9926_p11 = scmp.ne.s32.totalorder %s233_s22, %s9925_s23  ;;  %p9930_p12 = scmp.lt.s32.totalorder %s233_s22, %s233_s22 }
 0x1e8   :  { %p9931_p13 = scmp.lt.s32.totalorder %s9929_s3, %s9925_s23 }
 0x1ea   :  { %p9932_p0 = por %p9931_p13, %p9930_p12 }
 0x1ec   :  { %p9933_p1 = pnand %p9932_p0, %p9926_p11 }
 0x1ee   :  { %9936 = shalt.err (!%p9933_p1)
}
 0x1ef   :  { %s11283_s20 = sld [smem:[#allocation80_spill]] }
 0x1f0   :  { %235 = dma.hbm_to_vmem [thread:$0]  %s11282_s6, 16, %s233_s22, [#allocation22]  }
 0x1f5   :  { %s9937_s26 = scalar_lea.hbm %s11283_s20, 16 }
 0x1f6   :  { %p9938_p2 = scmp.ne.s32.totalorder %s11283_s20, %s9937_s26  ;;  %p9941_p3 = scmp.lt.u32.totalorder %s9937_s26, %s11283_s20 }
 0x1f8   :  { %p9943_p4 = pnand %p9941_p3, %p9938_p2 }
 0x1fa   :  { %9946 = shalt.err (!%p9943_p4)
}
 0x1fb   :  { %s9947_s4 = scalar_lea.vmem %s255_s9, 16  ;;  %s9951_s0 = scalar_lea.vmem %s255_s9, 32 }
 0x1fc   :  { %p9948_p5 = scmp.ne.s32.totalorder %s255_s9, %s9947_s4  ;;  %p9952_p6 = scmp.lt.s32.totalorder %s255_s9, %s255_s9 }
 0x1fd   :  { %p9953_p7 = scmp.lt.s32.totalorder %s9951_s0, %s9947_s4 }
 0x1ff   :  { %p9954_p8 = por %p9953_p7, %p9952_p6 }
 0x201   :  { %p9955_p9 = pnand %p9954_p8, %p9948_p5 }
 0x203   :  { %9958 = shalt.err (!%p9955_p9)
}
 0x204   :  { %s11284_s28 = sld [smem:[#allocation81_spill]]  ;;  %s10277_s21 = smov [#allocation29]  }
 0x205   :  { %257 = dma.hbm_to_vmem [thread:$0]  %s11283_s20, 16, %s255_s9, [#allocation25]  }
 0x206   :  { %s273_s14 = sshll.u32 %s10277_s21, 4  ;;  %s10278_s1 = smov [#allocation32]   ;;  %s274_s14 = int_to_ptr.vmem [resolvable:$true] %s273_s14 }
 0x207   :  { %s296_s7 = sshll.u32 %s10278_s1, 4  ;;  %s297_s7 = int_to_ptr.vmem [resolvable:$true] %s296_s7 }
 0x20a   :  { %s9959_s17 = scalar_lea.hbm %s11284_s28, 5120 }
 0x20b   :  { %p9960_p10 = scmp.ne.s32.totalorder %s11284_s28, %s9959_s17  ;;  %p9963_p11 = scmp.lt.u32.totalorder %s9959_s17, %s11284_s28 }
 0x20d   :  { %p9965_p12 = pnand %p9963_p11, %p9960_p10 }
 0x20f   :  { %9968 = shalt.err (!%p9965_p12)
}
 0x210   :  { %s9969_s30 = scalar_lea.vmem %s274_s14, 5120  ;;  %p9974_p0 = scmp.lt.s32.totalorder %s274_s14, %s274_s14 }
 0x211   :  { %p9970_p13 = scmp.ne.s32.totalorder %s274_s14, %s9969_s30  ;;  %p9975_p1 = scmp.lt.s32.totalorder %s9969_s30, %s9969_s30 }
 0x213   :  { %p9976_p2 = por %p9975_p1, %p9974_p0 }
 0x215   :  { %p9977_p3 = pnand %p9976_p2, %p9970_p13 }
 0x217   :  { %9980 = shalt.err (!%p9977_p3)
}
 0x218   :  { %s11285_s2 = sld [smem:[#allocation82_spill]] }
 0x219   :  { %279 = dma.hbm_to_vmem [thread:$0]  %s11284_s28, 5120, %s274_s14, [#allocation28], %s10253_s11, %s10253_s11, %s10254_s15  }
 0x21e   :  { %s9981_s24 = scalar_lea.hbm %s11285_s2, 16 }
 0x21f   :  { %p9982_p4 = scmp.ne.s32.totalorder %s11285_s2, %s9981_s24  ;;  %p9985_p5 = scmp.lt.u32.totalorder %s9981_s24, %s11285_s2 }
 0x221   :  { %p9987_p6 = pnand %p9985_p5, %p9982_p4 }
 0x223   :  { %9990 = shalt.err (!%p9987_p6)
}
 0x224   :  { %s9991_s25 = scalar_lea.vmem %s297_s7, 16  ;;  %s9995_s19 = scalar_lea.vmem %s297_s7, 32 }
 0x225   :  { %p9992_p7 = scmp.ne.s32.totalorder %s297_s7, %s9991_s25  ;;  %p9996_p8 = scmp.lt.s32.totalorder %s297_s7, %s297_s7 }
 0x226   :  { %p9997_p9 = scmp.lt.s32.totalorder %s9995_s19, %s9991_s25 }
 0x228   :  { %p9998_p10 = por %p9997_p9, %p9996_p8 }
 0x22a   :  { %p9999_p11 = pnand %p9998_p10, %p9992_p7 }
 0x22c   :  { %10002 = shalt.err (!%p9999_p11)
}
 0x22d   :  { %s11286_s10 = sld [smem:[#allocation83_spill]]  ;;  %s10279_s16 = smov [#allocation35]  }
 0x22e   :  { %299 = dma.hbm_to_vmem [thread:$0]  %s11285_s2, 16, %s297_s7, [#allocation31]  }
 0x22f   :  { %s318_s6 = sshll.u32 %s10279_s16, 4  ;;  %s10280_s18 = smov [#allocation38]   ;;  %s319_s6 = int_to_ptr.vmem [resolvable:$true] %s318_s6 }
 0x230   :  { %s340_s22 = sshll.u32 %s10280_s18, 4  ;;  %s341_s22 = int_to_ptr.vmem [resolvable:$true] %s340_s22 }
 0x233   :  { %s10003_s27 = scalar_lea.hbm %s11286_s10, 16 }
 0x234   :  { %p10004_p12 = scmp.ne.s32.totalorder %s11286_s10, %s10003_s27  ;;  %p10007_p13 = scmp.lt.u32.totalorder %s10003_s27, %s11286_s10 }
 0x236   :  { %p10009_p0 = pnand %p10007_p13, %p10004_p12 }
 0x238   :  { %10012 = shalt.err (!%p10009_p0)
}
 0x239   :  { %s10013_s9 = scalar_lea.vmem %s319_s6, 16  ;;  %s10017_s12 = scalar_lea.vmem %s319_s6, 32 }
 0x23a   :  { %p10014_p1 = scmp.ne.s32.totalorder %s319_s6, %s10013_s9  ;;  %p10018_p2 = scmp.lt.s32.totalorder %s319_s6, %s319_s6 }
 0x23b   :  { %p10019_p3 = scmp.lt.s32.totalorder %s10017_s12, %s10013_s9 }
 0x23d   :  { %p10020_p4 = por %p10019_p3, %p10018_p2 }
 0x23f   :  { %p10021_p5 = pnand %p10020_p4, %p10014_p1 }
 0x241   :  { %10024 = shalt.err (!%p10021_p5)
}
 0x242   :  { %s11287_s23 = sld [smem:[#allocation85_spill]] }
 0x243   :  { %321 = dma.hbm_to_vmem [thread:$0]  %s11286_s10, 16, %s319_s6, [#allocation34]  }
 0x248   :  { %s10025_s3 = scalar_lea.hbm %s11287_s23, 16 }
 0x249   :  { %p10026_p6 = scmp.ne.s32.totalorder %s11287_s23, %s10025_s3  ;;  %p10029_p7 = scmp.lt.u32.totalorder %s10025_s3, %s11287_s23 }
 0x24b   :  { %p10031_p8 = pnand %p10029_p7, %p10026_p6 }
 0x24d   :  { %10034 = shalt.err (!%p10031_p8)
}
 0x24e   :  { %s10035_s20 = scalar_lea.vmem %s341_s22, 16  ;;  %s10039_s26 = scalar_lea.vmem %s341_s22, 32 }
 0x24f   :  { %p10036_p9 = scmp.ne.s32.totalorder %s341_s22, %s10035_s20  ;;  %p10040_p10 = scmp.lt.s32.totalorder %s341_s22, %s341_s22 }
 0x250   :  { %p10041_p11 = scmp.lt.s32.totalorder %s10039_s26, %s10035_s20 }
 0x252   :  { %p10042_p12 = por %p10041_p11, %p10040_p10 }
 0x254   :  { %p10043_p13 = pnand %p10042_p12, %p10036_p9 }
 0x256   :  { %10046 = shalt.err (!%p10043_p13)
}
 0x257   :  { %s11288_s4 = sld [smem:[#allocation86_spill]]  ;;  %s10281_s0 = smov [#allocation41]  }
 0x258   :  { %343 = dma.hbm_to_vmem [thread:$0]  %s11287_s23, 16, %s341_s22, [#allocation37]  }
 0x259   :  { %s359_s28 = sshll.u32 %s10281_s0, 4  ;;  %s10282_s21 = smov [#allocation44]   ;;  %s360_s28 = int_to_ptr.vmem [resolvable:$true] %s359_s28 }
 0x25a   :  { %s382_s14 = sshll.u32 %s10282_s21, 4  ;;  %s383_s14 = int_to_ptr.vmem [resolvable:$true] %s382_s14 }
 0x25d   :  { %s10047_s1 = scalar_lea.hbm %s11288_s4, 8192 }
 0x25e   :  { %p10048_p0 = scmp.ne.s32.totalorder %s11288_s4, %s10047_s1  ;;  %p10051_p1 = scmp.lt.u32.totalorder %s10047_s1, %s11288_s4 }
 0x260   :  { %p10053_p2 = pnand %p10051_p1, %p10048_p0 }
 0x262   :  { %10056 = shalt.err (!%p10053_p2)
}
 0x263   :  { %s10057_s7 = scalar_lea.vmem %s360_s28, 8192  ;;  %p10062_p4 = scmp.lt.s32.totalorder %s360_s28, %s360_s28 }
 0x264   :  { %p10058_p3 = scmp.ne.s32.totalorder %s360_s28, %s10057_s7  ;;  %p10063_p5 = scmp.lt.s32.totalorder %s10057_s7, %s10057_s7 }
 0x266   :  { %p10064_p6 = por %p10063_p5, %p10062_p4 }
 0x268   :  { %p10065_p7 = pnand %p10064_p6, %p10058_p3 }
 0x26a   :  { %10068 = shalt.err (!%p10065_p7)
}
 0x26b   :  { %s11289_s17 = sld [smem:[#allocation87_spill]] }
 0x26c   :  { %365 = dma.hbm_to_vmem [thread:$0]  %s11288_s4, 8192, %s360_s28, [#allocation40], %s10253_s11, %s10253_s11, %s10254_s15  }
 0x271   :  { %s10069_s30 = scalar_lea.hbm %s11289_s17, 16 }
 0x272   :  { %p10070_p8 = scmp.ne.s32.totalorder %s11289_s17, %s10069_s30  ;;  %p10073_p9 = scmp.lt.u32.totalorder %s10069_s30, %s11289_s17 }
 0x274   :  { %p10075_p10 = pnand %p10073_p9, %p10070_p8 }
 0x276   :  { %10078 = shalt.err (!%p10075_p10)
}
 0x277   :  { %s10079_s2 = scalar_lea.vmem %s383_s14, 16  ;;  %s10083_s24 = scalar_lea.vmem %s383_s14, 32 }
 0x278   :  { %p10080_p11 = scmp.ne.s32.totalorder %s383_s14, %s10079_s2  ;;  %p10084_p12 = scmp.lt.s32.totalorder %s383_s14, %s383_s14 }
 0x279   :  { %p10085_p13 = scmp.lt.s32.totalorder %s10083_s24, %s10079_s2 }
 0x27b   :  { %p10086_p0 = por %p10085_p13, %p10084_p12 }
 0x27d   :  { %p10087_p1 = pnand %p10086_p0, %p10080_p11 }
 0x27f   :  { %10090 = shalt.err (!%p10087_p1)
}
 0x280   :  { %s11290_s25 = sld [smem:[#allocation88_spill]]  ;;  %s10283_s19 = smov [#allocation47]  }
 0x281   :  { %385 = dma.hbm_to_vmem [thread:$0]  %s11289_s17, 16, %s383_s14, [#allocation43]  }
 0x282   :  { %s404_s10 = sshll.u32 %s10283_s19, 4  ;;  %s10284_s16 = smov [#allocation50]   ;;  %s405_s10 = int_to_ptr.vmem [resolvable:$true] %s404_s10 }
 0x283   :  { %s423_s6 = sshll.u32 %s10284_s16, 4  ;;  %s10666_s6 = int_to_ptr.vmem [resolvable:$true] %s423_s6 }
 0x286   :  { %s10091_s18 = scalar_lea.hbm %s11290_s25, 16 }
 0x287   :  { %p10092_p2 = scmp.ne.s32.totalorder %s11290_s25, %s10091_s18  ;;  %p10095_p3 = scmp.lt.u32.totalorder %s10091_s18, %s11290_s25 }
 0x289   :  { %p10097_p4 = pnand %p10095_p3, %p10092_p2 }
 0x28b   :  { %10100 = shalt.err (!%p10097_p4)
}
 0x28c   :  { %s10101_s22 = scalar_lea.vmem %s405_s10, 16  ;;  %s10105_s27 = scalar_lea.vmem %s405_s10, 32 }
 0x28d   :  { %p10102_p5 = scmp.ne.s32.totalorder %s405_s10, %s10101_s22  ;;  %p10106_p6 = scmp.lt.s32.totalorder %s405_s10, %s405_s10 }
 0x28e   :  { %p10107_p7 = scmp.lt.s32.totalorder %s10105_s27, %s10101_s22 }
 0x290   :  { %p10108_p8 = por %p10107_p7, %p10106_p6 }
 0x292   :  { %p10109_p9 = pnand %p10108_p8, %p10102_p5 }
 0x294   :  { %10112 = shalt.err (!%p10109_p9)
}
 0x295   :  { %s11291_s9 = sld [smem:[#allocation90_spill]] }
 0x296   :  { %407 = dma.hbm_to_vmem [thread:$0]  %s11290_s25, 16, %s405_s10, [#allocation46]  }
 0x29b   :  { %s10113_s12 = scalar_lea.hbm %s11291_s9, 3072 }
 0x29c   :  { %p10114_p10 = scmp.ne.s32.totalorder %s11291_s9, %s10113_s12  ;;  %p10117_p11 = scmp.lt.u32.totalorder %s10113_s12, %s11291_s9 }
 0x29e   :  { %p10119_p12 = pnand %p10117_p11, %p10114_p10 }
 0x2a0   :  { %10122 = shalt.err (!%p10119_p12)
}
 0x2a1   :  { %s10123_s23 = scalar_lea.vmem %s10666_s6, 3072  ;;  %p10128_p0 = scmp.lt.s32.totalorder %s10666_s6, %s10666_s6 }
 0x2a2   :  { %p10124_p13 = scmp.ne.s32.totalorder %s10666_s6, %s10123_s23  ;;  %p10129_p1 = scmp.lt.s32.totalorder %s10123_s23, %s10123_s23 }
 0x2a4   :  { %p10130_p2 = por %p10129_p1, %p10128_p0 }
 0x2a6   :  { %p10131_p3 = pnand %p10130_p2, %p10124_p13 }
 0x2a8   :  { %10134 = shalt.err (!%p10131_p3)
}
 0x2a9   :  { %429 = dma.hbm_to_vmem [thread:$0]  %s11291_s9, 3072, %s10666_s6, [#allocation49], %s10253_s11, %s10253_s11, %s10254_s15  }
 0x2aa   :  { %s10285_s3 = smov [#allocation53]   ;;  %s10135_s26 = scalar_lea.hbm %s10463_s29, 16 }
 0x2ab   :  { %s446_s20 = sshll.u32 %s10285_s3, 4  ;;  %p10136_p4 = scmp.ne.s32.totalorder %s10463_s29, %s10135_s26  ;;  %s447_s20 = int_to_ptr.vmem [resolvable:$true] %s446_s20 }
 0x2ac   :  { %p10139_p5 = scmp.lt.u32.totalorder %s10135_s26, %s10463_s29 }
 0x2ae   :  { %p10141_p6 = pnand %p10139_p5, %p10136_p4 }
 0x2b0   :  { %10144 = shalt.err (!%p10141_p6)
}
 0x2b1   :  { %s10145_s4 = scalar_lea.vmem %s447_s20, 16  ;;  %s10149_s0 = scalar_lea.vmem %s447_s20, 32 }
 0x2b2   :  { %p10146_p7 = scmp.ne.s32.totalorder %s447_s20, %s10145_s4  ;;  %p10150_p8 = scmp.lt.s32.totalorder %s447_s20, %s447_s20 }
 0x2b3   :  { %p10151_p9 = scmp.lt.s32.totalorder %s10149_s0, %s10145_s4 }
 0x2b5   :  { %p10152_p10 = por %p10151_p9, %p10150_p8 }
 0x2b7   :  { %p10153_p11 = pnand %p10152_p10, %p10146_p7 }
 0x2b9   :  { %10156 = shalt.err (!%p10153_p11)
}
 0x2ba   :  { %449 = dma.hbm_to_vmem [thread:$0]  %s10463_s29, 16, %s447_s20, [#allocation52]  }
 0x2bb   :  { %10179 = dma.done.wait [#allocation4], 256  }
 0x2bc   :  { %10180 = vsyncadd [#allocation4], 4294967040 }
 0x2bd   :  { %10181 = dma.done.wait [#allocation7], 8208  }
 0x2be   :  { %10182 = vsyncadd [#allocation7], 4294959088 }
 0x2bf   :  { %10183 = dma.done.wait [#allocation10], 5136  }
 0x2c0   :  { %10184 = vsyncadd [#allocation10], 4294962160 }
 0x2c1   :  { %10185 = dma.done.wait [#allocation13], 32  }
 0x2c2   :  { %10186 = vsyncadd [#allocation13], 4294967264 }
 0x2c3   :  { %10187 = dma.done.wait [#allocation16], 3088  }
 0x2c4   :  { %10188 = vsyncadd [#allocation16], 4294964208 }
 0x2c5   :  { %10189 = dma.done.wait [#allocation19], 1040  }
 0x2c6   :  { %10190 = vsyncadd [#allocation19], 4294966256 }
 0x2c7   :  { %10191 = dma.done.wait [#allocation22], 32  }
 0x2c8   :  { %10192 = vsyncadd [#allocation22], 4294967264 }
 0x2c9   :  { %10193 = dma.done.wait [#allocation25], 8208  }
 0x2ca   :  { %10194 = vsyncadd [#allocation25], 4294959088 }
 0x2cb   :  { %10195 = dma.done.wait [#allocation28], 5136  }
 0x2cc   :  { %10196 = vsyncadd [#allocation28], 4294962160 }
 0x2cd   :  { %10197 = dma.done.wait [#allocation31], 32  }
 0x2ce   :  { %10198 = vsyncadd [#allocation31], 4294967264 }
 0x2cf   :  { %10199 = dma.done.wait [#allocation34], 3088  }
 0x2d0   :  { %10200 = vsyncadd [#allocation34], 4294964208 }
 0x2d1   :  { %10201 = dma.done.wait [#allocation37], 32  }
 0x2d2   :  { %10202 = vsyncadd [#allocation37], 4294967264 }
 0x2d3   :  { %10203 = dma.done.wait [#allocation40], 8208  }
 0x2d4   :  { %10204 = vsyncadd [#allocation40], 4294959088 }
 0x2d5   :  { %10205 = dma.done.wait [#allocation43], 32  }
 0x2d6   :  { %10206 = vsyncadd [#allocation43], 4294967264 }
 0x2d7   :  { %10207 = dma.done.wait [#allocation46], 5136  }
 0x2d8   :  { %10208 = vsyncadd [#allocation46], 4294962160 }
 0x2d9   :  { %10209 = dma.done.wait [#allocation49], 3088  }
 0x2da   :  { %10210 = vsyncadd [#allocation49], 4294964208 }
 0x2db   :  { %10211 = dma.done.wait [#allocation52], 32  }
 0x2dc   :  { %10212 = vsyncadd [#allocation52], 4294967264  ;;  %v10286_v0 = vmov 0   ;;  %v9021_v1 = vld [vmem:[#allocation20] sm:$0xff]   ;;  %v9022_v2 = vld [vmem:[#allocation6 + $0x40] sm:$0xff]   ;;  %vm764_vm2 = vcmask 1046528  }
 0x2dd   :  { %554 = vst [vmem:[#allocation2] sm:$0xff] %v10286_v0  ;;  %555 = vst [vmem:[#allocation2 + $0x18] sm:$0xff] %v10286_v0  ;;  %8766 = vmatprep.subr.bf16.mxu0 %v9021_v1  ;;  %v9023_v3 = vld [vmem:[#allocation6] sm:$0xff]   ;;  %8099 = vmatprep.subr.bf16.mxu1 %v9022_v2  ;;  %v9024_v4 = vld [vmem:[#allocation20 + $0x8] sm:$0xff]   ;;  %vm729_vm0 = vsmask.f32 7424 }
 0x2de   :  { %556 = vst [vmem:[#allocation2 + $0x10] sm:$0xff] %v10286_v0  ;;  %557 = vst [vmem:[#allocation2 + $0x28] sm:$0xff] %v10286_v0  ;;  %8767 = vmatpush3.bf16.msra.mxu0 %v9021_v1  ;;  %8100 = vmatpush3.bf16.msra.mxu1 %v9023_v3  ;;  %v9025_v5 = vld [vmem:[#allocation6 + $0x48] sm:$0xff]   ;;  %v9027_v7 = vld [vmem:[#allocation20 + $0x10] sm:$0xff]   ;;  %vm879_vm1 = vsmask.f32 1280 }
 0x2df   :  { %8768 = vmatprep.subr.bf16.mxu0 %v9024_v4  ;;  %v9026_v6 = vld [vmem:[#allocation6 + $0x8] sm:$0xff]   ;;  %8101 = vmatprep.subr.bf16.mxu1 %v9025_v5  ;;  %v9028_v8 = vld [vmem:[#allocation6 + $0x50] sm:$0xff]   ;;  %v9031_v11 = vld [vmem:[#allocation6 + $0x58] sm:$0xff]   ;;  %vm791_vm3 = vcmask 1045504   ;;  %vm798_vm4 = vsmask.f32 5376 }
 0x2e0   :  { %v9029_v9 = vld [vmem:[#allocation6 + $0x10] sm:$0xff]   ;;  %v9030_v10 = vld [vmem:[#allocation20 + $0x18] sm:$0xff]   ;;  %v9032_v12 = vld [vmem:[#allocation6 + $0x18] sm:$0xff]   ;;  %vm837_vm5 = vcmask 1044480   ;;  %vm844_vm6 = vsmask.f32 4352 }
 0x2e1   :  { %v9033_v13 = vld [vmem:[#allocation20 + $0x20] sm:$0xff]   ;;  %v9034_v14 = vld [vmem:[#allocation6 + $0x60] sm:$0xff]   ;;  %v9036_v16 = vld [vmem:[#allocation20 + $0x28] sm:$0xff]   ;;  %vm1918_vm7 = vsmask.f32 6400  ;;  %vm1959_vm8 = vcmask 1040384  }
 0x2e2   :  { %8769 = vmatpush3.bf16.msra.mxu0 %v9024_v4  ;;  %8102 = vmatpush3.bf16.msra.mxu1 %v9026_v6  ;;  %v9035_v15 = vld [vmem:[#allocation6 + $0x20] sm:$0xff]   ;;  %v9037_v17 = vld [vmem:[#allocation6 + $0x68] sm:$0xff]   ;;  %v9040_v20 = vld [vmem:[#allocation6 + $0x70] sm:$0xff]   ;;  %vm2527_vm9 = vsmask.f32 256  ;;  %s11292_s29 = sld [smem:[#allocation84_spill]] }
 0x2e3   :  { %8770 = vmatprep.subr.bf16.mxu0 %v9027_v7  ;;  %8103 = vmatprep.subr.bf16.mxu1 %v9028_v8  ;;  %v9038_v18 = vld [vmem:[#allocation6 + $0x28] sm:$0xff]   ;;  %v9039_v19 = vld [vmem:[#allocation20 + $0x30] sm:$0xff]   ;;  %v9041_v21 = vld [vmem:[#allocation6 + $0x30] sm:$0xff]   ;;  %vm10288_vm10 = vmmov 0   ;;  %vm7490_vm11 = vcmask 1041409  }
 0x2e4   :  { %v9042_v22 = vld [vmem:[#allocation20 + $0x38] sm:$0xff]   ;;  %v10688_v23 = vld [vmem:[#allocation3] sm:$0xff]   ;;  %v9043_v24 = vld [vmem:[#allocation6 + $0x78] sm:$0xff]  }
 0x2e5   :  { %574 = vst [vmem:[#allocation2 + $0x8] sm:$0xff] %v10688_v23  ;;  %8782 = vmatprep.mubr.bf16.mxu0 %v10688_v23  ;;  %v10692_v25 = vld [vmem:[#allocation3 + $0x8] sm:$0xff]   ;;  %v9047_v27 = vld [vmem:[#allocation6 + $0xc0] sm:$0xff]   ;;  %v9051_v38 = vld [vmem:[#allocation6 + $0xc8] sm:$0xff]   ;;  %v772_v51 = vshrl.u32 %v10688_v23, 16  ;;  %v775_v57 = vshll.u32 %v10688_v23, 16 }
 0x2e6   :  { %8771 = vmatpush3.bf16.msra.mxu0 %v9027_v7  ;;  %8104 = vmatpush3.bf16.msra.mxu1 %v9029_v9  ;;  %v9045_v26 = vld [vmem:[#allocation6 + $0x38] sm:$0xff]   ;;  %575 = vst [vmem:[#allocation2 + $0x20] sm:$0xff] %v10692_v25  ;;  %v10695_v28 = vld [vmem:[#allocation2] sm:$0x80]  ;;  %v9052_v46 = vld [vmem:[#allocation6 + $0x88] sm:$0xff]   ;;  %v10704_v7 = vrot.slane %v10688_v23, 1 }
 0x2e7   :  { %8772 = vmatprep.subr.bf16.mxu0 %v9030_v10  ;;  %8105 = vmatprep.subr.bf16.mxu1 %v9031_v11  ;;  %v731_v29 = vshrl.u32 %v10695_v28, 16  ;;  %v733_v30 = vshll.u32 %v10695_v28, 16  ;;  %v9049_v31 = vld [vmem:[#allocation6 + $0x140] sm:$0xff]   ;;  %v9055_v48 = vld [vmem:[#allocation6 + $0xd0] sm:$0xff]   ;;  %v9059_v0 = vld [vmem:[#allocation6 + $0xd8] sm:$0xff]   ;;  %v774_v1 = vrot.slane %v772_v51, 1 }
 0x2e8   :  { %v713_v32 = vld [vmem:[#allocation2] sm:$0xc0]  ;;  %v9056_v56 = vld [vmem:[#allocation6 + $0x90] sm:$0xff]   ;;  %v9060_v5 = vld [vmem:[#allocation6 + $0x98] sm:$0xff]   ;;  %v777_v6 = vrot.slane %v775_v57, 2 }
 0x2e9   :  { %v9048_v33 = vld [vmem:[#allocation6 + $0x80] sm:$0xff]   ;;  %v881_v34 = vshrl.u32 %v713_v32, 16  ;;  %v735_v35 = vrot.slane %v733_v30, 1  ;;  %v884_v36 = vshll.u32 %v713_v32, 16  ;;  %v9053_v9 = vld [vmem:[#allocation6 + $0x148] sm:$0xff]   ;;  %v9071_v32 = vld [vmem:[#allocation6 + $0xf0] sm:$0xff]  }
 0x2ea   :  { %8773 = vmatpush3.bf16.msra.mxu0 %v9030_v10  ;;  %8106 = vmatpush3.bf16.msra.mxu1 %v9032_v12  ;;  %v9050_v3 = vld [vmem:[#allocation6 + $0x100] sm:$0xff]   ;;  %v778_v12 = vor.u32 %v777_v6, %v774_v1 }
 0x2eb   :  { %8774 = vmatprep.subr.bf16.mxu0 %v9033_v13  ;;  %8107 = vmatprep.subr.bf16.mxu1 %v9034_v14  ;;  %v736_v39 = vor.u32 %v735_v35, %v731_v29  ;;  %v883_v42 = vrot.slane %v881_v34, 6  ;;  %v886_v44 = vrot.slane %v884_v36, 7  ;;  %v9063_v11 = vld [vmem:[#allocation6 + $0xe0] sm:$0xff]   ;;  %v9054_v14 = vld [vmem:[#allocation6 + $0x108] sm:$0xff]   ;;  %v921_v34 = vshll.u32 %v10704_v7, 16  ;;  %v9062_v35 = vld [vmem:[#allocation6 + $0x118] sm:$0xff]  }
 0x2ec   :  { %v714_v37 = vld [vmem:[#allocation2 + $0x8] sm:$0x7f]  ;;  %v10716_v36 = vld [vmem:[#allocation2 + $0x18] sm:$0x80] }
 0x2ed   :  { %v738_v40 = vshll.u32 %v714_v37, 16  ;;  %v742_v41 = vshrl.u32 %v714_v37, 16  ;;  %v887_v60 = vor.u32 %v886_v44, %v883_v42  ;;  %v9072_v42 = vld [vmem:[#allocation6 + $0xb0] sm:$0xff]  }
 0x2ee   :  { %8775 = vmatpush3.bf16.msra.mxu0 %v9033_v13  ;;  %8108 = vmatpush3.bf16.msra.mxu1 %v9035_v15  ;;  %v765_v13 = vrot.slane %v10695_v28, 1  ;;  %v9064_v15 = vld [vmem:[#allocation6 + $0xa0] sm:$0xff]   ;;  %v9068_v28 = vld [vmem:[#allocation6 + $0xa8] sm:$0xff]  }
 0x2ef   :  { %8776 = vmatprep.subr.bf16.mxu0 %v9036_v16  ;;  %8109 = vmatprep.subr.bf16.mxu1 %v9037_v17  ;;  %v740_v43 = vrot.slane %v738_v40, 1  ;;  %v888_v45 = vrot.slane %v742_v41, 6  ;;  %v889_v47 = vrot.slane %v738_v40, 7  ;;  %v9057_v17 = vld [vmem:[#allocation6 + $0x150] sm:$0xff]   ;;  %v746_v40 = vshrl.u32 %v10716_v36, 16 }
 0x2f1   :  { %v741_v49 = vsel %vm729_vm0, %v736_v39, %v740_v43  ;;  %v744_v50 = vor.u32 %v742_v41, %v740_v43  ;;  %v890_v61 = vor.u32 %v889_v47, %v888_v45  ;;  %v9065_v39 = vld [vmem:[#allocation6 + $0x160] sm:$0xff]   ;;  %v748_v41 = vshll.u32 %v10716_v36, 16  ;;  %v715_v45 = vld [vmem:[#allocation2 + $0x18] sm:$0xc0] }
 0x2f2   :  { %8777 = vmatpush3.bf16.msra.mxu0 %v9036_v16  ;;  %8110 = vmatpush3.bf16.msra.mxu1 %v9038_v18  ;;  %v893_v52 = vshrl.u32 %v741_v49, 16  ;;  %v896_v53 = vshll.u32 %v741_v49, 16  ;;  %v927_v16 = vshrl.u32 %v778_v12, 16  ;;  %v930_v18 = vshll.u32 %v778_v12, 16 }
 0x2f3   :  { %8778 = vmatprep.subr.bf16.mxu0 %v9039_v19  ;;  %8111 = vmatprep.subr.bf16.mxu1 %v9040_v20  ;;  %v901_v54 = vshrl.u32 %v744_v50, 16  ;;  %v904_v55 = vshll.u32 %v744_v50, 16  ;;  %v891_v8 = vsel %vm879_vm1, %v887_v60, %v890_v61  ;;  %v750_v49 = vrot.slane %v748_v41, 1 }
 0x2f4   :  { %v895_v58 = vrot.slane %v893_v52, 6  ;;  %v898_v59 = vrot.slane %v896_v53, 7  ;;  %v929_v20 = vrot.slane %v927_v16, 6  ;;  %v1004_v50 = vshrl.u32 %v715_v45, 16  ;;  %v9075_v52 = vld [vmem:[#allocation6 + $0xf8] sm:$0xff]   ;;  %v9066_v53 = vld [vmem:[#allocation6 + $0x120] sm:$0xff]  }
 0x2f5   :  { %v903_v62 = vrot.slane %v901_v54, 6  ;;  %v906_v63 = vrot.slane %v904_v55, 7  ;;  %v1007_v51 = vshll.u32 %v715_v45, 16  ;;  %v9069_v55 = vld [vmem:[#allocation6 + $0x168] sm:$0xff]   ;;  %v9079_v16 = vld [vmem:[#allocation6 + $0x1c0] sm:$0xff]  }
 0x2f6   :  { %8779 = vmatpush3.bf16.msra.mxu0 %v9039_v19  ;;  %8112 = vmatpush3.bf16.msra.mxu1 %v9041_v21  ;;  %v899_v2 = vor.u32 %v898_v59, %v895_v58  ;;  %v9067_v19 = vld [vmem:[#allocation6 + $0xe8] sm:$0xff]   ;;  %v767_v21 = vsel %vm764_vm2, %v765_v13, %v10704_v7  ;;  %v1006_v57 = vrot.slane %v1004_v50, 6  ;;  %v9083_v50 = vld [vmem:[#allocation6 + $0x1d0] sm:$0xff]  }
 0x2f7   :  { %8780 = vmatprep.subr.bf16.mxu0 %v9042_v22  ;;  %8113 = vmatprep.subr.bf16.mxu1 %v9043_v24  ;;  %v907_v4 = vor.u32 %v906_v63, %v903_v62  ;;  %v932_v24 = vrot.slane %v930_v18, 7  ;;  %v910_v30 = vshrl.u32 %v767_v21, 16  ;;  %v913_v43 = vshll.u32 %v767_v21, 16  ;;  %v10722_v18 = vld [vmem:[#allocation2 + $0x8] sm:$0xfe]  ;;  %v9074_v21 = vld [vmem:[#allocation6 + $0x130] sm:$0xff]  }
 0x2f8   :  { %v1009_v58 = vrot.slane %v1007_v51, 7 }
 0x2f9   :  { %v908_v10 = vsel %vm879_vm1, %v899_v2, %v907_v4  ;;  %v933_v29 = vor.u32 %v932_v24, %v929_v20  ;;  %v915_v1 = vrot.slane %v913_v43, 7  ;;  %v9070_v2 = vld [vmem:[#allocation6 + $0x128] sm:$0xff]   ;;  %v803_v24 = vshll.u32 %v10722_v18, 16 }
 0x2fa   :  { %8781 = vmatpush3.bf16.msra.mxu0 %v9042_v22  ;;  %8114 = vmatpush3.bf16.msra.mxu1 %v9045_v26  ;;  %v9058_v22 = vld [vmem:[#allocation6 + $0x110] sm:$0xff]   ;;  %v10712_v26 = vrot.slane %v10692_v25, 1  ;;  %v1010_v62 = vor.u32 %v1009_v58, %v1006_v57  ;;  %v9082_v43 = vld [vmem:[#allocation6 + $0x188] sm:$0xff]  }
 0x2fb   :  { %8127 = vmatprep.subr.bf16.mxu0 %v9047_v27  ;;  %8155 = vmatprep.subr.bf16.mxu1 %v9049_v31  ;;  %v9061_v27 = vld [vmem:[#allocation6 + $0x158] sm:$0xff]   ;;  %v918_v31 = vshrl.u32 %v10704_v7, 16  ;;  %v9073_v7 = vld [vmem:[#allocation6 + $0x170] sm:$0xff]  }
 0x2fc   :  { %1686 = vmatprep.mubr.bf16.mxu1 %v908_v10  ;;  %v923_v10 = vrot.slane %v921_v34, 7 }
 0x2fd   :  { %8783 = vmatmul.mubr.bf16.vlgmr.msra.gmra.mrb[0].mxu0 %v10692_v25  ;;  %1687 = vmatmul.mubr.bf16.vlgmr.msra.gmra.mrb[0].mxu1 %v891_v8 }
 0x2fe   :  { %8128 = vmatpush3.bf16.msra.mxu0 %v9048_v33  ;;  %8156 = vmatpush3.bf16.msra.mxu1 %v9050_v3  ;;  %v716_v33 = vld [vmem:[#allocation2 + $0x20] sm:$0x7f] }
 0x2ff   :  { %8129 = vmatprep.subr.bf16.mxu0 %v9051_v38  ;;  %8157 = vmatprep.subr.bf16.mxu1 %v9053_v9  ;;  %v753_v37 = vshll.u32 %v716_v33, 16  ;;  %v757_v38 = vshrl.u32 %v716_v33, 16  ;;  %v920_v9 = vrot.slane %v918_v31, 6  ;;  %v9081_v33 = vld [vmem:[#allocation6 + $0x1c8] sm:$0xff]  }
 0x300   :  { %1735 = vmatprep.mubr.bf16.mxu0 %v933_v29 }
 0x301   :  { %v755_v44 = vrot.slane %v753_v37, 1  ;;  %v1012_v47 = vrot.slane %v753_v37, 7  ;;  %v805_v37 = vrot.slane %v803_v24, 3 }
 0x302   :  { %8130 = vmatpush3.bf16.msra.mxu0 %v9052_v46  ;;  %8158 = vmatpush3.bf16.msra.mxu1 %v9054_v14  ;;  %v1011_v46 = vrot.slane %v757_v38, 6 }
 0x303   :  { %8131 = vmatprep.subr.bf16.mxu0 %v9055_v48  ;;  %8159 = vmatprep.subr.bf16.mxu1 %v9057_v17  ;;  %v912_v48 = vrot.slane %v910_v30, 6  ;;  %v759_v54 = vor.u32 %v757_v38, %v755_v44  ;;  %v720_v17 = vld [vmem:[#allocation2 + $0x10] sm:$0x1] }
 0x304   :  { %v1013_v63 = vor.u32 %v1012_v47, %v1011_v46  ;;  %v811_v30 = vshll.u32 %v720_v17, 16  ;;  %v793_v31 = vrot.slane %v720_v17, 2 }
 0x305   :  { %v1024_v59 = vshrl.u32 %v759_v54, 16  ;;  %v1027_v60 = vshll.u32 %v759_v54, 16  ;;  %v916_v8 = vor.u32 %v915_v1, %v912_v48 }
 0x306   :  { %8132 = vmatpush3.bf16.msra.mxu0 %v9056_v56  ;;  %8160 = vmatpush3.bf16.msra.mxu1 %v9058_v22  ;;  %v751_v56 = vor.u32 %v750_v49, %v746_v40  ;;  %v1014_v14 = vsel %vm879_vm1, %v1010_v62, %v1013_v63  ;;  %v800_v22 = vshrl.u32 %v10722_v18, 16  ;;  %v9085_v62 = vld [vmem:[#allocation6 + $0x1d8] sm:$0xff]  }
 0x307   :  { %8133 = vmatprep.subr.bf16.mxu0 %v9059_v0  ;;  %8161 = vmatprep.subr.bf16.mxu1 %v9061_v27  ;;  %v9076_v0 = vld [vmem:[#allocation6 + $0xb8] sm:$0xff]   ;;  %v1029_v6 = vrot.slane %v1027_v60, 7  ;;  %v808_v27 = vshrl.u32 %v720_v17, 16 }
 0x308   :  { %v756_v61 = vsel %vm729_vm0, %v751_v56, %v755_v44  ;;  %v9078_v44 = vld [vmem:[#allocation6 + $0x138] sm:$0xff]  }
 0x309   :  { %v1016_v3 = vshrl.u32 %v756_v61, 16  ;;  %v1019_v4 = vshll.u32 %v756_v61, 16  ;;  %v810_v38 = vrot.slane %v808_v27, 2  ;;  %v9084_v61 = vld [vmem:[#allocation6 + $0x190] sm:$0xff]  }
 0x30a   :  { %8134 = vmatpush3.bf16.msra.mxu0 %v9060_v5  ;;  %8162 = vmatpush3.bf16.msra.mxu1 %v9062_v35  ;;  %v1026_v5 = vrot.slane %v1024_v59, 6  ;;  %v9077_v35 = vld [vmem:[#allocation6 + $0x178] sm:$0xff]  }
 0x30b   :  { %8135 = vmatprep.subr.bf16.mxu0 %v9063_v11  ;;  %8163 = vmatprep.subr.bf16.mxu1 %v9065_v39  ;;  %v1018_v11 = vrot.slane %v1016_v3, 6  ;;  %v1021_v12 = vrot.slane %v1019_v4, 7  ;;  %v813_v39 = vrot.slane %v811_v30, 3  ;;  %v9086_v3 = vld [vmem:[#allocation6 + $0x198] sm:$0xff]  }
 0x30c   :  { %v1030_v13 = vor.u32 %v1029_v6, %v1026_v5  ;;  %v780_v5 = vshrl.u32 %v10692_v25, 16  ;;  %v783_v6 = vshll.u32 %v10692_v25, 16 }
 0x30d   :  { %v1022_v20 = vor.u32 %v1021_v12, %v1018_v11  ;;  %v814_v48 = vor.u32 %v813_v39, %v810_v38  ;;  %v1044_v11 = vshll.u32 %v10712_v26, 16  ;;  %v722_v12 = vld [vmem:[#allocation2 + $0x28] sm:$0x1] }
 0x30e   :  { %8136 = vmatpush3.bf16.msra.mxu0 %v9064_v15  ;;  %8164 = vmatpush3.bf16.msra.mxu1 %v9066_v53  ;;  %v924_v15 = vor.u32 %v923_v10, %v920_v9  ;;  %v768_v9 = vrot.slane %v10716_v36, 1  ;;  %v1041_v10 = vshrl.u32 %v10712_v26, 16  ;;  %v828_v17 = vshll.u32 %v722_v12, 16  ;;  %v9088_v36 = vld [vmem:[#allocation6 + $0x1a0] sm:$0xff]  }
 0x30f   :  { %8137 = vmatprep.subr.bf16.mxu0 %v9067_v19  ;;  %8165 = vmatprep.subr.bf16.mxu1 %v9069_v55  ;;  %v792_v19 = vrot.slane %v10688_v23, 2  ;;  %v1031_v34 = vsel %vm879_vm1, %v1022_v20, %v1030_v13  ;;  %v802_v23 = vrot.slane %v800_v22, 2  ;;  %v782_v13 = vrot.slane %v780_v5, 1 }
 0x310   :  { %v925_v29 = vsel %vm879_vm1, %v916_v8, %v924_v15  ;;  %1694 = vmatprep.mubr.bf16.mxu1 %v1031_v34  ;;  %v9087_v8 = vld [vmem:[#allocation6 + $0x1e0] sm:$0xff]   ;;  %v770_v20 = vsel %vm764_vm2, %v768_v9, %v10712_v26  ;;  %v1046_v22 = vrot.slane %v1044_v11, 7  ;;  %v9089_v34 = vld [vmem:[#allocation6 + $0x1e8] sm:$0xff]   ;;  %v9093_v11 = vld [vmem:[#allocation6 + $0x1f8] sm:$0xff]  }
 0x311   :  { %v794_v40 = vsel %vm791_vm3, %v792_v19, %v793_v31  ;;  %1695 = vmatmul.mubr.bf16.gmra.mrb[4].mxu1 %v1014_v14  ;;  %v806_v45 = vor.u32 %v805_v37, %v802_v23  ;;  %v785_v14 = vrot.slane %v783_v6, 2  ;;  %v10737_v15 = vld [vmem:[#allocation2 + $0x20] sm:$0xfe]  ;;  %v1033_v27 = vshrl.u32 %v770_v20, 16 }
 0x312   :  { %8138 = vmatpush3.bf16.msra.mxu0 %v9068_v28  ;;  %v9080_v28 = vld [vmem:[#allocation6 + $0x180] sm:$0xff]   ;;  %8166 = vmatpush3.bf16.msra.mxu1 %v9070_v2  ;;  %v944_v46 = vshrl.u32 %v794_v40, 16  ;;  %v947_v47 = vshll.u32 %v794_v40, 16  ;;  %v820_v31 = vshll.u32 %v10737_v15, 16 }
 0x313   :  { %8139 = vmatprep.subr.bf16.mxu0 %v9071_v32  ;;  %v936_v32 = vshrl.u32 %v792_v19, 16  ;;  %8167 = vmatprep.subr.bf16.mxu1 %v9073_v7  ;;  %v953_v51 = vshrl.u32 %v806_v45, 16  ;;  %v815_v55 = vsel %vm798_vm4, %v806_v45, %v814_v48  ;;  %v786_v24 = vor.u32 %v785_v14, %v782_v13 }
 0x314   :  { %v946_v53 = vrot.slane %v944_v46, 6  ;;  %v949_v54 = vrot.slane %v947_v47, 7  ;;  %v961_v59 = vshrl.u32 %v815_v55, 16  ;;  %v964_v60 = vshll.u32 %v815_v55, 16  ;;  %v9090_v46 = vld [vmem:[#allocation6 + $0x1a8] sm:$0xff]  }
 0x315   :  { %v938_v41 = vrot.slane %v936_v32, 6  ;;  %v955_v57 = vrot.slane %v953_v51, 6  ;;  %v1053_v26 = vshll.u32 %v786_v24, 16  ;;  %v1035_v23 = vrot.slane %v1033_v27, 6  ;;  %v9094_v27 = vld [vmem:[#allocation6 + $0x1b8] sm:$0xff]  }
 0x316   :  { %8140 = vmatpush3.bf16.msra.mxu0 %v9072_v42  ;;  %v939_v42 = vshll.u32 %v792_v19, 16  ;;  %8168 = vmatpush3.bf16.msra.mxu1 %v9074_v21  ;;  %v950_v63 = vor.u32 %v949_v54, %v946_v53  ;;  %v963_v1 = vrot.slane %v961_v59, 6  ;;  %v966_v2 = vrot.slane %v964_v60, 7 }
 0x317   :  { %8141 = vmatprep.subr.bf16.mxu0 %v9075_v52  ;;  %v956_v52 = vshll.u32 %v806_v45, 16  ;;  %8169 = vmatprep.subr.bf16.mxu1 %v9077_v35  ;;  %v1043_v21 = vrot.slane %v1041_v10, 6  ;;  %v1050_v35 = vshrl.u32 %v786_v24, 16  ;;  %v822_v39 = vrot.slane %v820_v31, 3 }
 0x318   :  { %v941_v49 = vrot.slane %v939_v42, 7  ;;  %v967_v7 = vor.u32 %v966_v2, %v963_v1  ;;  %v796_v45 = vrot.slane %v722_v12, 2  ;;  %v725_v1 = vld [vmem:[#allocation2 + $0x10] sm:$0x3] }
 0x319   :  { %v958_v58 = vrot.slane %v956_v52, 7  ;;  %v1047_v30 = vor.u32 %v1046_v22, %v1043_v21  ;;  %v1052_v42 = vrot.slane %v1050_v35, 6  ;;  %v839_v22 = vrot.slane %v725_v1, 3 }
 0x31a   :  { %8142 = vmatpush3.bf16.msra.mxu0 %v9076_v0  ;;  %v942_v56 = vor.u32 %v941_v49, %v938_v41  ;;  %8170 = vmatpush3.bf16.msra.mxu1 %v9078_v44  ;;  %v795_v41 = vrot.slane %v10692_v25, 2 }
 0x31b   :  { %8183 = vmatprep.subr.bf16.mxu0 %v9079_v16  ;;  %v959_v0 = vor.u32 %v958_v58, %v955_v57  ;;  %v825_v16 = vshrl.u32 %v722_v12, 16 }
 0x31c   :  { %v951_v4 = vsel %vm879_vm1, %v942_v56, %v950_v63  ;;  %v1059_v48 = vshrl.u32 %v795_v41, 16  ;;  %v1062_v49 = vshll.u32 %v795_v41, 16  ;;  %v797_v52 = vsel %vm791_vm3, %v795_v41, %v796_v45  ;;  %v9091_v56 = vld [vmem:[#allocation6 + $0x1f0] sm:$0xff]  }
 0x31d   :  { %1736 = vmatmul.mubr.bf16.vlgmr.msra.gmra.mrb[4].mxu0 %v925_v29  ;;  %v968_v19 = vsel %vm879_vm1, %v959_v0, %v967_v7  ;;  %v817_v29 = vshrl.u32 %v10737_v15, 16  ;;  %v827_v32 = vrot.slane %v825_v16, 2  ;;  %v1067_v60 = vshrl.u32 %v797_v52, 16  ;;  %v9092_v7 = vld [vmem:[#allocation6 + $0x1b0] sm:$0xff]  }
 0x31e   :  { %8184 = vmatpush3.bf16.msra.mxu0 %v9080_v28  ;;  %1784 = vmatprep.mubr.bf16.mxu1 %v968_v19  ;;  %v1036_v28 = vshll.u32 %v770_v20, 16  ;;  %v1061_v55 = vrot.slane %v1059_v48, 6  ;;  %v1064_v59 = vrot.slane %v1062_v49, 7  ;;  %v1070_v0 = vshll.u32 %v797_v52, 16 }
 0x31f   :  { %8185 = vmatprep.subr.bf16.mxu0 %v9081_v33  ;;  %1785 = vmatmul.mubr.bf16.vlgmr.msra.gmra.mrb[8].mxu1 %v951_v4  ;;  %v830_v33 = vrot.slane %v828_v17, 3  ;;  %v819_v38 = vrot.slane %v817_v29, 2  ;;  %v1069_v6 = vrot.slane %v1067_v60, 6  ;;  %v854_v16 = vshrl.u32 %v725_v1, 16 }
 0x320   :  { %v1038_v37 = vrot.slane %v1036_v28, 7  ;;  %v1065_v5 = vor.u32 %v1064_v59, %v1061_v55  ;;  %v1072_v10 = vrot.slane %v1070_v0, 7  ;;  %v857_v17 = vshll.u32 %v725_v1, 16 }
 0x321   :  { %v831_v40 = vor.u32 %v830_v33, %v827_v32  ;;  %v823_v47 = vor.u32 %v822_v39, %v819_v38  ;;  %v838_v19 = vrot.slane %v10722_v18, 3  ;;  %v856_v28 = vrot.slane %v854_v16, 3  ;;  %v726_v18 = vld [vmem:[#allocation2 + $0x28] sm:$0x3] }
 0x322   :  { %8186 = vmatpush3.bf16.msra.mxu0 %v9082_v43  ;;  %v1055_v43 = vrot.slane %v1053_v26, 7  ;;  %v1039_v44 = vor.u32 %v1038_v37, %v1035_v23  ;;  %v1073_v20 = vor.u32 %v1072_v10, %v1069_v6  ;;  %v859_v29 = vrot.slane %v857_v17, 4 }
 0x323   :  { %8187 = vmatprep.subr.bf16.mxu0 %v9083_v50  ;;  %v832_v53 = vsel %vm798_vm4, %v823_v47, %v831_v40  ;;  %v1076_v54 = vshrl.u32 %v823_v47, 16  ;;  %v1079_v25 = vshll.u32 %v823_v47, 16  ;;  %v840_v33 = vsel %vm837_vm5, %v838_v19, %v839_v22 }
 0x324   :  { %v1056_v50 = vor.u32 %v1055_v43, %v1052_v42  ;;  %v1048_v51 = vsel %vm879_vm1, %v1039_v44, %v1047_v30  ;;  %v1084_v57 = vshrl.u32 %v832_v53, 16  ;;  %v1087_v58 = vshll.u32 %v832_v53, 16 }
 0x325   :  { %v1081_v63 = vrot.slane %v1079_v25, 7  ;;  %v970_v30 = vshrl.u32 %v838_v19, 16  ;;  %v1074_v31 = vsel %vm879_vm1, %v1065_v5, %v1073_v20  ;;  %v860_v35 = vor.u32 %v859_v29, %v856_v28  ;;  %v9095_v29 = vld [vmem:[#allocation11 + $0x40] sm:$0xff]  }
 0x326   :  { %8188 = vmatpush3.bf16.msra.mxu0 %v9084_v61  ;;  %1743 = vmatprep.mubr.bf16.mxu0 %v1056_v50  ;;  %v727_v61 = vld [vmem:[#allocation2 + $0x8] sm:$0xfc]  ;;  %v1089_v4 = vrot.slane %v1087_v58, 7  ;;  %v978_v23 = vshrl.u32 %v840_v33, 16  ;;  %v981_v37 = vshll.u32 %v840_v33, 16  ;;  %v871_v53 = vshrl.u32 %v726_v18, 16 }
 0x327   :  { %8189 = vmatprep.subr.bf16.mxu0 %v9085_v62  ;;  %1744 = vmatmul.mubr.bf16.gmra.mrb[8].mxu0 %v1048_v51  ;;  %v1078_v62 = vrot.slane %v1076_v54, 6  ;;  %v846_v2 = vshrl.u32 %v727_v61, 16  ;;  %v849_v13 = vshll.u32 %v727_v61, 16  ;;  %v972_v26 = vrot.slane %v970_v30, 6  ;;  %v9096_v30 = vld [vmem:[#allocation11] sm:$0xff]   ;;  %v9099_v33 = vld [vmem:[#allocation11 + $0x48] sm:$0xff]  }
 0x328   :  { %v980_v43 = vrot.slane %v978_v23, 6  ;;  %v983_v44 = vrot.slane %v981_v37, 7  ;;  %v873_v58 = vrot.slane %v871_v53, 3  ;;  %v841_v59 = vrot.slane %v10737_v15, 3  ;;  %8211 = vmatprep.subr.bf16.mxu1 %v9095_v29  ;;  %v9104_v23 = vld [vmem:[#allocation11 + $0x10] sm:$0xff]  }
 0x329   :  { %v1082_v9 = vor.u32 %v1081_v63, %v1078_v62  ;;  %v848_v12 = vrot.slane %v846_v2, 3  ;;  %v851_v21 = vrot.slane %v849_v13, 4  ;;  %v842_v63 = vrot.slane %v726_v18, 3  ;;  %8212 = vmatpush3.bf16.msra.mxu1 %v9096_v30  ;;  %v9105_v37 = vld [vmem:[#allocation11 + $0xd0] sm:$0xff]  }
 0x32a   :  { %8190 = vmatpush3.bf16.msra.mxu0 %v9086_v3  ;;  %v1086_v3 = vrot.slane %v1084_v57, 6  ;;  %v984_v51 = vor.u32 %v983_v44, %v980_v43  ;;  %v1093_v2 = vshrl.u32 %v841_v59, 16  ;;  %8213 = vmatprep.subr.bf16.mxu1 %v9099_v33  ;;  %v9111_v43 = vld [vmem:[#allocation11 + $0x60] sm:$0xff]   ;;  %v9121_v53 = vld [vmem:[#allocation11 + $0xf0] sm:$0xff]  }
 0x32b   :  { %8191 = vmatprep.subr.bf16.mxu0 %v9087_v8  ;;  %v728_v8 = vld [vmem:[#allocation2 + $0x20] sm:$0xfc]  ;;  %v852_v32 = vor.u32 %v851_v21, %v848_v12  ;;  %v843_v6 = vsel %vm837_vm5, %v841_v59, %v842_v63 }
 0x32c   :  { %v1090_v14 = vor.u32 %v1089_v4, %v1086_v3  ;;  %v866_v45 = vshll.u32 %v728_v8, 16  ;;  %v1096_v3 = vshll.u32 %v841_v59, 16  ;;  %v1104_v12 = vshll.u32 %v843_v6, 16  ;;  %v9112_v44 = vld [vmem:[#allocation11 + $0x20] sm:$0xff]  }
 0x32d   :  { %v987_v38 = vshrl.u32 %v852_v32, 16  ;;  %v990_v39 = vshll.u32 %v852_v32, 16  ;;  %v861_v42 = vsel %vm844_vm6, %v852_v32, %v860_v35  ;;  %v9098_v32 = vld [vmem:[#allocation11 + $0x80] sm:$0xff]   ;;  %v9102_v35 = vld [vmem:[#allocation11 + $0x88] sm:$0xff]  }
 0x32e   :  { %8192 = vmatpush3.bf16.msra.mxu0 %v9088_v36  ;;  %v863_v36 = vshrl.u32 %v728_v8, 16  ;;  %v1091_v24 = vsel %vm879_vm1, %v1082_v9, %v1090_v14  ;;  %v995_v48 = vshrl.u32 %v861_v42, 16  ;;  %v998_v49 = vshll.u32 %v861_v42, 16  ;;  %v9110_v42 = vld [vmem:[#allocation11 + $0x98] sm:$0xff]  }
 0x32f   :  { %8193 = vmatprep.subr.bf16.mxu0 %v9089_v34  ;;  %1792 = vmatprep.mubr.bf16.mxu1 %v1091_v24  ;;  %v973_v34 = vshll.u32 %v838_v19, 16  ;;  %v992_v47 = vrot.slane %v990_v39, 7  ;;  %v868_v52 = vrot.slane %v866_v45, 4  ;;  %v1095_v9 = vrot.slane %v1093_v2, 6  ;;  %v9107_v39 = vld [vmem:[#allocation11 + $0x58] sm:$0xff]   ;;  %v9113_v45 = vld [vmem:[#allocation11 + $0xe0] sm:$0xff]  }
 0x330   :  { %1793 = vmatmul.mubr.bf16.gmra.mrb[12].mxu1 %v1074_v31  ;;  %v865_v41 = vrot.slane %v863_v36, 3  ;;  %v997_v25 = vrot.slane %v995_v48, 6  ;;  %v1000_v55 = vrot.slane %v998_v49, 7  ;;  %v1098_v10 = vrot.slane %v1096_v3, 7  ;;  %v9097_v31 = vld [vmem:[#allocation11 + $0xc0] sm:$0xff]   ;;  %v9116_v48 = vld [vmem:[#allocation11 + $0x28] sm:$0xff]  }
 0x331   :  { %v975_v40 = vrot.slane %v973_v34, 7  ;;  %v1106_v19 = vrot.slane %v1104_v12, 7  ;;  %v9100_v34 = vld [vmem:[#allocation11 + $0x8] sm:$0xff]  }
 0x332   :  { %8194 = vmatpush3.bf16.msra.mxu0 %v9090_v46  ;;  %v989_v46 = vrot.slane %v987_v38, 6  ;;  %v869_v57 = vor.u32 %v868_v52, %v865_v41  ;;  %v1001_v60 = vor.u32 %v1000_v55, %v997_v25  ;;  %v1099_v16 = vor.u32 %v1098_v10, %v1095_v9  ;;  %8214 = vmatpush3.bf16.msra.mxu1 %v9100_v34  ;;  %v9106_v38 = vld [vmem:[#allocation11 + $0x90] sm:$0xff]   ;;  %v9109_v41 = vld [vmem:[#allocation11 + $0xd8] sm:$0xff]   ;;  %v9117_v49 = vld [vmem:[#allocation11 + $0xe8] sm:$0xff]  }
 0x333   :  { %8195 = vmatprep.subr.bf16.mxu0 %v9091_v56  ;;  %v976_v50 = vor.u32 %v975_v40, %v972_v26  ;;  %v874_v56 = vshll.u32 %v726_v18, 16  ;;  %v9101_v18 = vld [vmem:[#allocation11 + $0xc8] sm:$0xff]   ;;  %v9103_v26 = vld [vmem:[#allocation11 + $0x50] sm:$0xff]   ;;  %v9108_v40 = vld [vmem:[#allocation11 + $0x18] sm:$0xff]  }
 0x334   :  { %v993_v54 = vor.u32 %v992_v47, %v989_v46  ;;  %v1110_v0 = vshrl.u32 %v869_v57, 16  ;;  %v1113_v1 = vshll.u32 %v869_v57, 16  ;;  %8215 = vmatprep.subr.bf16.mxu1 %v9103_v26  ;;  %v9114_v46 = vld [vmem:[#allocation11 + $0xa0] sm:$0xff]   ;;  %v9115_v47 = vld [vmem:[#allocation11 + $0x68] sm:$0xff]   ;;  %v9120_v52 = vld [vmem:[#allocation11 + $0x30] sm:$0xff]  }
 0x335   :  { %v985_v61 = vsel %vm879_vm1, %v976_v50, %v984_v51  ;;  %v876_v62 = vrot.slane %v874_v56, 4  ;;  %v9118_v50 = vld [vmem:[#allocation11 + $0xa8] sm:$0xff]   ;;  %v9119_v51 = vld [vmem:[#allocation11 + $0x70] sm:$0xff]   ;;  %v9123_v25 = vld [vmem:[#allocation11 + $0x78] sm:$0xff]  }
 0x336   :  { %8196 = vmatpush3.bf16.msra.mxu0 %v9092_v7  ;;  %v1002_v4 = vsel %vm879_vm1, %v993_v54, %v1001_v60  ;;  %v1112_v7 = vrot.slane %v1110_v0, 6  ;;  %v1115_v8 = vrot.slane %v1113_v1, 7  ;;  %8216 = vmatpush3.bf16.msra.mxu1 %v9104_v23  ;;  %v9122_v54 = vld [vmem:[#allocation11 + $0xb0] sm:$0xff]   ;;  %v9124_v55 = vld [vmem:[#allocation11 + $0x38] sm:$0xff]  }
 0x337   :  { %8197 = vmatprep.subr.bf16.mxu0 %v9093_v11  ;;  %v877_v5 = vor.u32 %v876_v62, %v873_v58  ;;  %1833 = vmatprep.mubr.bf16.mxu0 %v1002_v4  ;;  %v1101_v11 = vshrl.u32 %v843_v6, 16  ;;  %v9125_v56 = vld [vmem:[#allocation11 + $0xf8] sm:$0xff]   ;;  %v10760_v58 = vld [vmem:[#allocation11 + $0x100] sm:$0xff]  }
 0x338   :  { %v1116_v20 = vor.u32 %v1115_v8, %v1112_v7  ;;  %8217 = vmatprep.subr.bf16.mxu1 %v9107_v39 }
 0x339   :  { %v878_v15 = vsel %vm844_vm6, %v869_v57, %v877_v5  ;;  %v1103_v17 = vrot.slane %v1101_v11, 6  ;;  %v9126_v57 = vld [vmem:[#allocation11 + $0xb8] sm:$0xff]  }
 0x33a   :  { %8198 = vmatpush3.bf16.msra.mxu0 %v9094_v27  ;;  %v1118_v13 = vshrl.u32 %v878_v15, 16  ;;  %v1121_v14 = vshll.u32 %v878_v15, 16  ;;  %8218 = vmatpush3.bf16.msra.mxu1 %v9108_v40 }
 0x33b   :  { %v1107_v36 = vor.u32 %v1106_v19, %v1103_v17  ;;  %8239 = vmatprep.subr.bf16.mxu0 %v9097_v31  ;;  %8219 = vmatprep.subr.bf16.mxu1 %v9111_v43 }
 0x33c   :  { %v1120_v21 = vrot.slane %v1118_v13, 6  ;;  %v1123_v22 = vrot.slane %v1121_v14, 7 }
 0x33d   :  { %1834 = vmatmul.mubr.bf16.vlgmr.msra.gmra.mrb[12].mxu0 %v985_v61  ;;  %v1108_v27 = vsel %vm879_vm1, %v1099_v16, %v1107_v36 }
 0x33e   :  { %v1124_v24 = vor.u32 %v1123_v22, %v1120_v21  ;;  %8240 = vmatpush3.bf16.msra.mxu0 %v9098_v32  ;;  %8220 = vmatpush3.bf16.msra.mxu1 %v9112_v44  ;;  %v10771_v44 = vld [vmem:[#allocation2] sm:$0x80] }
 0x33f   :  { %8241 = vmatprep.subr.bf16.mxu0 %v9101_v18  ;;  %8221 = vmatprep.subr.bf16.mxu1 %v9115_v47 }
 0x340   :  { %v1125_v28 = vsel %vm879_vm1, %v1116_v20, %v1124_v24 }
 0x341   :  { %1841 = vmatprep.mubr.bf16.mxu0 %v1125_v28 }
 0x342   :  { %8242 = vmatpush3.bf16.msra.mxu0 %v9102_v35  ;;  %8222 = vmatpush3.bf16.msra.mxu1 %v9116_v48  ;;  %v7726_v48 = vld [vmem:[#allocation8] ss:$0 sm:$0xff] }
 0x343   :  { %8243 = vmatprep.subr.bf16.mxu0 %v9105_v37  ;;  %8223 = vmatprep.subr.bf16.mxu1 %v9119_v51  ;;  %v1893_v51 = vshrl.u32 %v10771_v44, 16 }
 0x345   :  { %1842 = vmatmul.mubr.bf16.gmra.mrb[16].mxu0 %v1108_v27 }
 0x346   :  { %8244 = vmatpush3.bf16.msra.mxu0 %v9106_v38  ;;  %8224 = vmatpush3.bf16.msra.mxu1 %v9120_v52  ;;  %v7727_v52 = vld [vmem:[#allocation9] ss:$0 sm:$0xff] }
 0x347   :  { %8245 = vmatprep.subr.bf16.mxu0 %v9109_v41  ;;  %8225 = vmatprep.subr.bf16.mxu1 %v9123_v25 }
 0x34a   :  { %8246 = vmatpush3.bf16.msra.mxu0 %v9110_v42  ;;  %8226 = vmatpush3.bf16.msra.mxu1 %v9124_v55 }
 0x34b   :  { %8247 = vmatprep.subr.bf16.mxu0 %v9113_v45  ;;  %8786 = vmatprep.subr.bf16.mxu1 %v10760_v58  ;;  %v10773_v45 = vld [vmem:[#allocation2 + $0x10] sm:$0x1] }
 0x34e   :  { %8248 = vmatpush3.bf16.msra.mxu0 %v9114_v46 }
 0x34f   :  { %8249 = vmatprep.subr.bf16.mxu0 %v9117_v49 }
 0x352   :  { %8250 = vmatpush3.bf16.msra.mxu0 %v9118_v50 }
 0x353   :  { %8251 = vmatprep.subr.bf16.mxu0 %v9121_v53 }
 0x356   :  { %8252 = vmatpush3.bf16.msra.mxu0 %v9122_v54  ;;  %v1928_v54 = vshll.u32 %v10773_v45, 16 }
 0x357   :  { %8253 = vmatprep.subr.bf16.mxu0 %v9125_v56 }
 0x35a   :  { %8254 = vmatpush3.bf16.msra.mxu0 %v9126_v57 }
 0x3d0   :  { %v10763_v59 = vpop.f32.mrb[0].mxu0  ;;  %v8115_v63 = vpop.f32.mrb[0].mxu1 }
 0x3d1   :  { %v10765_v60 = vpop.f32.mrb[1].mxu0  ;;  %v8116_v0 = vpop.f32.mrb[1].mxu1 }
 0x3d2   :  { %v10767_v61 = vpop.f32.mrb[2].mxu0  ;;  %v8117_v1 = vadd.f32 %v8116_v0, %v8115_v63  ;;  %v8118_v2 = vpop.f32.mrb[2].mxu1 }
 0x3d3   :  { %v10769_v62 = vpop.f32.mrb[3].mxu0  ;;  %v8119_v3 = vpop.f32.mrb[3].mxu1 }
 0x3d4   :  { %v8120_v4 = vadd.f32 %v8119_v3, %v8118_v2  ;;  %v1960_v2 = vrot.slane %v10771_v44, 7 }
 0x3e4   :  { %v8121_v7 = vpop.f32.mrb[4].mxu1 }
 0x3e5   :  { %v8122_v10 = vpop.f32.mrb[5].mxu1 }
 0x3e6   :  { %v8123_v11 = vadd.f32 %v8122_v10, %v8121_v7  ;;  %v8124_v12 = vpop.f32.mrb[6].mxu1 }
 0x3e7   :  { %v8125_v16 = vpop.f32.mrb[7].mxu1 }
 0x3e8   :  { %v8126_v17 = vadd.f32 %v8125_v16, %v8124_v12 }
 0x3f0   :  { %v8143_v5 = vpop.f32.mrb[4].mxu0 }
 0x3f1   :  { %v8144_v6 = vpop.f32.mrb[5].mxu0 }
 0x3f2   :  { %v8145_v8 = vadd.f32 %v8144_v6, %v8143_v5  ;;  %v8146_v9 = vpop.f32.mrb[6].mxu0  ;;  %v8171_v20 = vpop.f32.mrb[8].mxu1  ;;  %v1930_v5 = vrot.slane %v1928_v54, 2 }
 0x3f3   :  { %v8147_v15 = vpop.f32.mrb[7].mxu0  ;;  %v8172_v21 = vpop.f32.mrb[9].mxu1 }
 0x3f4   :  { %v1738_v13 = vadd.f32 %v8145_v8, %v8117_v1  ;;  %v8148_v14 = vadd.f32 %v8147_v15, %v8146_v9  ;;  %v8173_v22 = vadd.f32 %v8172_v21, %v8171_v20  ;;  %v8174_v36 = vpop.f32.mrb[10].mxu1 }
 0x3f5   :  { %v8175_v24 = vpop.f32.mrb[11].mxu1 }
 0x3f6   :  { %v1741_v19 = vadd.f32 %v8148_v14, %v8120_v4  ;;  %v1787_v27 = vadd.f32 %v8173_v22, %v1738_v13  ;;  %v8176_v28 = vadd.f32 %v8175_v24, %v8174_v36  ;;  %v10778_v13 = vld [vmem:[#allocation2 + $0x28] sm:$0x1] }
 0x3f8   :  { %v1790_v29 = vadd.f32 %v8176_v28, %v1741_v19  ;;  %v1950_v28 = vrot.slane %v10773_v45, 2 }
 0x3fa   :  { %v8149_v30 = vpop.f32.mrb[8].mxu0 }
 0x3fb   :  { %v8150_v31 = vpop.f32.mrb[9].mxu0 }
 0x3fc   :  { %v8151_v32 = vadd.f32 %v8150_v31, %v8149_v30  ;;  %v8152_v33 = vpop.f32.mrb[10].mxu0  ;;  %v1941_v31 = vshll.u32 %v10778_v13, 16 }
 0x3fd   :  { %v8153_v34 = vpop.f32.mrb[11].mxu0 }
 0x3fe   :  { %v1746_v18 = vadd.f32 %v8151_v32, %v8123_v11  ;;  %v8154_v35 = vadd.f32 %v8153_v34, %v8152_v33 }
 0x400   :  { %v1749_v26 = vadd.f32 %v8154_v35, %v8126_v17 }
 0x403   :  { %v8177_v23 = vpop.f32.mrb[12].mxu1 }
 0x404   :  { %v8178_v37 = vpop.f32.mrb[13].mxu1 }
 0x405   :  { %v8179_v38 = vadd.f32 %v8178_v37, %v8177_v23  ;;  %v8180_v39 = vpop.f32.mrb[14].mxu1 }
 0x406   :  { %v8181_v40 = vpop.f32.mrb[15].mxu1 }
 0x407   :  { %v1795_v41 = vadd.f32 %v8179_v38, %v1746_v18  ;;  %v8182_v42 = vadd.f32 %v8181_v40, %v8180_v39 }
 0x409   :  { %v1798_v43 = vadd.f32 %v8182_v42, %v1749_v26 }
 0x410   :  { %v8199_v46 = vpop.f32.mrb[12].mxu0 }
 0x411   :  { %v8200_v47 = vpop.f32.mrb[13].mxu0 }
 0x412   :  { %v8201_v49 = vadd.f32 %v8200_v47, %v8199_v46  ;;  %v8202_v50 = vpop.f32.mrb[14].mxu0 }
 0x413   :  { %v8203_v53 = vpop.f32.mrb[15].mxu0 }
 0x414   :  { %v1836_v25 = vadd.f32 %v8201_v49, %v1787_v27  ;;  %v8204_v55 = vadd.f32 %v8203_v53, %v8202_v50  ;;  %v1882_v27 = vld [vmem:[#allocation2 + $0x18] sm:$0x80]  ;;  %v9129_v53 = vld [vmem:[#allocation11 + $0x110] sm:$0xff]  }
 0x415   :  { %v1904_v42 = vshrl.u32 %v1882_v27, 16 }
 0x416   :  { %v1857_v56 = vmul.f32 %v7726_v48, %v1836_v25  ;;  %v1839_v57 = vadd.f32 %v8204_v55, %v1790_v29 }
 0x418   :  { %v1868_v63 = vadd.f32 %v7727_v52, %v1857_v56  ;;  %v1858_v0 = vmul.f32 %v7726_v48, %v1839_v57  ;;  %v8205_v1 = vpop.f32.mrb[16].mxu0 }
 0x419   :  { %v8206_v4 = vpop.f32.mrb[17].mxu0 }
 0x41a   :  { %v1869_v3 = vadd.f32 %v7727_v52, %v1858_v0  ;;  %v1872_v6 = vmax.f32 %v1868_v63, 0.0  ;;  %v8207_v7 = vadd.f32 %v8206_v4, %v8205_v1  ;;  %v8208_v8 = vpop.f32.mrb[18].mxu0  ;;  %v1974_v1 = vrot.slane %v1882_v27, 7 }
 0x41b   :  { %v8209_v10 = vpop.f32.mrb[19].mxu0 }
 0x41c   :  { %v1873_v9 = vmax.f32 %v1869_v3, 0.0  ;;  %v1844_v15 = vadd.f32 %v8207_v7, %v1795_v41  ;;  %v8210_v11 = vadd.f32 %v8209_v10, %v8208_v8  ;;  %v9128_v41 = vld [vmem:[#allocation11 + $0x108] sm:$0xff]   ;;  %v9130_v10 = vld [vmem:[#allocation11 + $0x118] sm:$0xff]  }
 0x41e   :  { %v1876_v12 = vpack.c.bf16 %v1873_v9, %v1872_v6  ;;  %v1859_v14 = vmul.f32 %v7726_v48, %v1844_v15  ;;  %v1847_v16 = vadd.f32 %v8210_v11, %v1798_v43 }
 0x420   :  { %1878 = vst [vmem:[#allocation2 + $0x8] sm:$0xff] %v1876_v12  ;;  %v1896_v17 = vshll.u32 %v1876_v12, 16  ;;  %v1900_v19 = vshrl.u32 %v1876_v12, 16  ;;  %v1870_v20 = vadd.f32 %v7727_v52, %v1859_v14  ;;  %v1860_v21 = vmul.f32 %v7726_v48, %v1847_v16  ;;  %v9131_v14 = vld [vmem:[#allocation11 + $0x120] sm:$0xff]   ;;  %v9132_v16 = vld [vmem:[#allocation11 + $0x128] sm:$0xff]  }
 0x422   :  { %v1898_v22 = vrot.slane %v1896_v17, 1  ;;  %v1922_v36 = vrot.slane %v1900_v19, 1  ;;  %v1925_v24 = vrot.slane %v1896_v17, 2  ;;  %v1874_v29 = vmax.f32 %v1870_v20, 0.0 }
 0x423   :  { %v1871_v30 = vadd.f32 %v7727_v52, %v1860_v21  ;;  %v1953_v20 = vrot.slane %v10778_v13, 2  ;;  %v9138_v13 = vld [vmem:[#allocation15 + $0x88] sm:$0xff]  }
 0x424   :  { %v1899_v32 = vsel %vm729_vm0, %v1893_v51, %v1898_v22  ;;  %v1902_v33 = vor.u32 %v1900_v19, %v1898_v22  ;;  %v1926_v34 = vor.u32 %v1925_v24, %v1922_v36  ;;  %v1943_v51 = vrot.slane %v1941_v31, 2  ;;  %v9133_v19 = vld [vmem:[#allocation11 + $0x130] sm:$0xff]   ;;  %v9134_v22 = vld [vmem:[#allocation11 + $0x138] sm:$0xff]   ;;  %v9137_v31 = vld [vmem:[#allocation15] sm:$0xff]  }
 0x425   :  { %v1875_v18 = vmax.f32 %v1871_v30, 0.0  ;;  %v1963_v35 = vrot.slane %v1899_v32, 7  ;;  %v9136_v30 = vld [vmem:[#allocation15 + $0x40] sm:$0xff]   ;;  %v9139_v32 = vld [vmem:[#allocation15 + $0x48] sm:$0xff]  }
 0x426   :  { %v1964_v26 = vrot.slane %v1902_v33, 7  ;;  %v1931_v23 = vsel %vm1918_vm7, %v1926_v34, %v1930_v5  ;;  %v1968_v37 = vrot.slane %v1926_v34, 7  ;;  %8277 = vmatprep.subr.bf16.mxu0 %v9136_v30  ;;  %v9140_v33 = vld [vmem:[#allocation15 + $0x8] sm:$0xff]   ;;  %v9141_v34 = vld [vmem:[#allocation15 + $0x90] sm:$0xff]  }
 0x427   :  { %v1877_v38 = vpack.c.bf16 %v1875_v18, %v1874_v29  ;;  %v1881_v39 = vld [vmem:[#allocation2 + $0x8] sm:$0x7f]  ;;  %v1969_v40 = vrot.slane %v1931_v23, 7  ;;  %v9142_v18 = vld [vmem:[#allocation15 + $0x50] sm:$0xff]   ;;  %v9145_v23 = vld [vmem:[#allocation15 + $0x58] sm:$0xff]  }
 0x428   :  { %v1890_v43 = vld [vmem:[#allocation2 + $0x8] sm:$0xfe]  ;;  %v1965_v44 = vsel %vm1959_vm8, %v1963_v35, %v1964_v26  ;;  %v1961_v45 = vrot.slane %v1881_v39, 7  ;;  %v9143_v35 = vld [vmem:[#allocation15 + $0x10] sm:$0xff]   ;;  %v9144_v26 = vld [vmem:[#allocation15 + $0x98] sm:$0xff]  }
 0x429   :  { %v1949_v46 = vrot.slane %v1890_v43, 2  ;;  %1879 = vst [vmem:[#allocation2 + $0x20] sm:$0xff] %v1877_v38  ;;  %2350 = vmatprep.mubr.bf16.mxu1 %v1965_v44  ;;  %v1970_v47 = vsel %vm1959_vm8, %v1968_v37, %v1969_v40  ;;  %v1907_v48 = vshll.u32 %v1877_v38, 16  ;;  %v1911_v49 = vshrl.u32 %v1877_v38, 16  ;;  %v9135_v29 = vld [vmem:[#allocation15 + $0x80] sm:$0xff]   ;;  %v9146_v37 = vld [vmem:[#allocation15 + $0x18] sm:$0xff]  }
 0x42a   :  { %v1962_v50 = vsel %vm1959_vm8, %v1960_v2, %v1961_v45  ;;  %2399 = vmatprep.mubr.bf16.mxu0 %v1970_v47  ;;  %v9148_v39 = vld [vmem:[#allocation15 + $0x60] sm:$0xff]   ;;  %v9153_v43 = vld [vmem:[#allocation15 + $0xb0] sm:$0xff]   ;;  %v9152_v44 = vld [vmem:[#allocation15 + $0x28] sm:$0xff]  }
 0x42b   :  { %2351 = vmatmul.mubr.bf16.vlgmr.msra.gmra.mrb[16].mxu1 %v1962_v50  ;;  %2400 = vmatmul.mubr.bf16.vlgmr.msra.gmra.mrb[20].mxu0 %v1876_v12  ;;  %v1909_v52 = vrot.slane %v1907_v48, 1  ;;  %v1935_v54 = vrot.slane %v1911_v49, 1  ;;  %v1938_v25 = vrot.slane %v1907_v48, 2  ;;  %v1951_v63 = vsel %vm791_vm3, %v1949_v46, %v1950_v28  ;;  %v9149_v40 = vld [vmem:[#allocation15 + $0x20] sm:$0xff]   ;;  %v9154_v45 = vld [vmem:[#allocation15 + $0x70] sm:$0xff]   ;;  %v9157_v48 = vld [vmem:[#allocation15 + $0x78] sm:$0xff]  }
 0x42c   :  { %8787 = vmatpush3.bf16.msra.mxu1 %v10760_v58  ;;  %v1971_v7 = vrot.slane %v1949_v46, 7  ;;  %v1972_v8 = vrot.slane %v1951_v63, 7  ;;  %8278 = vmatpush3.bf16.msra.mxu0 %v9137_v31  ;;  %v9156_v46 = vld [vmem:[#allocation15 + $0xb8] sm:$0xff]   ;;  %v9155_v47 = vld [vmem:[#allocation15 + $0x30] sm:$0xff]  }
 0x42d   :  { %8788 = vmatprep.subr.bf16.mxu1 %v9128_v41  ;;  %v1910_v55 = vsel %vm729_vm0, %v1904_v42, %v1909_v52  ;;  %v1913_v56 = vor.u32 %v1911_v49, %v1909_v52  ;;  %v1939_v57 = vor.u32 %v1938_v25, %v1935_v54  ;;  %8279 = vmatprep.subr.bf16.mxu0 %v9139_v32  ;;  %v9151_v42 = vld [vmem:[#allocation15 + $0x68] sm:$0xff]   ;;  %v9158_v49 = vld [vmem:[#allocation15 + $0x38] sm:$0xff]  }
 0x42e   :  { %v1977_v0 = vrot.slane %v1910_v55, 7  ;;  %v1973_v12 = vsel %vm1959_vm8, %v1971_v7, %v1972_v8 }
 0x42f   :  { %v1978_v2 = vrot.slane %v1913_v56, 7  ;;  %v1944_v3 = vsel %vm1918_vm7, %v1939_v57, %v1943_v51  ;;  %v1982_v4 = vrot.slane %v1939_v57, 7 }
 0x430   :  { %8789 = vmatpush3.bf16.msra.mxu1 %v9128_v41  ;;  %v1883_v5 = vld [vmem:[#allocation2 + $0x20] sm:$0x7f]  ;;  %v1983_v6 = vrot.slane %v1944_v3, 7  ;;  %8280 = vmatpush3.bf16.msra.mxu0 %v9140_v33  ;;  %v9150_v41 = vld [vmem:[#allocation15 + $0xa8] sm:$0xff]  }
 0x431   :  { %v1979_v58 = vsel %vm1959_vm8, %v1977_v0, %v1978_v2  ;;  %8790 = vmatprep.subr.bf16.mxu1 %v9129_v53  ;;  %v1975_v9 = vrot.slane %v1883_v5, 7  ;;  %v1891_v17 = vld [vmem:[#allocation2 + $0x20] sm:$0xfe]  ;;  %8281 = vmatprep.subr.bf16.mxu0 %v9142_v18 }
 0x432   :  { %2358 = vmatprep.mubr.bf16.mxu1 %v1979_v58  ;;  %v1984_v15 = vsel %vm1959_vm8, %v1982_v4, %v1983_v6  ;;  %v1952_v21 = vrot.slane %v1891_v17, 2 }
 0x433   :  { %v1976_v11 = vsel %vm1959_vm8, %v1974_v1, %v1975_v9  ;;  %2407 = vmatprep.mubr.bf16.mxu0 %v1984_v15 }
 0x434   :  { %2359 = vmatmul.mubr.bf16.gmra.mrb[20].mxu1 %v1976_v11  ;;  %2408 = vmatmul.mubr.bf16.gmra.mrb[24].mxu0 %v1877_v38  ;;  %v1954_v36 = vsel %vm791_vm3, %v1952_v21, %v1953_v20  ;;  %v1985_v24 = vrot.slane %v1952_v21, 7  ;;  %v9147_v38 = vld [vmem:[#allocation15 + $0xa0] sm:$0xff]   ;;  %v7770_v20 = vld [vmem:[#allocation12] ss:$0 sm:$0xff] }
 0x435   :  { %8791 = vmatpush3.bf16.msra.mxu1 %v9129_v53  ;;  %8802 = vmatprep.mubr.bf16.mxu1 %v1973_v12  ;;  %v1986_v27 = vrot.slane %v1954_v36, 7  ;;  %v7771_v36 = vld [vmem:[#allocation14] ss:$0 sm:$0xff] }
 0x436   :  { %8792 = vmatprep.subr.bf16.mxu1 %v9130_v10  ;;  %8282 = vmatpush3.bf16.msra.mxu0 %v9143_v35 }
 0x437   :  { %v1987_v28 = vsel %vm1959_vm8, %v1985_v24, %v1986_v27  ;;  %8283 = vmatprep.subr.bf16.mxu0 %v9145_v23  ;;  %v2502_v23 = vld [vmem:[#allocation2 + $0x28] sm:$0x1] }
 0x439   :  { %8793 = vmatpush3.bf16.msra.mxu1 %v9130_v10 }
 0x43a   :  { %8794 = vmatprep.subr.bf16.mxu1 %v9131_v14  ;;  %8284 = vmatpush3.bf16.msra.mxu0 %v9146_v37 }
 0x43b   :  { %8285 = vmatprep.subr.bf16.mxu0 %v9148_v39  ;;  %v2500_v39 = vld [vmem:[#allocation2 + $0x10] sm:$0x1] }
 0x43d   :  { %8795 = vmatpush3.bf16.msra.mxu1 %v9131_v14 }
 0x43e   :  { %8796 = vmatprep.subr.bf16.mxu1 %v9132_v16  ;;  %8286 = vmatpush3.bf16.msra.mxu0 %v9149_v40 }
 0x43f   :  { %8287 = vmatprep.subr.bf16.mxu0 %v9151_v42 }
 0x441   :  { %8797 = vmatpush3.bf16.msra.mxu1 %v9132_v16 }
 0x442   :  { %8798 = vmatprep.subr.bf16.mxu1 %v9133_v19  ;;  %8288 = vmatpush3.bf16.msra.mxu0 %v9152_v44 }
 0x443   :  { %8289 = vmatprep.subr.bf16.mxu0 %v9154_v45  ;;  %v2522_v45 = vrot.slane %v2500_v39, 1  ;;  %v9160_v39 = vld [vmem:[%s11292_s29 + $0x8] sm:$0xff]  }
 0x445   :  { %8799 = vmatpush3.bf16.msra.mxu1 %v9133_v19 }
 0x446   :  { %8800 = vmatprep.subr.bf16.mxu1 %v9134_v22  ;;  %8290 = vmatpush3.bf16.msra.mxu0 %v9155_v47 }
 0x447   :  { %8291 = vmatprep.subr.bf16.mxu0 %v9157_v48 }
 0x449   :  { %8801 = vmatpush3.bf16.msra.mxu1 %v9134_v22 }
 0x44a   :  { %8806 = vmatprep.subr.bf16.mxu1 %v9135_v29  ;;  %8292 = vmatpush3.bf16.msra.mxu0 %v9158_v49 }
 0x44c   :  { %8803 = vmatmul.mubr.bf16.vlgmr.msra.gmra.mrb[24].mxu1 %v1987_v28 }
 0x44d   :  { %8807 = vmatpush3.bf16.msra.mxu1 %v9135_v29 }
 0x44e   :  { %8808 = vmatprep.subr.bf16.mxu1 %v9138_v13 }
 0x451   :  { %8809 = vmatpush3.bf16.msra.mxu1 %v9138_v13 }
 0x452   :  { %8810 = vmatprep.subr.bf16.mxu1 %v9141_v34 }
 0x455   :  { %8811 = vmatpush3.bf16.msra.mxu1 %v9141_v34 }
 0x456   :  { %8812 = vmatprep.subr.bf16.mxu1 %v9144_v26 }
 0x459   :  { %8813 = vmatpush3.bf16.msra.mxu1 %v9144_v26 }
 0x45a   :  { %8814 = vmatprep.subr.bf16.mxu1 %v9147_v38 }
 0x45d   :  { %8815 = vmatpush3.bf16.msra.mxu1 %v9147_v38 }
 0x45e   :  { %8816 = vmatprep.subr.bf16.mxu1 %v9150_v41 }
 0x461   :  { %8817 = vmatpush3.bf16.msra.mxu1 %v9150_v41 }
 0x462   :  { %8818 = vmatprep.subr.bf16.mxu1 %v9153_v43 }
 0x465   :  { %8819 = vmatpush3.bf16.msra.mxu1 %v9153_v43  ;;  %v2525_v43 = vrot.slane %v2502_v23, 1 }
 0x466   :  { %8820 = vmatprep.subr.bf16.mxu1 %v9156_v46 }
 0x469   :  { %8821 = vmatpush3.bf16.msra.mxu1 %v9156_v46 }
 0x4fe   :  { %v8227_v50 = vpop.f32.mrb[16].mxu1  ;;  %v8255_v51 = vpop.f32.mrb[20].mxu0 }
 0x4ff   :  { %v8228_v52 = vpop.f32.mrb[17].mxu1  ;;  %v8256_v53 = vpop.f32.mrb[21].mxu0 }
 0x500   :  { %v8229_v54 = vadd.f32 %v8228_v52, %v8227_v50  ;;  %v8230_v25 = vpop.f32.mrb[18].mxu1  ;;  %v8257_v55 = vadd.f32 %v8256_v53, %v8255_v51  ;;  %v8258_v56 = vpop.f32.mrb[22].mxu0 }
 0x501   :  { %v8231_v57 = vpop.f32.mrb[19].mxu1  ;;  %v8259_v63 = vpop.f32.mrb[23].mxu0 }
 0x502   :  { %v8232_v0 = vadd.f32 %v8231_v57, %v8230_v25  ;;  %v8260_v1 = vadd.f32 %v8259_v63, %v8258_v56  ;;  %v2402_v2 = vadd.f32 %v8257_v55, %v8229_v54  ;;  %v2495_v63 = vld [vmem:[#allocation2] sm:$0x80] }
 0x504   :  { %v2405_v3 = vadd.f32 %v8260_v1, %v8232_v0 }
 0x507   :  { %v8233_v4 = vpop.f32.mrb[20].mxu1  ;;  %v8261_v5 = vpop.f32.mrb[24].mxu0 }
 0x508   :  { %v8234_v6 = vpop.f32.mrb[21].mxu1  ;;  %v8262_v7 = vpop.f32.mrb[25].mxu0 }
 0x509   :  { %v8235_v8 = vadd.f32 %v8234_v6, %v8233_v4  ;;  %v8236_v58 = vpop.f32.mrb[22].mxu1  ;;  %v8263_v9 = vadd.f32 %v8262_v7, %v8261_v5  ;;  %v8264_v10 = vpop.f32.mrb[26].mxu0 }
 0x50a   :  { %v8237_v15 = vpop.f32.mrb[23].mxu1  ;;  %v8265_v11 = vpop.f32.mrb[27].mxu0 }
 0x50b   :  { %v8238_v12 = vadd.f32 %v8237_v15, %v8236_v58  ;;  %v8266_v14 = vadd.f32 %v8265_v11, %v8264_v10  ;;  %v2410_v16 = vadd.f32 %v8263_v9, %v8235_v8  ;;  %v2529_v8 = vshrl.u32 %v2495_v63, 16  ;;  %v9179_v63 = vld [vmem:[#allocation24 + $0x70] sm:$0xff]  }
 0x50d   :  { %v2413_v17 = vadd.f32 %v8266_v14, %v8238_v12 }
 0x51f   :  { %v8804_v19 = vpop.f32.mrb[24].mxu1 }
 0x520   :  { %v2459_v21 = vadd.f32 %v8804_v19, %v2410_v16  ;;  %v2450_v22 = vpop.f32.mrb[25].mxu1 }
 0x521   :  { %v2451_v24 = vadd.f32 %v2450_v22, %v2402_v2  ;;  %v8805_v27 = vpop.f32.mrb[26].mxu1 }
 0x522   :  { %v2474_v28 = vmul.f32 %v7770_v20, %v2459_v21  ;;  %v2462_v29 = vadd.f32 %v8805_v27, %v2413_v17  ;;  %v2453_v30 = vpop.f32.mrb[27].mxu1 }
 0x523   :  { %v2472_v31 = vmul.f32 %v7770_v20, %v2451_v24  ;;  %v2454_v13 = vadd.f32 %v2453_v30, %v2405_v3  ;;  %v2531_v24 = vrot.slane %v2529_v8, 7 }
 0x524   :  { %v2485_v32 = vadd.f32 %v7771_v36, %v2474_v28  ;;  %v2475_v33 = vmul.f32 %v7770_v20, %v2462_v29 }
 0x525   :  { %v2483_v34 = vadd.f32 %v7771_v36, %v2472_v31  ;;  %v2473_v18 = vmul.f32 %v7770_v20, %v2454_v13  ;;  %v2497_v31 = vld [vmem:[#allocation2 + $0x18] sm:$0x80] }
 0x526   :  { %v2486_v35 = vadd.f32 %v7771_v36, %v2475_v33  ;;  %v2489_v37 = vmax.f32 %v2485_v32, 0.0 }
 0x527   :  { %v2484_v26 = vadd.f32 %v7771_v36, %v2473_v18  ;;  %v2487_v40 = vmax.f32 %v2483_v34, 0.0  ;;  %v2560_v34 = vshrl.u32 %v2497_v31, 16 }
 0x528   :  { %v2490_v38 = vmax.f32 %v2486_v35, 0.0 }
 0x529   :  { %v2488_v41 = vmax.f32 %v2484_v26, 0.0  ;;  %v2562_v26 = vrot.slane %v2560_v34, 7 }
 0x52a   :  { %v2492_v42 = vpack.c.bf16 %v2490_v38, %v2489_v37  ;;  %v9159_v38 = vld [vmem:[%s11292_s29] sm:$0xff]  }
 0x52b   :  { %v2491_v44 = vpack.c.bf16 %v2488_v41, %v2487_v40  ;;  %8826 = vmatprep.subr.bf16.mxu0 %v9159_v38  ;;  %v9163_v40 = vld [vmem:[%s11292_s29 + $0x10] sm:$0xff]   ;;  %v9166_v41 = vld [vmem:[%s11292_s29 + $0x18] sm:$0xff]  }
 0x52c   :  { %v2524_v46 = vrot.slane %v2492_v42, 1  ;;  %v2511_v47 = vshll.u32 %v2492_v42, 16  ;;  %v2514_v25 = vshrl.u32 %v2492_v42, 16  ;;  %v9161_v42 = vld [vmem:[#allocation24 + $0x40] sm:$0xff]  }
 0x52d   :  { %v2521_v48 = vrot.slane %v2491_v44, 1  ;;  %v2504_v49 = vshll.u32 %v2491_v44, 16  ;;  %v2507_v54 = vshrl.u32 %v2491_v44, 16  ;;  %8325 = vmatprep.subr.bf16.mxu1 %v9161_v42  ;;  %v9169_v44 = vld [vmem:[%s11292_s29 + $0x20] sm:$0xff]  }
 0x52e   :  { %v2526_v50 = vsel %vm764_vm2, %v2524_v46, %v2525_v43  ;;  %v2513_v51 = vrot.slane %v2511_v47, 1  ;;  %v2579_v0 = vshrl.u32 %v2524_v46, 16  ;;  %v2563_v18 = vrot.slane %v2514_v25, 7  ;;  %v9162_v43 = vld [vmem:[#allocation24] sm:$0xff]   ;;  %v9165_v46 = vld [vmem:[#allocation24 + $0x8] sm:$0xff]  }
 0x52f   :  { %v2523_v52 = vsel %vm764_vm2, %v2521_v48, %v2522_v45  ;;  %v2583_v53 = vshrl.u32 %v2526_v50, 16  ;;  %v2548_v55 = vshrl.u32 %v2521_v48, 16  ;;  %v2506_v57 = vrot.slane %v2504_v49, 1  ;;  %v9164_v45 = vld [vmem:[#allocation24 + $0x48] sm:$0xff]   ;;  %v9167_v48 = vld [vmem:[#allocation24 + $0x50] sm:$0xff]  }
 0x530   :  { %v2552_v56 = vshrl.u32 %v2523_v52, 16  ;;  %v2586_v2 = vshll.u32 %v2526_v50, 16  ;;  %v2516_v3 = vor.u32 %v2514_v25, %v2513_v51  ;;  %v2555_v5 = vshll.u32 %v2523_v52, 16  ;;  %v9175_v50 = vld [vmem:[%s11292_s29 + $0x30] sm:$0xff]   ;;  %v9171_v52 = vld [vmem:[#allocation24 + $0x18] sm:$0xff]  }
 0x531   :  { %v2585_v1 = vrot.slane %v2583_v53, 7  ;;  %v2509_v6 = vor.u32 %v2507_v54, %v2506_v57  ;;  %v2532_v58 = vrot.slane %v2507_v54, 7  ;;  %v2550_v10 = vrot.slane %v2548_v55, 7  ;;  %v9178_v53 = vld [vmem:[%s11292_s29 + $0x38] sm:$0xff]   ;;  %v9173_v54 = vld [vmem:[#allocation24 + $0x60] sm:$0xff]  }
 0x532   :  { %v2554_v4 = vrot.slane %v2552_v56, 7  ;;  %v2571_v9 = vshrl.u32 %v2516_v3, 16  ;;  %v2536_v11 = vshrl.u32 %v2506_v57, 16  ;;  %v2581_v14 = vrot.slane %v2579_v0, 7  ;;  %v9174_v25 = vld [vmem:[#allocation24 + $0x20] sm:$0xff]   ;;  %v9176_v55 = vld [vmem:[#allocation24 + $0x68] sm:$0xff]  }
 0x533   :  { %v2588_v7 = vor.u32 %v2586_v2, %v2585_v1  ;;  %v2540_v12 = vshrl.u32 %v2509_v6, 16  ;;  %v2567_v16 = vshrl.u32 %v2513_v51, 16  ;;  %v2543_v21 = vshll.u32 %v2509_v6, 16  ;;  %v9170_v51 = vld [vmem:[#allocation24 + $0x58] sm:$0xff]   ;;  %v9181_v56 = vld [vmem:[#allocation24 + $0xc0] sm:$0xff]   ;;  %v9177_v57 = vld [vmem:[#allocation24 + $0x28] sm:$0xff]  }
 0x534   :  { %v2557_v15 = vor.u32 %v2555_v5, %v2554_v4  ;;  %v2573_v17 = vrot.slane %v2571_v9, 7  ;;  %v2574_v22 = vshll.u32 %v2516_v3, 16  ;;  %v2533_v27 = vor.u32 %v2532_v58, %v2504_v49  ;;  %v9168_v49 = vld [vmem:[#allocation24 + $0x10] sm:$0xff]   ;;  %v9183_v1 = vld [vmem:[#allocation24 + $0x78] sm:$0xff]   ;;  %v9187_v3 = vld [vmem:[#allocation24 + $0x140] sm:$0xff]  }
 0x535   :  { %v2542_v20 = vrot.slane %v2540_v12, 7  ;;  %v2589_v36 = vsel %vm2527_vm9, %v2581_v14, %v2588_v7  ;;  %v2538_v28 = vrot.slane %v2536_v11, 7  ;;  %v2569_v32 = vrot.slane %v2567_v16, 7  ;;  %v9180_v0 = vld [vmem:[#allocation24 + $0x30] sm:$0xff]   ;;  %v9184_v2 = vld [vmem:[#allocation24 + $0x38] sm:$0xff]  }
 0x536   :  { %v2558_v19 = vsel %vm2527_vm9, %v2550_v10, %v2557_v15  ;;  %v2576_v30 = vor.u32 %v2574_v22, %v2573_v17  ;;  %v2534_v33 = vsel %vm2527_vm9, %v2531_v24, %v2533_v27  ;;  %v2564_v23 = vor.u32 %v2563_v18, %v2511_v47  ;;  %v9172_v47 = vld [vmem:[%s11292_s29 + $0x28] sm:$0xff]  }
 0x537   :  { %8822 = vmatprep.mubr.bf16.mxu1 %v2558_v19  ;;  %v2545_v29 = vor.u32 %v2543_v21, %v2542_v20  ;;  %v7660_v15 = vld [vmem:[#allocation21] ss:$0 sm:$0xff]  ;;  %v7796_v11 = vld [vmem:[#allocation17] ss:$0 sm:$0xff]  ;;  %v7797_v17 = vld [vmem:[#allocation18] ss:$0 sm:$0xff] }
 0x538   :  { %8823 = vmatmul.mubr.bf16.vlgmr.msra.gmra.mrb[28].mxu1 %v2589_v36  ;;  %v2577_v35 = vsel %vm2527_vm9, %v2569_v32, %v2576_v30  ;;  %v2565_v37 = vsel %vm2527_vm9, %v2562_v26, %v2564_v23  ;;  %v698_v19 = vmul.f32 %v7660_v15, %v10765_v60  ;;  %v7661_v22 = vld [vmem:[#allocation23] ss:$0 sm:$0xff]  ;;  %v699_v36 = vmul.f32 %v7660_v15, %v10769_v62  ;;  %v3057_v26 = vld [vmem:[#allocation2] sm:$0xc0] }
 0x539   :  { %v2546_v13 = vsel %vm2527_vm9, %v2538_v28, %v2545_v29  ;;  %8326 = vmatpush3.bf16.msra.mxu1 %v9162_v43  ;;  %v700_v34 = vmul.f32 %v10763_v59, %v7660_v15  ;;  %v701_v18 = vmul.f32 %v10767_v61, %v7660_v15  ;;  %v3221_v59 = vshll.u32 %v3057_v26, 16 }
 0x53a   :  { %2820 = vmatprep.mubr.bf16.mxu0 %v2546_v13  ;;  %8327 = vmatprep.subr.bf16.mxu1 %v9164_v45  ;;  %v709_v30 = vadd.f32 %v7661_v22, %v698_v19 }
 0x53b   :  { %2821 = vmatmul.mubr.bf16.vlgmr.msra.gmra.mrb[28].mxu0 %v2534_v33  ;;  %v711_v45 = vadd.f32 %v7661_v22, %v700_v34 }
 0x53c   :  { %2828 = vmatprep.mubr.bf16.mxu0 %v2577_v35  ;;  %8827 = vmatpush3.bf16.msra.mxu0 %v9159_v38  ;;  %v710_v35 = vadd.f32 %v7661_v22, %v699_v36  ;;  %v9185_v36 = vld [vmem:[#allocation24 + $0xc8] sm:$0xff]  }
 0x53d   :  { %8828 = vmatprep.subr.bf16.mxu0 %v9160_v39  ;;  %8328 = vmatpush3.bf16.msra.mxu1 %v9165_v46  ;;  %v712_v46 = vadd.f32 %v7661_v22, %v701_v18 }
 0x53e   :  { %8329 = vmatprep.subr.bf16.mxu1 %v9167_v48 }
 0x540   :  { %8829 = vmatpush3.bf16.msra.mxu0 %v9160_v39  ;;  %v10818_v39 = vld [vmem:[#allocation2] sm:$0x80] }
 0x541   :  { %8830 = vmatprep.subr.bf16.mxu0 %v9163_v40  ;;  %8330 = vmatpush3.bf16.msra.mxu1 %v9168_v49 }
 0x542   :  { %8331 = vmatprep.subr.bf16.mxu1 %v9170_v51  ;;  %v3059_v51 = vld [vmem:[#allocation2 + $0x18] sm:$0xc0] }
 0x543   :  { %2829 = vmatmul.mubr.bf16.gmra.mrb[32].mxu0 %v2565_v37 }
 0x544   :  { %8831 = vmatpush3.bf16.msra.mxu0 %v9163_v40  ;;  %v3076_v40 = vshll.u32 %v10818_v39, 16 }
 0x545   :  { %8832 = vmatprep.subr.bf16.mxu0 %v9166_v41  ;;  %8332 = vmatpush3.bf16.msra.mxu1 %v9171_v52 }
 0x546   :  { %8333 = vmatprep.subr.bf16.mxu1 %v9173_v54  ;;  %v3078_v54 = vrot.slane %v3076_v40, 1 }
 0x548   :  { %8833 = vmatpush3.bf16.msra.mxu0 %v9166_v41 }
 0x549   :  { %8834 = vmatprep.subr.bf16.mxu0 %v9169_v44  ;;  %8334 = vmatpush3.bf16.msra.mxu1 %v9174_v25 }
 0x54a   :  { %8335 = vmatprep.subr.bf16.mxu1 %v9176_v55 }
 0x54c   :  { %8835 = vmatpush3.bf16.msra.mxu0 %v9169_v44  ;;  %v3218_v44 = vshrl.u32 %v3057_v26, 16  ;;  %v9186_v26 = vld [vmem:[#allocation24 + $0x88] sm:$0xff]  }
 0x54d   :  { %8836 = vmatprep.subr.bf16.mxu0 %v9172_v47  ;;  %8336 = vmatpush3.bf16.msra.mxu1 %v9177_v57 }
 0x54e   :  { %8337 = vmatprep.subr.bf16.mxu1 %v9179_v63 }
 0x550   :  { %8837 = vmatpush3.bf16.msra.mxu0 %v9172_v47  ;;  %v10821_v47 = vld [vmem:[#allocation2 + $0x10] sm:$0x1] }
 0x551   :  { %8838 = vmatprep.subr.bf16.mxu0 %v9175_v50  ;;  %8338 = vmatpush3.bf16.msra.mxu1 %v9180_v0  ;;  %v3148_v52 = vshrl.u32 %v10821_v47, 16  ;;  %v3151_v55 = vshll.u32 %v10821_v47, 16  ;;  %v10834_v0 = vrot.slane %v3218_v44, 6 }
 0x552   :  { %8339 = vmatprep.subr.bf16.mxu1 %v9183_v1 }
 0x553   :  { %v10842_v15 = vrot.slane %v3151_v55, 3  ;;  %v9190_v55 = vld [vmem:[#allocation24 + $0x90] sm:$0xff]  }
 0x554   :  { %8839 = vmatpush3.bf16.msra.mxu0 %v9175_v50  ;;  %v10825_v50 = vld [vmem:[#allocation2 + $0x18] sm:$0x80] }
 0x555   :  { %8840 = vmatprep.subr.bf16.mxu0 %v9178_v53  ;;  %8340 = vmatpush3.bf16.msra.mxu1 %v9184_v2  ;;  %v3091_v25 = vshll.u32 %v10825_v50, 16  ;;  %v10837_v2 = vrot.slane %v3221_v59, 7  ;;  %v3110_v59 = vrot.slane %v10825_v50, 1 }
 0x556   :  { %8381 = vmatprep.subr.bf16.mxu1 %v9187_v3  ;;  %v3341_v3 = vshrl.u32 %v3059_v51, 16 }
 0x558   :  { %8841 = vmatpush3.bf16.msra.mxu0 %v9178_v53  ;;  %v3074_v53 = vshrl.u32 %v10818_v39, 16  ;;  %v10847_v19 = vrot.slane %v3341_v3, 6 }
 0x559   :  { %8353 = vmatprep.subr.bf16.mxu0 %v9181_v56 }
 0x60b   :  { %v8824_v4 = vpop.f32.mrb[28].mxu1 }
 0x60c   :  { %v2871_v5 = vpop.f32.mrb[29].mxu1 }
 0x60d   :  { %v8825_v6 = vpop.f32.mrb[30].mxu1 }
 0x60e   :  { %v2874_v7 = vpop.f32.mrb[31].mxu1  ;;  %v8293_v8 = vpop.f32.mrb[28].mxu0 }
 0x60f   :  { %v8294_v58 = vpop.f32.mrb[29].mxu0 }
 0x610   :  { %v8295_v9 = vadd.f32 %v8294_v58, %v8293_v8  ;;  %v8296_v10 = vpop.f32.mrb[30].mxu0  ;;  %v10839_v8 = vrot.slane %v3148_v52, 2 }
 0x611   :  { %v8297_v12 = vpop.f32.mrb[31].mxu0 }
 0x612   :  { %v2872_v14 = vadd.f32 %v8295_v9, %v2871_v5  ;;  %v8298_v16 = vadd.f32 %v8297_v12, %v8296_v10  ;;  %v3089_v9 = vshrl.u32 %v10825_v50, 16  ;;  %v3093_v10 = vrot.slane %v3091_v25, 1 }
 0x614   :  { %v2893_v20 = vmul.f32 %v7796_v11, %v2872_v14  ;;  %v2875_v21 = vadd.f32 %v8298_v16, %v2874_v7  ;;  %v3107_v14 = vrot.slane %v10818_v39, 1  ;;  %v9182_v16 = vld [vmem:[#allocation24 + $0x80] sm:$0xff]  }
 0x616   :  { %v2904_v24 = vadd.f32 %v7797_v17, %v2893_v20  ;;  %v2894_v27 = vmul.f32 %v7796_v11, %v2875_v21  ;;  %v8299_v28 = vpop.f32.mrb[32].mxu0  ;;  %v3134_v21 = vrot.slane %v10821_v47, 2 }
 0x617   :  { %v8300_v29 = vpop.f32.mrb[33].mxu0 }
 0x618   :  { %v2908_v31 = vmax.f32 %v2904_v24, 0.0  ;;  %v2905_v13 = vadd.f32 %v7797_v17, %v2894_v27  ;;  %v8301_v32 = vadd.f32 %v8300_v29, %v8299_v28  ;;  %v8302_v33 = vpop.f32.mrb[34].mxu0  ;;  %v3079_v24 = vor.u32 %v3078_v54, %v3074_v53 }
 0x619   :  { %v8303_v60 = vpop.f32.mrb[35].mxu0  ;;  %v3224_v27 = vor.u32 %v10837_v2, %v10834_v0 }
 0x61a   :  { %v2912_v23 = vadd.f32 %v2908_v31, %v709_v30  ;;  %v2909_v37 = vmax.f32 %v2905_v13, 0.0  ;;  %v2880_v38 = vadd.f32 %v8824_v4, %v8301_v32  ;;  %v8304_v62 = vadd.f32 %v8303_v60, %v8302_v33 }
 0x61b   :  { %v3344_v4 = vshll.u32 %v3059_v51, 16  ;;  %v10857_v13 = vor.u32 %v3093_v10, %v3089_v9  ;;  %v3154_v33 = vor.u32 %v10842_v15, %v10839_v8 }
 0x61c   :  { %v2913_v41 = vadd.f32 %v2909_v37, %v710_v35  ;;  %v2895_v42 = vmul.f32 %v7796_v11, %v2880_v38  ;;  %v2883_v43 = vadd.f32 %v8825_v6, %v8304_v62 }
 0x61d   :  { %v10849_v20 = vrot.slane %v3344_v4, 7  ;;  %v9193_v4 = vld [vmem:[#allocation24 + $0xd8] sm:$0xff]  }
 0x61e   :  { %v10823_v61 = vpack.c.bf16 %v2913_v41, %v2912_v23  ;;  %v2906_v48 = vadd.f32 %v7797_v17, %v2895_v42  ;;  %v2896_v49 = vmul.f32 %v7796_v11, %v2883_v43  ;;  %v10844_v11 = vld [vmem:[#allocation2 + $0x10] sm:$0x3]  ;;  %v9189_v43 = vld [vmem:[#allocation24 + $0xd0] sm:$0xff]  }
 0x61f   :  { %v3192_v28 = vshrl.u32 %v10844_v11, 16  ;;  %v3195_v60 = vshll.u32 %v10844_v11, 16  ;;  %v3347_v38 = vor.u32 %v10849_v20, %v10847_v19  ;;  %v9200_v19 = vld [vmem:[#allocation24 + $0x118] sm:$0xff]  }
 0x620   :  { %2918 = vst [vmem:[#allocation2 + $0x8] sm:$0xff] %v10823_v61  ;;  %v2910_v56 = vmax.f32 %v2906_v48, 0.0  ;;  %v2907_v57 = vadd.f32 %v7797_v17, %v2896_v49  ;;  %8842 = vmatprep.mubr.bf16.mxu0 %v10823_v61  ;;  %v3114_v63 = vshrl.u32 %v10823_v61, 16  ;;  %v3117_v1 = vshll.u32 %v10823_v61, 16 }
 0x621   :  { %v10871_v48 = vrot.slane %v3192_v28, 3  ;;  %v10874_v49 = vrot.slane %v10823_v61, 1  ;;  %v10877_v53 = vrot.slane %v3195_v60, 4 }
 0x622   :  { %v2914_v5 = vadd.f32 %v2910_v56, %v711_v45  ;;  %v2911_v6 = vmax.f32 %v2907_v57, 0.0  ;;  %v3116_v7 = vrot.slane %v3114_v63, 1  ;;  %v3119_v58 = vrot.slane %v3117_v1, 2 }
 0x624   :  { %v2915_v12 = vadd.f32 %v2911_v6, %v712_v46  ;;  %v3120_v17 = vor.u32 %v3119_v58, %v3116_v7 }
 0x626   :  { %v10852_v22 = vpack.c.bf16 %v2915_v12, %v2914_v5  ;;  %v3264_v29 = vshrl.u32 %v3120_v17, 16  ;;  %v3267_v30 = vshll.u32 %v3120_v17, 16  ;;  %v10882_v17 = vld [vmem:[#allocation2 + $0x28] sm:$0x1] }
 0x627   :  { %v3058_v31 = vld [vmem:[#allocation2 + $0x8] sm:$0x7f] }
 0x628   :  { %v10859_v32 = vld [vmem:[#allocation2 + $0x8] sm:$0xfe]  ;;  %2919 = vst [vmem:[#allocation2 + $0x20] sm:$0xff] %v10852_v22  ;;  %8843 = vmatmul.mubr.bf16.vlgmr.msra.gmra.mrb[36].mxu0 %v10852_v22  ;;  %v3081_v34 = vshll.u32 %v3058_v31, 16  ;;  %v3085_v18 = vshrl.u32 %v3058_v31, 16  ;;  %v3266_v23 = vrot.slane %v3264_v29, 6  ;;  %v10888_v29 = vsel %vm764_vm2, %v3107_v14, %v10874_v49 }
 0x629   :  { %v3140_v35 = vshrl.u32 %v10859_v32, 16  ;;  %8354 = vmatpush3.bf16.msra.mxu0 %v9182_v16  ;;  %v3269_v37 = vrot.slane %v3267_v30, 7  ;;  %v3143_v62 = vshll.u32 %v10859_v32, 16  ;;  %v3122_v57 = vshrl.u32 %v10852_v22, 16 }
 0x62a   :  { %8355 = vmatprep.subr.bf16.mxu0 %v9185_v36  ;;  %v3083_v40 = vrot.slane %v3081_v34, 1  ;;  %v3225_v41 = vrot.slane %v3085_v18, 6  ;;  %v3226_v42 = vrot.slane %v3081_v34, 7  ;;  %v3125_v5 = vshll.u32 %v10852_v22, 16  ;;  %v9197_v34 = vld [vmem:[#allocation24 + $0xe0] sm:$0xff]  }
 0x62b   :  { %v3142_v44 = vrot.slane %v3140_v35, 2  ;;  %v3270_v45 = vor.u32 %v3269_v37, %v3266_v23  ;;  %v3145_v46 = vrot.slane %v3143_v62, 3  ;;  %v3165_v30 = vshrl.u32 %v10882_v17, 16  ;;  %v9191_v62 = vld [vmem:[#allocation24 + $0x148] sm:$0xff]  }
 0x62c   :  { %v3084_v51 = vsel %vm729_vm0, %v3079_v24, %v3083_v40  ;;  %v3087_v52 = vor.u32 %v3085_v18, %v3083_v40  ;;  %v3227_v3 = vor.u32 %v3226_v42, %v3225_v41  ;;  %v9194_v24 = vld [vmem:[#allocation24 + $0x98] sm:$0xff]   ;;  %v3124_v35 = vrot.slane %v3122_v57, 1 }
 0x62d   :  { %8356 = vmatpush3.bf16.msra.mxu0 %v9186_v26  ;;  %4072 = vmatprep.mubr.bf16.mxu0 %v3270_v45  ;;  %v3230_v54 = vshrl.u32 %v3084_v51, 16  ;;  %v3233_v25 = vshll.u32 %v3084_v51, 16  ;;  %v3146_v56 = vor.u32 %v3145_v46, %v3142_v44  ;;  %v9188_v26 = vld [vmem:[#allocation24 + $0x100] sm:$0xff]   ;;  %v3127_v37 = vrot.slane %v3125_v5, 2 }
 0x62e   :  { %v3238_v63 = vshrl.u32 %v3087_v52, 16  ;;  %v3241_v1 = vshll.u32 %v3087_v52, 16  ;;  %8357 = vmatprep.subr.bf16.mxu0 %v9189_v43  ;;  %v3228_v60 = vsel %vm879_vm1, %v3224_v27, %v3227_v3  ;;  %v9198_v27 = vld [vmem:[#allocation24 + $0xa0] sm:$0xff]   ;;  %v3247_v57 = vshrl.u32 %v10888_v29, 16 }
 0x62f   :  { %v3232_v6 = vrot.slane %v3230_v54, 6  ;;  %v3235_v7 = vrot.slane %v3233_v25, 7  ;;  %v3060_v8 = vld [vmem:[#allocation2 + $0x20] sm:$0x7f]  ;;  %v3155_v58 = vsel %vm798_vm4, %v3146_v56, %v3154_v33  ;;  %v3290_v9 = vshrl.u32 %v3146_v56, 16  ;;  %v9201_v54 = vld [vmem:[#allocation24 + $0xe8] sm:$0xff]  }
 0x630   :  { %v3240_v10 = vrot.slane %v3238_v63, 6  ;;  %v3243_v15 = vrot.slane %v3241_v1, 7  ;;  %v3096_v12 = vshll.u32 %v3060_v8, 16  ;;  %v3100_v16 = vshrl.u32 %v3060_v8, 16  ;;  %v9192_v25 = vld [vmem:[#allocation24 + $0x108] sm:$0xff]  }
 0x631   :  { %v3236_v36 = vor.u32 %v3235_v7, %v3232_v6  ;;  %8358 = vmatpush3.bf16.msra.mxu0 %v9190_v55  ;;  %v3293_v28 = vshll.u32 %v3146_v56, 16  ;;  %v3298_v18 = vshrl.u32 %v3155_v58, 16  ;;  %v10895_v23 = vrot.slane %v3290_v9, 6  ;;  %v9195_v56 = vld [vmem:[#allocation24 + $0x150] sm:$0xff]  }
 0x632   :  { %v3244_v31 = vor.u32 %v3243_v15, %v3240_v10  ;;  %8359 = vmatprep.subr.bf16.mxu0 %v9193_v4  ;;  %v3098_v33 = vrot.slane %v3096_v12, 1  ;;  %v3301_v39 = vshll.u32 %v3155_v58, 16  ;;  %v3348_v42 = vrot.slane %v3100_v16, 6  ;;  %v10904_v6 = vld [vmem:[#allocation2 + $0x20] sm:$0xfe]  ;;  %v9202_v58 = vld [vmem:[#allocation24 + $0xa8] sm:$0xff]  }
 0x633   :  { %v3349_v0 = vrot.slane %v3096_v12, 7  ;;  %v3295_v2 = vrot.slane %v3293_v28, 7  ;;  %v3300_v51 = vrot.slane %v3298_v18, 6  ;;  %v3250_v63 = vshll.u32 %v10888_v29, 16  ;;  %v9196_v12 = vld [vmem:[#allocation24 + $0x110] sm:$0xff]  }
 0x634   :  { %v3245_v14 = vsel %vm879_vm1, %v3236_v36, %v3244_v31  ;;  %v3099_v40 = vsel %vm729_vm0, %v10857_v13, %v3098_v33  ;;  %v3102_v41 = vor.u32 %v3100_v16, %v3098_v33  ;;  %v3303_v52 = vrot.slane %v3301_v39, 7  ;;  %v9206_v39 = vld [vmem:[#allocation24 + $0xb0] sm:$0xff]  }
 0x635   :  { %4023 = vmatprep.mubr.bf16.mxu1 %v3245_v14  ;;  %8360 = vmatpush3.bf16.msra.mxu0 %v9194_v24  ;;  %v3353_v43 = vshrl.u32 %v3099_v40, 16  ;;  %v3356_v44 = vshll.u32 %v3099_v40, 16  ;;  %v3255_v4 = vshrl.u32 %v10874_v49, 16  ;;  %v3258_v5 = vshll.u32 %v10874_v49, 16  ;;  %v9205_v24 = vld [vmem:[#allocation24 + $0xf0] sm:$0xff]  }
 0x636   :  { %4024 = vmatmul.mubr.bf16.vlgmr.msra.gmra.mrb[32].mxu1 %v3228_v60  ;;  %v3361_v45 = vshrl.u32 %v3102_v41, 16  ;;  %v3364_v46 = vshll.u32 %v3102_v41, 16  ;;  %8361 = vmatprep.subr.bf16.mxu0 %v9197_v34  ;;  %v3350_v8 = vor.u32 %v3349_v0, %v3348_v42  ;;  %v3128_v9 = vor.u32 %v3127_v37, %v3124_v35  ;;  %v3071_v34 = vld [vmem:[#allocation2 + $0x8] sm:$0xfc] }
 0x637   :  { %8382 = vmatpush3.bf16.msra.mxu1 %v9188_v26  ;;  %v3355_v55 = vrot.slane %v3353_v43, 6  ;;  %v3358_v13 = vrot.slane %v3356_v44, 7  ;;  %v3168_v10 = vshll.u32 %v10882_v17, 16  ;;  %v3296_v16 = vor.u32 %v3295_v2, %v10895_v23  ;;  %v9199_v35 = vld [vmem:[#allocation24 + $0x158] sm:$0xff]   ;;  %v9203_v2 = vld [vmem:[#allocation24 + $0x160] sm:$0xff]  }
 0x638   :  { %8383 = vmatprep.subr.bf16.mxu1 %v9191_v62  ;;  %v3363_v1 = vrot.slane %v3361_v45, 6  ;;  %v3366_v3 = vrot.slane %v3364_v46, 7  ;;  %v3304_v36 = vor.u32 %v3303_v52, %v3300_v51  ;;  %v10908_v28 = vrot.slane %v3165_v30, 2  ;;  %v9209_v41 = vld [vmem:[#allocation24 + $0xf8] sm:$0xff]  }
 0x639   :  { %v3359_v7 = vor.u32 %v3358_v13, %v3355_v55  ;;  %8362 = vmatpush3.bf16.msra.mxu0 %v9198_v27  ;;  %v10911_v49 = vrot.slane %v10852_v22, 1  ;;  %v3249_v29 = vrot.slane %v3247_v57, 6  ;;  %v3157_v31 = vshrl.u32 %v10904_v6, 16  ;;  %v9210_v52 = vld [vmem:[#allocation24 + $0xb8] sm:$0xff]   ;;  %v9204_v13 = vld [vmem:[#allocation24 + $0x120] sm:$0xff]  }
 0x63a   :  { %v3367_v15 = vor.u32 %v3366_v3, %v3363_v1  ;;  %8363 = vmatprep.subr.bf16.mxu0 %v9201_v54  ;;  %v3160_v33 = vshll.u32 %v10904_v6, 16  ;;  %v3252_v60 = vrot.slane %v3250_v63, 7  ;;  %v3257_v26 = vrot.slane %v3255_v4, 6 }
 0x63b   :  { %8384 = vmatpush3.bf16.msra.mxu1 %v9192_v25  ;;  %v3260_v23 = vrot.slane %v3258_v5, 7  ;;  %v3351_v30 = vsel %vm879_vm1, %v3347_v38, %v3350_v8  ;;  %v3387_v37 = vshrl.u32 %v3128_v9, 16  ;;  %v10921_v14 = vrot.slane %v10823_v61, 2 }
 0x63c   :  { %v3368_v18 = vsel %vm879_vm1, %v3359_v7, %v3367_v15  ;;  %8385 = vmatprep.subr.bf16.mxu1 %v9195_v56  ;;  %v3170_v62 = vrot.slane %v3168_v10, 3  ;;  %v3305_v40 = vsel %vm879_vm1, %v3296_v16, %v3304_v36  ;;  %v3390_v42 = vshll.u32 %v3128_v9, 16  ;;  %v9214_v7 = vld [vmem:[#allocation24 + $0x180] sm:$0xff]  }
 0x63d   :  { %4031 = vmatprep.mubr.bf16.mxu1 %v3368_v18  ;;  %8364 = vmatpush3.bf16.msra.mxu0 %v9202_v58  ;;  %v3184_v43 = vshrl.u32 %v3071_v34, 16  ;;  %v3187_v44 = vshll.u32 %v3071_v34, 16  ;;  %v3159_v20 = vrot.slane %v3157_v31, 2  ;;  %v3162_v38 = vrot.slane %v3160_v33, 3  ;;  %v9211_v18 = vld [vmem:[#allocation24 + $0x170] sm:$0xff]  }
 0x63e   :  { %4032 = vmatmul.mubr.bf16.gmra.mrb[36].mxu1 %v3351_v30  ;;  %8365 = vmatprep.subr.bf16.mxu0 %v9205_v24  ;;  %v3112_v61 = vsel %vm764_vm2, %v3110_v59, %v10911_v49  ;;  %v3198_v0 = vor.u32 %v10877_v53, %v10871_v48  ;;  %v3253_v27 = vor.u32 %v3252_v60, %v3249_v29  ;;  %v9213_v59 = vld [vmem:[#allocation24 + $0x1c0] sm:$0xff]   ;;  %v3389_v25 = vrot.slane %v3387_v37, 6  ;;  %v9218_v30 = vld [vmem:[#allocation24 + $0x188] sm:$0xff]   ;;  %v9219_v37 = vld [vmem:[#allocation24 + $0x1d0] sm:$0xff]  }
 0x63f   :  { %8386 = vmatpush3.bf16.msra.mxu1 %v9196_v12  ;;  %4121 = vmatprep.mubr.bf16.mxu1 %v3305_v40  ;;  %v3261_v45 = vor.u32 %v3260_v23, %v3257_v26  ;;  %v3186_v46 = vrot.slane %v3184_v43, 3  ;;  %v3189_v51 = vrot.slane %v3187_v44, 4  ;;  %v10934_v54 = vsel %vm791_vm3, %v10921_v14, %v3134_v21  ;;  %v9207_v21 = vld [vmem:[#allocation24 + $0x168] sm:$0xff]  }
 0x640   :  { %8387 = vmatprep.subr.bf16.mxu1 %v9199_v35  ;;  %v3171_v50 = vor.u32 %v3170_v62, %v10908_v28  ;;  %v3392_v48 = vrot.slane %v3390_v42, 7  ;;  %v3370_v53 = vshrl.u32 %v3112_v61, 16  ;;  %v10937_v56 = vor.u32 %v3162_v38, %v3159_v20  ;;  %v9217_v12 = vld [vmem:[#allocation24 + $0x1c8] sm:$0xff]   ;;  %v10947_v28 = vld [vmem:[#allocation2 + $0x28] sm:$0x3]  ;;  %v9212_v20 = vld [vmem:[#allocation24 + $0x130] sm:$0xff]  }
 0x641   :  { %8366 = vmatpush3.bf16.msra.mxu0 %v9206_v39  ;;  %v3190_v55 = vor.u32 %v3189_v51, %v3186_v46  ;;  %v3373_v57 = vshll.u32 %v3112_v61, 16  ;;  %v3378_v63 = vshrl.u32 %v10911_v49, 16  ;;  %v3381_v47 = vshll.u32 %v10911_v49, 16  ;;  %v9208_v49 = vld [vmem:[#allocation24 + $0x128] sm:$0xff]  }
 0x642   :  { %8367 = vmatprep.subr.bf16.mxu0 %v9209_v41  ;;  %v3262_v1 = vsel %vm879_vm1, %v3253_v27, %v3261_v45  ;;  %v3273_v3 = vshrl.u32 %v10921_v14, 16  ;;  %v3276_v4 = vshll.u32 %v10921_v14, 16  ;;  %v3281_v8 = vshrl.u32 %v10934_v54, 16 }
 0x643   :  { %8388 = vmatpush3.bf16.msra.mxu1 %v9200_v19  ;;  %v3199_v5 = vsel %vm844_vm6, %v3190_v55, %v3198_v0  ;;  %v3324_v58 = vshrl.u32 %v3190_v55, 16  ;;  %v3327_v9 = vshll.u32 %v3190_v55, 16  ;;  %v3393_v15 = vor.u32 %v3392_v48, %v3389_v25  ;;  %v3072_v19 = vld [vmem:[#allocation2 + $0x20] sm:$0xfc] }
 0x644   :  { %8389 = vmatprep.subr.bf16.mxu1 %v9203_v2  ;;  %v3332_v10 = vshrl.u32 %v3199_v5, 16  ;;  %v3284_v16 = vshll.u32 %v10934_v54, 16  ;;  %v3372_v36 = vrot.slane %v3370_v53, 6  ;;  %v3335_v24 = vshll.u32 %v3199_v5, 16  ;;  %v9220_v54 = vld [vmem:[#allocation24 + $0x190] sm:$0xff]   ;;  %v9221_v53 = vld [vmem:[#allocation24 + $0x1d8] sm:$0xff]  }
 0x645   :  { %8368 = vmatpush3.bf16.msra.mxu0 %v9210_v52  ;;  %v3172_v29 = vsel %vm798_vm4, %v10937_v56, %v3171_v50  ;;  %v3375_v31 = vrot.slane %v3373_v57, 7  ;;  %v3380_v33 = vrot.slane %v3378_v63, 6  ;;  %v3383_v34 = vrot.slane %v3381_v47, 7  ;;  %v9222_v5 = vld [vmem:[#allocation24 + $0x198] sm:$0xff]  }
 0x646   :  { %8409 = vmatprep.subr.bf16.mxu0 %v9213_v59  ;;  %v3326_v35 = vrot.slane %v3324_v58, 6  ;;  %v3329_v60 = vrot.slane %v3327_v9, 7  ;;  %v3334_v26 = vrot.slane %v3332_v10, 6  ;;  %v3337_v23 = vrot.slane %v3335_v24, 7 }
 0x647   :  { %8390 = vmatpush3.bf16.msra.mxu1 %v9204_v13  ;;  %v3413_v39 = vshrl.u32 %v10937_v56, 16  ;;  %v3137_v14 = vrot.slane %v10882_v17, 2  ;;  %v3209_v62 = vshrl.u32 %v10947_v28, 16  ;;  %v3212_v40 = vshll.u32 %v10947_v28, 16  ;;  %v9215_v17 = vld [vmem:[#allocation24 + $0x178] sm:$0xff]  }
 0x648   :  { %8391 = vmatprep.subr.bf16.mxu1 %v9207_v21  ;;  %4073 = vmatmul.mubr.bf16.vlgmr.msra.gmra.mrb[40].mxu0 %v3262_v1  ;;  %v3416_v41 = vshll.u32 %v10937_v56, 16  ;;  %v3421_v42 = vshrl.u32 %v3172_v29, 16  ;;  %v3424_v43 = vshll.u32 %v3172_v29, 16  ;;  %v3136_v44 = vrot.slane %v10852_v22, 2  ;;  %v9216_v13 = vld [vmem:[#allocation24 + $0x138] sm:$0xff]  }
 0x649   :  { %4080 = vmatprep.mubr.bf16.mxu0 %v3393_v15  ;;  %8410 = vmatpush3.bf16.msra.mxu0 %v9214_v7  ;;  %v3275_v38 = vrot.slane %v3273_v3, 6  ;;  %v3278_v61 = vrot.slane %v3276_v4, 7  ;;  %v3376_v0 = vor.u32 %v3375_v31, %v3372_v36  ;;  %v3384_v2 = vor.u32 %v3383_v34, %v3380_v33 }
 0x64a   :  { %8411 = vmatprep.subr.bf16.mxu0 %v9217_v12  ;;  %v3283_v27 = vrot.slane %v3281_v8, 6  ;;  %v3286_v45 = vrot.slane %v3284_v16, 7  ;;  %v3330_v46 = vor.u32 %v3329_v60, %v3326_v35  ;;  %v3338_v51 = vor.u32 %v3337_v23, %v3334_v26  ;;  %v9223_v12 = vld [vmem:[#allocation24 + $0x1e0] sm:$0xff]   ;;  %v9225_v26 = vld [vmem:[#allocation24 + $0x1e8] sm:$0xff]  }
 0x64b   :  { %8392 = vmatpush3.bf16.msra.mxu1 %v9208_v49  ;;  %v3415_v52 = vrot.slane %v3413_v39, 6  ;;  %v3201_v50 = vshrl.u32 %v3072_v19, 16  ;;  %v3204_v59 = vshll.u32 %v3072_v19, 16  ;;  %v3418_v25 = vrot.slane %v3416_v41, 7  ;;  %v9226_v39 = vld [vmem:[#allocation24 + $0x1a8] sm:$0xff]  }
 0x64c   :  { %8393 = vmatprep.subr.bf16.mxu1 %v9211_v18  ;;  %v3423_v22 = vrot.slane %v3421_v42, 6  ;;  %v3426_v48 = vrot.slane %v3424_v43, 7  ;;  %v3138_v55 = vsel %vm791_vm3, %v3136_v44, %v3137_v14  ;;  %v3279_v56 = vor.u32 %v3278_v61, %v3275_v38  ;;  %v9224_v18 = vld [vmem:[#allocation24 + $0x1a0] sm:$0xff]  }
 0x64d   :  { %8412 = vmatpush3.bf16.msra.mxu0 %v9218_v30  ;;  %v3385_v57 = vsel %vm879_vm1, %v3376_v0, %v3384_v2  ;;  %v3211_v63 = vrot.slane %v3209_v62, 3  ;;  %v3214_v47 = vrot.slane %v3212_v40, 4  ;;  %v3287_v21 = vor.u32 %v3286_v45, %v3283_v27  ;;  %v9228_v0 = vld [vmem:[#allocation24 + $0x1b0] sm:$0xff]   ;;  %v9229_v2 = vld [vmem:[#allocation24 + $0x1f8] sm:$0xff]  }
 0x64e   :  { %8413 = vmatprep.subr.bf16.mxu0 %v9219_v37  ;;  %v3339_v1 = vsel %vm879_vm1, %v3330_v46, %v3338_v51  ;;  %v3396_v3 = vshrl.u32 %v3136_v44, 16  ;;  %v3399_v4 = vshll.u32 %v3136_v44, 16  ;;  %v3404_v7 = vshrl.u32 %v3138_v55, 16  ;;  %v9227_v37 = vld [vmem:[#allocation24 + $0x1f0] sm:$0xff]  }
 0x64f   :  { %8394 = vmatpush3.bf16.msra.mxu1 %v9212_v20  ;;  %v3407_v8 = vshll.u32 %v3138_v55, 16  ;;  %v3203_v58 = vrot.slane %v3201_v50, 3  ;;  %v3206_v9 = vrot.slane %v3204_v59, 4  ;;  %v3419_v10 = vor.u32 %v3418_v25, %v3415_v52  ;;  %v9230_v50 = vld [vmem:[#allocation24 + $0x1b8] sm:$0xff]  }
 0x650   :  { %8395 = vmatprep.subr.bf16.mxu1 %v9215_v17  ;;  %4081 = vmatmul.mubr.bf16.gmra.mrb[44].mxu0 %v3385_v57  ;;  %v3427_v15 = vor.u32 %v3426_v48, %v3423_v22  ;;  %v3178_v16 = vrot.slane %v10844_v11, 3  ;;  %v3288_v36 = vsel %vm879_vm1, %v3279_v56, %v3287_v21  ;;  %v3398_v24 = vrot.slane %v3396_v3, 6 }
 0x651   :  { %8414 = vmatpush3.bf16.msra.mxu0 %v9220_v54  ;;  %4170 = vmatprep.mubr.bf16.mxu0 %v3339_v1  ;;  %v3177_v49 = vrot.slane %v10859_v32, 3  ;;  %v3215_v29 = vor.u32 %v3214_v47, %v3211_v63  ;;  %v3401_v31 = vrot.slane %v3399_v4, 7  ;;  %v3406_v33 = vrot.slane %v3404_v7, 6 }
 0x652   :  { %8415 = vmatprep.subr.bf16.mxu0 %v9221_v53  ;;  %v3409_v34 = vrot.slane %v3407_v8, 7  ;;  %v3207_v35 = vor.u32 %v3206_v9, %v3203_v58  ;;  %v3428_v60 = vsel %vm879_vm1, %v3419_v10, %v3427_v15  ;;  %v3180_v42 = vrot.slane %v10904_v6, 3  ;;  %v9231_v8 = vld [vmem:[#allocation29 + $0x40] sm:$0xff]   ;;  %v9235_v15 = vld [vmem:[#allocation29 + $0x48] sm:$0xff]  }
 0x653   :  { %8396 = vmatpush3.bf16.msra.mxu1 %v9216_v13  ;;  %v3179_v11 = vsel %vm837_vm5, %v3177_v49, %v3178_v16  ;;  %v3402_v23 = vor.u32 %v3401_v31, %v3398_v24  ;;  %v3307_v14 = vshrl.u32 %v3177_v49, 16  ;;  %v3310_v62 = vshll.u32 %v3177_v49, 16  ;;  %v9232_v58 = vld [vmem:[#allocation29] sm:$0xff]   ;;  %v9237_v16 = vld [vmem:[#allocation29 + $0xc8] sm:$0xff]   ;;  %v9240_v49 = vld [vmem:[#allocation29 + $0x10] sm:$0xff]  }
 0x654   :  { %v3410_v30 = vor.u32 %v3409_v34, %v3406_v33  ;;  %v3216_v32 = vsel %vm844_vm6, %v3207_v35, %v3215_v29  ;;  %v3315_v40 = vshrl.u32 %v3179_v11, 16  ;;  %v3318_v41 = vshll.u32 %v3179_v11, 16  ;;  %8437 = vmatprep.subr.bf16.mxu1 %v9231_v8  ;;  %v9233_v9 = vld [vmem:[#allocation29 + $0xc0] sm:$0xff]   ;;  %v9238_v24 = vld [vmem:[#allocation29 + $0x88] sm:$0xff]   ;;  %v9241_v29 = vld [vmem:[#allocation29 + $0xd0] sm:$0xff]  }
 0x655   :  { %8416 = vmatpush3.bf16.msra.mxu0 %v9222_v5  ;;  %v3181_v43 = vrot.slane %v10947_v28, 3  ;;  %v3447_v44 = vshrl.u32 %v3207_v35, 16  ;;  %v3450_v19 = vshll.u32 %v3207_v35, 16  ;;  %v3455_v20 = vshrl.u32 %v3216_v32, 16  ;;  %v9234_v10 = vld [vmem:[#allocation29 + $0x80] sm:$0xff]   ;;  %v9242_v31 = vld [vmem:[#allocation29 + $0x90] sm:$0xff]  }
 0x656   :  { %4122 = vmatmul.mubr.bf16.vlgmr.msra.gmra.mrb[40].mxu1 %v3288_v36  ;;  %8417 = vmatprep.subr.bf16.mxu0 %v9223_v12  ;;  %v3458_v38 = vshll.u32 %v3216_v32, 16  ;;  %v3411_v61 = vsel %vm879_vm1, %v3402_v23, %v3410_v30  ;;  %v3309_v17 = vrot.slane %v3307_v14, 6  ;;  %v3312_v27 = vrot.slane %v3310_v62, 7  ;;  %v9236_v12 = vld [vmem:[#allocation29 + $0x8] sm:$0xff]   ;;  %v9239_v36 = vld [vmem:[#allocation29 + $0x50] sm:$0xff]   ;;  %v9243_v33 = vld [vmem:[#allocation29 + $0x58] sm:$0xff]  }
 0x657   :  { %4129 = vmatprep.mubr.bf16.mxu1 %v3428_v60  ;;  %v3317_v45 = vrot.slane %v3315_v40, 6  ;;  %v3320_v46 = vrot.slane %v3318_v41, 7  ;;  %v3182_v51 = vsel %vm837_vm5, %v3180_v42, %v3181_v43  ;;  %v3449_v6 = vrot.slane %v3447_v44, 6  ;;  %8438 = vmatpush3.bf16.msra.mxu1 %v9232_v58  ;;  %v9244_v34 = vld [vmem:[#allocation29 + $0x18] sm:$0xff]   ;;  %v9247_v35 = vld [vmem:[#allocation29 + $0x60] sm:$0xff]   ;;  %v9251_v23 = vld [vmem:[#allocation29 + $0x68] sm:$0xff]  }
 0x658   :  { %v3452_v52 = vrot.slane %v3450_v19, 7  ;;  %v3457_v28 = vrot.slane %v3455_v20, 6  ;;  %v3460_v54 = vrot.slane %v3458_v38, 7  ;;  %v3313_v59 = vor.u32 %v3312_v27, %v3309_v17  ;;  %8439 = vmatprep.subr.bf16.mxu1 %v9235_v15  ;;  %v9246_v60 = vld [vmem:[#allocation29 + $0x98] sm:$0xff]   ;;  %v9249_v11 = vld [vmem:[#allocation29 + $0xe0] sm:$0xff]   ;;  %v9253_v32 = vld [vmem:[#allocation29 + $0xe8] sm:$0xff]  }
 0x659   :  { %8418 = vmatpush3.bf16.msra.mxu0 %v9224_v18  ;;  %v3430_v25 = vshrl.u32 %v3180_v42, 16  ;;  %v3321_v22 = vor.u32 %v3320_v46, %v3317_v45  ;;  %v3433_v48 = vshll.u32 %v3180_v42, 16  ;;  %v3438_v53 = vshrl.u32 %v3182_v51, 16  ;;  %v9245_v18 = vld [vmem:[#allocation29 + $0xd8] sm:$0xff]   ;;  %v9250_v30 = vld [vmem:[#allocation29 + $0xa0] sm:$0xff]   ;;  %v9254_v14 = vld [vmem:[#allocation29 + $0xa8] sm:$0xff]  }
 0x65a   :  { %8419 = vmatprep.subr.bf16.mxu0 %v9225_v26  ;;  %v3441_v55 = vshll.u32 %v3182_v51, 16  ;;  %v3453_v13 = vor.u32 %v3452_v52, %v3449_v6  ;;  %v3461_v56 = vor.u32 %v3460_v54, %v3457_v28  ;;  %v9248_v26 = vld [vmem:[#allocation29 + $0x20] sm:$0xff]   ;;  %v9256_v62 = vld [vmem:[#allocation29 + $0x30] sm:$0xff]   ;;  %v9259_v41 = vld [vmem:[#allocation29 + $0x78] sm:$0xff]  }
 0x65b   :  { %v3432_v57 = vrot.slane %v3430_v25, 6  ;;  %v3322_v63 = vsel %vm879_vm1, %v3313_v59, %v3321_v22  ;;  %v3435_v47 = vrot.slane %v3433_v48, 7  ;;  %v3440_v21 = vrot.slane %v3438_v53, 6  ;;  %8440 = vmatpush3.bf16.msra.mxu1 %v9236_v12  ;;  %v9257_v40 = vld [vmem:[#allocation29 + $0xf0] sm:$0xff]   ;;  %v9260_v43 = vld [vmem:[#allocation29 + $0x38] sm:$0xff]   ;;  %v10973_v19 = vld [vmem:[#allocation29 + $0x100] sm:$0xff]  }
 0x65c   :  { %v3443_v1 = vrot.slane %v3441_v55, 7  ;;  %v3462_v3 = vsel %vm879_vm1, %v3453_v13, %v3461_v56  ;;  %8441 = vmatprep.subr.bf16.mxu1 %v9239_v36  ;;  %v9258_v42 = vld [vmem:[#allocation29 + $0xb0] sm:$0xff]   ;;  %v9261_v44 = vld [vmem:[#allocation29 + $0xf8] sm:$0xff]  }
 0x65d   :  { %8420 = vmatpush3.bf16.msra.mxu0 %v9226_v39  ;;  %v3436_v4 = vor.u32 %v3435_v47, %v3432_v57  ;;  %v9252_v39 = vld [vmem:[#allocation29 + $0x28] sm:$0xff]   ;;  %v9262_v20 = vld [vmem:[#allocation29 + $0xb8] sm:$0xff]  }
 0x65e   :  { %4130 = vmatmul.mubr.bf16.gmra.mrb[44].mxu1 %v3411_v61  ;;  %8421 = vmatprep.subr.bf16.mxu0 %v9227_v37  ;;  %v3444_v5 = vor.u32 %v3443_v1, %v3440_v21  ;;  %v9255_v37 = vld [vmem:[#allocation29 + $0x70] sm:$0xff]  }
 0x65f   :  { %8442 = vmatpush3.bf16.msra.mxu1 %v9240_v49 }
 0x660   :  { %v3445_v7 = vsel %vm879_vm1, %v3436_v4, %v3444_v5  ;;  %8443 = vmatprep.subr.bf16.mxu1 %v9243_v33 }
 0x661   :  { %8422 = vmatpush3.bf16.msra.mxu0 %v9228_v0 }
 0x662   :  { %8423 = vmatprep.subr.bf16.mxu0 %v9229_v2 }
 0x663   :  { %8444 = vmatpush3.bf16.msra.mxu1 %v9244_v34 }
 0x664   :  { %8445 = vmatprep.subr.bf16.mxu1 %v9247_v35 }
 0x665   :  { %8424 = vmatpush3.bf16.msra.mxu0 %v9230_v50 }
 0x666   :  { %8465 = vmatprep.subr.bf16.mxu0 %v9233_v9 }
 0x667   :  { %8446 = vmatpush3.bf16.msra.mxu1 %v9248_v26 }
 0x668   :  { %4171 = vmatmul.mubr.bf16.vlgmr.msra.gmra.mrb[48].mxu0 %v3322_v63  ;;  %8447 = vmatprep.subr.bf16.mxu1 %v9251_v23 }
 0x669   :  { %4178 = vmatprep.mubr.bf16.mxu0 %v3462_v3  ;;  %8466 = vmatpush3.bf16.msra.mxu0 %v9234_v10 }
 0x66a   :  { %8467 = vmatprep.subr.bf16.mxu0 %v9237_v16 }
 0x66b   :  { %8448 = vmatpush3.bf16.msra.mxu1 %v9252_v39  ;;  %v7872_v39 = vld [vmem:[#allocation26] ss:$0 sm:$0xff] }
 0x66c   :  { %8449 = vmatprep.subr.bf16.mxu1 %v9255_v37 }
 0x66d   :  { %8468 = vmatpush3.bf16.msra.mxu0 %v9238_v24 }
 0x66e   :  { %8469 = vmatprep.subr.bf16.mxu0 %v9241_v29 }
 0x66f   :  { %8450 = vmatpush3.bf16.msra.mxu1 %v9256_v62  ;;  %v7873_v62 = vld [vmem:[#allocation27] ss:$0 sm:$0xff] }
 0x670   :  { %4179 = vmatmul.mubr.bf16.gmra.mrb[52].mxu0 %v3445_v7  ;;  %8451 = vmatprep.subr.bf16.mxu1 %v9259_v41 }
 0x671   :  { %8470 = vmatpush3.bf16.msra.mxu0 %v9242_v31 }
 0x672   :  { %8471 = vmatprep.subr.bf16.mxu0 %v9245_v18 }
 0x673   :  { %8452 = vmatpush3.bf16.msra.mxu1 %v9260_v43 }
 0x674   :  { %8846 = vmatprep.subr.bf16.mxu1 %v10973_v19 }
 0x675   :  { %8472 = vmatpush3.bf16.msra.mxu0 %v9246_v60 }
 0x676   :  { %8473 = vmatprep.subr.bf16.mxu0 %v9249_v11 }
 0x679   :  { %8474 = vmatpush3.bf16.msra.mxu0 %v9250_v30 }
 0x67a   :  { %8475 = vmatprep.subr.bf16.mxu0 %v9253_v32 }
 0x67d   :  { %8476 = vmatpush3.bf16.msra.mxu0 %v9254_v14 }
 0x67e   :  { %8477 = vmatprep.subr.bf16.mxu0 %v9257_v40 }
 0x681   :  { %8478 = vmatpush3.bf16.msra.mxu0 %v9258_v42 }
 0x682   :  { %8479 = vmatprep.subr.bf16.mxu0 %v9261_v44 }
 0x685   :  { %8480 = vmatpush3.bf16.msra.mxu0 %v9262_v20 }
 0x6fb   :  { %v10976_v38 = vpop.f32.mrb[36].mxu0 }
 0x6fc   :  { %v10978_v61 = vpop.f32.mrb[37].mxu0 }
 0x6fd   :  { %v10980_v0 = vpop.f32.mrb[38].mxu0 }
 0x6fe   :  { %v10982_v2 = vpop.f32.mrb[39].mxu0 }
 0x709   :  { %v8341_v17 = vpop.f32.mrb[32].mxu1 }
 0x70a   :  { %v8342_v27 = vpop.f32.mrb[33].mxu1 }
 0x70b   :  { %v8343_v45 = vadd.f32 %v8342_v27, %v8341_v17  ;;  %v8344_v46 = vpop.f32.mrb[34].mxu1 }
 0x70c   :  { %v8345_v51 = vpop.f32.mrb[35].mxu1 }
 0x70d   :  { %v8346_v6 = vadd.f32 %v8345_v51, %v8344_v46 }
 0x711   :  { %v8347_v52 = vpop.f32.mrb[36].mxu1 }
 0x712   :  { %v8348_v28 = vpop.f32.mrb[37].mxu1 }
 0x713   :  { %v8349_v54 = vadd.f32 %v8348_v28, %v8347_v52  ;;  %v8350_v50 = vpop.f32.mrb[38].mxu1 }
 0x714   :  { %v8351_v59 = vpop.f32.mrb[39].mxu1 }
 0x715   :  { %v8352_v25 = vadd.f32 %v8351_v59, %v8350_v50  ;;  %v4224_v50 = vld [vmem:[#allocation2 + $0x10] sm:$0x1] }
 0x71b   :  { %v8369_v22 = vpop.f32.mrb[40].mxu0 }
 0x71c   :  { %v8370_v48 = vpop.f32.mrb[41].mxu0 }
 0x71d   :  { %v8371_v53 = vadd.f32 %v8370_v48, %v8369_v22  ;;  %v8372_v55 = vpop.f32.mrb[42].mxu0 }
 0x71e   :  { %v8373_v13 = vpop.f32.mrb[43].mxu0 }
 0x71f   :  { %v4075_v56 = vadd.f32 %v8371_v53, %v8343_v45  ;;  %v8374_v57 = vadd.f32 %v8373_v13, %v8372_v55  ;;  %v4264_v53 = vshll.u32 %v4224_v50, 16 }
 0x721   :  { %v4078_v63 = vadd.f32 %v8374_v57, %v8346_v6 }
 0x723   :  { %v8375_v47 = vpop.f32.mrb[44].mxu0 }
 0x724   :  { %v8376_v21 = vpop.f32.mrb[45].mxu0 }
 0x725   :  { %v8377_v1 = vadd.f32 %v8376_v21, %v8375_v47  ;;  %v8378_v3 = vpop.f32.mrb[46].mxu0 }
 0x726   :  { %v8379_v4 = vpop.f32.mrb[47].mxu0 }
 0x727   :  { %v4083_v5 = vadd.f32 %v8377_v1, %v8349_v54  ;;  %v8380_v7 = vadd.f32 %v8379_v4, %v8378_v3  ;;  %v4217_v54 = vld [vmem:[#allocation2] sm:$0x80]  ;;  %v4266_v3 = vrot.slane %v4264_v53, 2  ;;  %v4219_v4 = vld [vmem:[#allocation2 + $0x18] sm:$0x80] }
 0x728   :  { %v4230_v48 = vshrl.u32 %v4217_v54, 16 }
 0x729   :  { %v8397_v8 = vpop.f32.mrb[40].mxu1  ;;  %v4086_v58 = vadd.f32 %v8380_v7, %v8352_v25 }
 0x72a   :  { %v8398_v9 = vpop.f32.mrb[41].mxu1 }
 0x72b   :  { %v8399_v10 = vadd.f32 %v8398_v9, %v8397_v8  ;;  %v8400_v15 = vpop.f32.mrb[42].mxu1  ;;  %v10985_v9 = vld [vmem:[#allocation2 + $0x28] sm:$0x1] }
 0x72c   :  { %v8401_v12 = vpop.f32.mrb[43].mxu1 }
 0x72d   :  { %v4124_v16 = vadd.f32 %v8399_v10, %v4075_v56  ;;  %v8402_v36 = vadd.f32 %v8401_v12, %v8400_v15 }
 0x72f   :  { %v4127_v24 = vadd.f32 %v8402_v36, %v4078_v63  ;;  %v4295_v36 = vrot.slane %v4217_v54, 7 }
 0x731   :  { %v8403_v49 = vpop.f32.mrb[44].mxu1 }
 0x732   :  { %v8404_v29 = vpop.f32.mrb[45].mxu1 }
 0x733   :  { %v8405_v31 = vadd.f32 %v8404_v29, %v8403_v49  ;;  %v8406_v33 = vpop.f32.mrb[46].mxu1 }
 0x734   :  { %v8407_v34 = vpop.f32.mrb[47].mxu1 }
 0x735   :  { %v4132_v18 = vadd.f32 %v8405_v31, %v4083_v5  ;;  %v8408_v35 = vadd.f32 %v8407_v34, %v8406_v33  ;;  %v4277_v33 = vshll.u32 %v10985_v9, 16 }
 0x737   :  { %v4135_v60 = vadd.f32 %v8408_v35, %v4086_v58 }
 0x73b   :  { %v8425_v26 = vpop.f32.mrb[48].mxu0 }
 0x73c   :  { %v8426_v11 = vpop.f32.mrb[49].mxu0 }
 0x73d   :  { %v8427_v23 = vadd.f32 %v8426_v11, %v8425_v26  ;;  %v8428_v30 = vpop.f32.mrb[50].mxu0  ;;  %v9264_v11 = vld [vmem:[#allocation29 + $0x108] sm:$0xff]  }
 0x73e   :  { %v8429_v32 = vpop.f32.mrb[51].mxu0 }
 0x73f   :  { %v4173_v37 = vadd.f32 %v8427_v23, %v4124_v16  ;;  %v8430_v14 = vadd.f32 %v8429_v32, %v8428_v30 }
 0x741   :  { %v4194_v40 = vmul.f32 %v7872_v39, %v4173_v37  ;;  %v4176_v41 = vadd.f32 %v8430_v14, %v4127_v24  ;;  %v4241_v24 = vshrl.u32 %v4219_v4, 16 }
 0x743   :  { %v4205_v42 = vadd.f32 %v7873_v62, %v4194_v40  ;;  %v4195_v43 = vmul.f32 %v7872_v39, %v4176_v41  ;;  %v8431_v44 = vpop.f32.mrb[52].mxu0  ;;  %v4279_v41 = vrot.slane %v4277_v33, 2  ;;  %v9284_v33 = vld [vmem:[#allocation33 + $0x60] sm:$0xff]  }
 0x744   :  { %v8432_v20 = vpop.f32.mrb[53].mxu0 }
 0x745   :  { %v4206_v17 = vadd.f32 %v7873_v62, %v4195_v43  ;;  %v8433_v27 = vadd.f32 %v8432_v20, %v8431_v44  ;;  %v8434_v45 = vpop.f32.mrb[54].mxu0  ;;  %v4209_v51 = vmax.f32 %v4205_v42, 0.0  ;;  %v9265_v20 = vld [vmem:[#allocation29 + $0x110] sm:$0xff]  }
 0x746   :  { %v8435_v46 = vpop.f32.mrb[55].mxu0 }
 0x747   :  { %v4210_v6 = vmax.f32 %v4206_v17, 0.0  ;;  %v4181_v52 = vadd.f32 %v8433_v27, %v4132_v18  ;;  %v8436_v28 = vadd.f32 %v8435_v46, %v8434_v45  ;;  %v4309_v46 = vrot.slane %v4219_v4, 7 }
 0x749   :  { %v4213_v59 = vpack.c.bf16 %v4210_v6, %v4209_v51  ;;  %v4196_v25 = vmul.f32 %v7872_v39, %v4181_v52  ;;  %v4184_v22 = vadd.f32 %v8436_v28, %v4135_v60 }
 0x74b   :  { %4215 = vst [vmem:[#allocation2 + $0x8] sm:$0xff] %v4213_v59  ;;  %v4207_v55 = vadd.f32 %v7873_v62, %v4196_v25  ;;  %v4197_v13 = vmul.f32 %v7872_v39, %v4184_v22  ;;  %v4233_v56 = vshll.u32 %v4213_v59, 16  ;;  %v4237_v57 = vshrl.u32 %v4213_v59, 16  ;;  %v9266_v25 = vld [vmem:[#allocation29 + $0x118] sm:$0xff]  }
 0x74c   :  { %v4286_v39 = vrot.slane %v4224_v50, 2 }
 0x74d   :  { %v4208_v63 = vadd.f32 %v7873_v62, %v4197_v13  ;;  %v4235_v47 = vrot.slane %v4233_v56, 1  ;;  %v4258_v21 = vrot.slane %v4237_v57, 1  ;;  %v4261_v1 = vrot.slane %v4233_v56, 2  ;;  %v9268_v13 = vld [vmem:[#allocation29 + $0x128] sm:$0xff]  }
 0x74e   :  { %v4211_v5 = vmax.f32 %v4207_v55, 0.0  ;;  %v9267_v55 = vld [vmem:[#allocation29 + $0x120] sm:$0xff]  }
 0x74f   :  { %v4212_v7 = vmax.f32 %v4208_v63, 0.0  ;;  %v4236_v8 = vsel %vm729_vm0, %v4230_v48, %v4235_v47  ;;  %v4239_v58 = vor.u32 %v4237_v57, %v4235_v47  ;;  %v4262_v15 = vor.u32 %v4261_v1, %v4258_v21  ;;  %v9269_v57 = vld [vmem:[#allocation29 + $0x130] sm:$0xff]   ;;  %v9270_v21 = vld [vmem:[#allocation29 + $0x138] sm:$0xff]  }
 0x750   :  { %v4298_v10 = vrot.slane %v4236_v8, 7  ;;  %v4289_v63 = vrot.slane %v10985_v9, 2  ;;  %v9272_v8 = vld [vmem:[#allocation33 + $0x40] sm:$0xff]   ;;  %v9274_v9 = vld [vmem:[#allocation33 + $0x88] sm:$0xff]  }
 0x751   :  { %v4214_v12 = vpack.c.bf16 %v4212_v7, %v4211_v5  ;;  %v4299_v16 = vrot.slane %v4239_v58, 7  ;;  %v4267_v29 = vsel %vm1918_vm7, %v4262_v15, %v4266_v3  ;;  %v4303_v31 = vrot.slane %v4262_v15, 7  ;;  %v9271_v7 = vld [vmem:[#allocation33 + $0x80] sm:$0xff]   ;;  %v9277_v15 = vld [vmem:[#allocation33 + $0x90] sm:$0xff]   ;;  %8503 = vmatprep.subr.bf16.mxu0 %v9272_v8 }
 0x752   :  { %v4218_v49 = vld [vmem:[#allocation2 + $0x8] sm:$0x7f]  ;;  %v4304_v60 = vrot.slane %v4267_v29, 7  ;;  %v9273_v58 = vld [vmem:[#allocation33] sm:$0xff]  }
 0x753   :  { %v4227_v34 = vld [vmem:[#allocation2 + $0x8] sm:$0xfe]  ;;  %4216 = vst [vmem:[#allocation2 + $0x20] sm:$0xff] %v4214_v12  ;;  %v4300_v18 = vsel %vm1959_vm8, %v4298_v10, %v4299_v16  ;;  %v4296_v35 = vrot.slane %v4218_v49, 7  ;;  %v4244_v26 = vshll.u32 %v4214_v12, 16  ;;  %v4248_v23 = vshrl.u32 %v4214_v12, 16 }
 0x754   :  { %4685 = vmatprep.mubr.bf16.mxu1 %v4300_v18  ;;  %v4285_v30 = vrot.slane %v4227_v34, 2  ;;  %v4305_v37 = vsel %vm1959_vm8, %v4303_v31, %v4304_v60  ;;  %v9275_v10 = vld [vmem:[#allocation33 + $0x48] sm:$0xff]   ;;  %v9278_v16 = vld [vmem:[#allocation33 + $0x50] sm:$0xff]   ;;  %v9281_v49 = vld [vmem:[#allocation33 + $0x58] sm:$0xff]  }
 0x755   :  { %v4297_v32 = vsel %vm1959_vm8, %v4295_v36, %v4296_v35  ;;  %v4246_v14 = vrot.slane %v4244_v26, 1  ;;  %v4274_v62 = vrot.slane %v4244_v26, 2  ;;  %4734 = vmatprep.mubr.bf16.mxu0 %v4305_v37  ;;  %v4271_v40 = vrot.slane %v4248_v23, 1  ;;  %v9280_v36 = vld [vmem:[#allocation33 + $0x98] sm:$0xff]   ;;  %v9283_v29 = vld [vmem:[#allocation33 + $0xa0] sm:$0xff]   ;;  %v9286_v34 = vld [vmem:[#allocation33 + $0xa8] sm:$0xff]  }
 0x756   :  { %4686 = vmatmul.mubr.bf16.vlgmr.msra.gmra.mrb[48].mxu1 %v4297_v32  ;;  %4735 = vmatmul.mubr.bf16.vlgmr.msra.gmra.mrb[56].mxu0 %v4213_v59  ;;  %v4287_v27 = vsel %vm791_vm3, %v4285_v30, %v4286_v39  ;;  %v4306_v28 = vrot.slane %v4285_v30, 7  ;;  %v9282_v31 = vld [vmem:[#allocation33 + $0x18] sm:$0xff]   ;;  %v9285_v18 = vld [vmem:[#allocation33 + $0x20] sm:$0xff]   ;;  %v9287_v35 = vld [vmem:[#allocation33 + $0x68] sm:$0xff]  }
 0x757   :  { %8847 = vmatpush3.bf16.msra.mxu1 %v10973_v19  ;;  %v4247_v42 = vsel %vm729_vm0, %v4241_v24, %v4246_v14  ;;  %v4250_v43 = vor.u32 %v4248_v23, %v4246_v14  ;;  %v4275_v17 = vor.u32 %v4274_v62, %v4271_v40  ;;  %v4307_v59 = vrot.slane %v4287_v27, 7  ;;  %8504 = vmatpush3.bf16.msra.mxu0 %v9273_v58  ;;  %v9279_v24 = vld [vmem:[#allocation33 + $0x10] sm:$0xff]   ;;  %v9288_v26 = vld [vmem:[#allocation33 + $0x28] sm:$0xff]   ;;  %v9292_v23 = vld [vmem:[#allocation33 + $0xb8] sm:$0xff]  }
 0x758   :  { %8848 = vmatprep.subr.bf16.mxu1 %v9264_v11  ;;  %v4312_v44 = vrot.slane %v4247_v42, 7  ;;  %8505 = vmatprep.subr.bf16.mxu0 %v9275_v10  ;;  %v9289_v60 = vld [vmem:[#allocation33 + $0xb0] sm:$0xff]   ;;  %v9293_v39 = vld [vmem:[#allocation33 + $0x78] sm:$0xff]  }
 0x759   :  { %v4313_v45 = vrot.slane %v4250_v43, 7  ;;  %v4280_v6 = vsel %vm1918_vm7, %v4275_v17, %v4279_v41  ;;  %v4317_v52 = vrot.slane %v4275_v17, 7  ;;  %v4308_v53 = vsel %vm1959_vm8, %v4306_v28, %v4307_v59  ;;  %v9291_v30 = vld [vmem:[#allocation33 + $0x30] sm:$0xff]   ;;  %v9294_v32 = vld [vmem:[#allocation33 + $0x38] sm:$0xff]  }
 0x75a   :  { %v4220_v51 = vld [vmem:[#allocation2 + $0x20] sm:$0x7f]  ;;  %v4318_v50 = vrot.slane %v4280_v6, 7 }
 0x75b   :  { %8849 = vmatpush3.bf16.msra.mxu1 %v9264_v11  ;;  %v4314_v19 = vsel %vm1959_vm8, %v4312_v44, %v4313_v45  ;;  %v4310_v54 = vrot.slane %v4220_v51, 7  ;;  %v4228_v56 = vld [vmem:[#allocation2 + $0x20] sm:$0xfe]  ;;  %v9290_v11 = vld [vmem:[#allocation33 + $0x70] sm:$0xff]  }
 0x75c   :  { %4693 = vmatprep.mubr.bf16.mxu1 %v4314_v19  ;;  %8850 = vmatprep.subr.bf16.mxu1 %v9265_v20  ;;  %v4319_v48 = vsel %vm1959_vm8, %v4317_v52, %v4318_v50  ;;  %v4288_v47 = vrot.slane %v4228_v56, 2 }
 0x75d   :  { %v4311_v22 = vsel %vm1959_vm8, %v4309_v46, %v4310_v54  ;;  %4742 = vmatprep.mubr.bf16.mxu0 %v4319_v48 }
 0x75e   :  { %4694 = vmatmul.mubr.bf16.gmra.mrb[52].mxu1 %v4311_v22  ;;  %4743 = vmatmul.mubr.bf16.gmra.mrb[60].mxu0 %v4214_v12  ;;  %v4290_v1 = vsel %vm791_vm3, %v4288_v47, %v4289_v63  ;;  %v4320_v3 = vrot.slane %v4288_v47, 7  ;;  %v9276_v12 = vld [vmem:[#allocation33 + $0x8] sm:$0xff]   ;;  %v7916_v63 = vld [vmem:[#allocation30] ss:$0 sm:$0xff] }
 0x75f   :  { %8851 = vmatpush3.bf16.msra.mxu1 %v9265_v20  ;;  %8862 = vmatprep.mubr.bf16.mxu1 %v4308_v53  ;;  %v4321_v4 = vrot.slane %v4290_v1, 7  ;;  %v7917_v1 = vld [vmem:[#allocation32] ss:$0 sm:$0xff] }
 0x760   :  { %8852 = vmatprep.subr.bf16.mxu1 %v9266_v25  ;;  %8506 = vmatpush3.bf16.msra.mxu0 %v9276_v12 }
 0x761   :  { %v4322_v5 = vsel %vm1959_vm8, %v4320_v3, %v4321_v4  ;;  %8507 = vmatprep.subr.bf16.mxu0 %v9278_v16 }
 0x763   :  { %8853 = vmatpush3.bf16.msra.mxu1 %v9266_v25 }
 0x764   :  { %8854 = vmatprep.subr.bf16.mxu1 %v9267_v55  ;;  %8508 = vmatpush3.bf16.msra.mxu0 %v9279_v24 }
 0x765   :  { %8509 = vmatprep.subr.bf16.mxu0 %v9281_v49  ;;  %v4837_v49 = vld [vmem:[#allocation2 + $0x28] sm:$0x1] }
 0x767   :  { %8855 = vmatpush3.bf16.msra.mxu1 %v9267_v55 }
 0x768   :  { %8856 = vmatprep.subr.bf16.mxu1 %v9268_v13  ;;  %8510 = vmatpush3.bf16.msra.mxu0 %v9282_v31 }
 0x769   :  { %8511 = vmatprep.subr.bf16.mxu0 %v9284_v33  ;;  %v4835_v33 = vld [vmem:[#allocation2 + $0x10] sm:$0x1] }
 0x76b   :  { %8857 = vmatpush3.bf16.msra.mxu1 %v9268_v13 }
 0x76c   :  { %8858 = vmatprep.subr.bf16.mxu1 %v9269_v57  ;;  %8512 = vmatpush3.bf16.msra.mxu0 %v9285_v18 }
 0x76d   :  { %8513 = vmatprep.subr.bf16.mxu0 %v9287_v35 }
 0x76f   :  { %8859 = vmatpush3.bf16.msra.mxu1 %v9269_v57 }
 0x770   :  { %8860 = vmatprep.subr.bf16.mxu1 %v9270_v21  ;;  %8514 = vmatpush3.bf16.msra.mxu0 %v9288_v26 }
 0x771   :  { %8515 = vmatprep.subr.bf16.mxu0 %v9290_v11  ;;  %v4857_v11 = vrot.slane %v4835_v33, 1  ;;  %v9296_v33 = vld [vmem:[#allocation41 + $0x40] sm:$0xff]  }
 0x773   :  { %8861 = vmatpush3.bf16.msra.mxu1 %v9270_v21 }
 0x774   :  { %8866 = vmatprep.subr.bf16.mxu1 %v9271_v7  ;;  %8516 = vmatpush3.bf16.msra.mxu0 %v9291_v30 }
 0x775   :  { %8517 = vmatprep.subr.bf16.mxu0 %v9293_v39 }
 0x776   :  { %8863 = vmatmul.mubr.bf16.vlgmr.msra.gmra.mrb[56].mxu1 %v4322_v5 }
 0x777   :  { %8867 = vmatpush3.bf16.msra.mxu1 %v9271_v7 }
 0x778   :  { %8868 = vmatprep.subr.bf16.mxu1 %v9274_v9  ;;  %8518 = vmatpush3.bf16.msra.mxu0 %v9294_v32 }
 0x779   :  { %8541 = vmatprep.subr.bf16.mxu0 %v9296_v33 }
 0x77b   :  { %8869 = vmatpush3.bf16.msra.mxu1 %v9274_v9 }
 0x77c   :  { %8870 = vmatprep.subr.bf16.mxu1 %v9277_v15 }
 0x77f   :  { %8871 = vmatpush3.bf16.msra.mxu1 %v9277_v15 }
 0x780   :  { %8872 = vmatprep.subr.bf16.mxu1 %v9280_v36 }
 0x783   :  { %8873 = vmatpush3.bf16.msra.mxu1 %v9280_v36 }
 0x784   :  { %8874 = vmatprep.subr.bf16.mxu1 %v9283_v29 }
 0x787   :  { %8875 = vmatpush3.bf16.msra.mxu1 %v9283_v29 }
 0x788   :  { %8876 = vmatprep.subr.bf16.mxu1 %v9286_v34 }
 0x78b   :  { %8877 = vmatpush3.bf16.msra.mxu1 %v9286_v34 }
 0x78c   :  { %8878 = vmatprep.subr.bf16.mxu1 %v9289_v60 }
 0x78f   :  { %8879 = vmatpush3.bf16.msra.mxu1 %v9289_v60  ;;  %v4860_v60 = vrot.slane %v4837_v49, 1 }
 0x790   :  { %8880 = vmatprep.subr.bf16.mxu1 %v9292_v23 }
 0x793   :  { %8881 = vmatpush3.bf16.msra.mxu1 %v9292_v23 }
 0x829   :  { %v8453_v37 = vpop.f32.mrb[48].mxu1  ;;  %v8481_v62 = vpop.f32.mrb[56].mxu0 }
 0x82a   :  { %v8454_v14 = vpop.f32.mrb[49].mxu1  ;;  %v8482_v42 = vpop.f32.mrb[57].mxu0 }
 0x82b   :  { %v8455_v40 = vadd.f32 %v8454_v14, %v8453_v37  ;;  %v8456_v41 = vpop.f32.mrb[50].mxu1  ;;  %v8483_v43 = vadd.f32 %v8482_v42, %v8481_v62  ;;  %v8484_v20 = vpop.f32.mrb[58].mxu0 }
 0x82c   :  { %v8457_v44 = vpop.f32.mrb[51].mxu1  ;;  %v8485_v27 = vpop.f32.mrb[59].mxu0 }
 0x82d   :  { %v8458_v17 = vadd.f32 %v8457_v44, %v8456_v41  ;;  %v8486_v45 = vadd.f32 %v8485_v27, %v8484_v20  ;;  %v4737_v46 = vadd.f32 %v8483_v43, %v8455_v40 }
 0x82f   :  { %v4740_v51 = vadd.f32 %v8486_v45, %v8458_v17  ;;  %v4830_v17 = vld [vmem:[#allocation2] sm:$0x80] }
 0x831   :  { %v8459_v6 = vpop.f32.mrb[52].mxu1  ;;  %v8487_v28 = vpop.f32.mrb[60].mxu0 }
 0x832   :  { %v8460_v52 = vpop.f32.mrb[53].mxu1  ;;  %v8488_v50 = vpop.f32.mrb[61].mxu0 }
 0x833   :  { %v8461_v19 = vadd.f32 %v8460_v52, %v8459_v6  ;;  %v8462_v54 = vpop.f32.mrb[54].mxu1  ;;  %v8489_v59 = vadd.f32 %v8488_v50, %v8487_v28  ;;  %v8490_v22 = vpop.f32.mrb[62].mxu0 }
 0x834   :  { %v8463_v25 = vpop.f32.mrb[55].mxu1  ;;  %v8491_v53 = vpop.f32.mrb[63].mxu0 }
 0x835   :  { %v8464_v48 = vadd.f32 %v8463_v25, %v8462_v54  ;;  %v8492_v55 = vadd.f32 %v8491_v53, %v8490_v22  ;;  %v4745_v13 = vadd.f32 %v8489_v59, %v8461_v19  ;;  %v4863_v54 = vshrl.u32 %v4830_v17, 16  ;;  %v9316_v17 = vld [vmem:[#allocation41 + $0x68] sm:$0xff]  }
 0x837   :  { %v4748_v56 = vadd.f32 %v8492_v55, %v8464_v48 }
 0x849   :  { %v8864_v57 = vpop.f32.mrb[56].mxu1 }
 0x84a   :  { %v4794_v47 = vadd.f32 %v8864_v57, %v4745_v13  ;;  %v4785_v21 = vpop.f32.mrb[57].mxu1 }
 0x84b   :  { %v4786_v3 = vadd.f32 %v4785_v21, %v4737_v46  ;;  %v8865_v4 = vpop.f32.mrb[58].mxu1 }
 0x84c   :  { %v4809_v5 = vmul.f32 %v7916_v63, %v4794_v47  ;;  %v4797_v7 = vadd.f32 %v8865_v4, %v4748_v56  ;;  %v4788_v8 = vpop.f32.mrb[59].mxu1 }
 0x84d   :  { %v4807_v58 = vmul.f32 %v7916_v63, %v4786_v3  ;;  %v4789_v9 = vadd.f32 %v4788_v8, %v4740_v51  ;;  %v4865_v3 = vrot.slane %v4863_v54, 7  ;;  %v9325_v54 = vld [vmem:[#allocation41 + $0xb8] sm:$0xff]  }
 0x84e   :  { %v4820_v10 = vadd.f32 %v7917_v1, %v4809_v5  ;;  %v4810_v15 = vmul.f32 %v7916_v63, %v4797_v7 }
 0x84f   :  { %v4818_v12 = vadd.f32 %v7917_v1, %v4807_v58  ;;  %v4808_v16 = vmul.f32 %v7916_v63, %v4789_v9  ;;  %v4832_v58 = vld [vmem:[#allocation2 + $0x18] sm:$0x80] }
 0x850   :  { %v4821_v36 = vadd.f32 %v7917_v1, %v4810_v15  ;;  %v4824_v29 = vmax.f32 %v4820_v10, 0.0 }
 0x851   :  { %v4819_v24 = vadd.f32 %v7917_v1, %v4808_v16  ;;  %v4822_v34 = vmax.f32 %v4818_v12, 0.0  ;;  %v4894_v12 = vshrl.u32 %v4832_v58, 16 }
 0x852   :  { %v4825_v31 = vmax.f32 %v4821_v36, 0.0 }
 0x853   :  { %v4823_v18 = vmax.f32 %v4819_v24, 0.0  ;;  %v4896_v24 = vrot.slane %v4894_v12, 7 }
 0x854   :  { %v4827_v35 = vpack.c.bf16 %v4825_v31, %v4824_v29  ;;  %v9295_v31 = vld [vmem:[#allocation41 + $0xc0] sm:$0xff]  }
 0x855   :  { %v4826_v26 = vpack.c.bf16 %v4823_v18, %v4822_v34  ;;  %v9297_v34 = vld [vmem:[#allocation41 + $0x80] sm:$0xff]   ;;  %8569 = vmatprep.subr.bf16.mxu1 %v9295_v31 }
 0x856   :  { %v4859_v23 = vrot.slane %v4827_v35, 1  ;;  %v4846_v30 = vshll.u32 %v4827_v35, 16  ;;  %v4849_v42 = vshrl.u32 %v4827_v35, 16  ;;  %v9298_v18 = vld [vmem:[#allocation41] sm:$0xff]   ;;  %v9299_v35 = vld [vmem:[#allocation41 + $0xc8] sm:$0xff]  }
 0x857   :  { %v4856_v39 = vrot.slane %v4826_v26, 1  ;;  %v4839_v32 = vshll.u32 %v4826_v26, 16  ;;  %v4842_v41 = vshrl.u32 %v4826_v26, 16  ;;  %v9301_v26 = vld [vmem:[#allocation41 + $0x88] sm:$0xff]  }
 0x858   :  { %v4861_v37 = vsel %vm764_vm2, %v4859_v23, %v4860_v60  ;;  %v4848_v14 = vrot.slane %v4846_v30, 1  ;;  %v4913_v27 = vshrl.u32 %v4859_v23, 16  ;;  %v4897_v16 = vrot.slane %v4849_v42, 7  ;;  %v9300_v60 = vld [vmem:[#allocation41 + $0x48] sm:$0xff]   ;;  %v9303_v23 = vld [vmem:[#allocation41 + $0xd0] sm:$0xff]  }
 0x859   :  { %v4858_v62 = vsel %vm764_vm2, %v4856_v39, %v4857_v11  ;;  %v4917_v40 = vshrl.u32 %v4861_v37, 16  ;;  %v4882_v43 = vshrl.u32 %v4856_v39, 16  ;;  %v4841_v20 = vrot.slane %v4839_v32, 1  ;;  %v9302_v11 = vld [vmem:[#allocation41 + $0x8] sm:$0xff]   ;;  %v9304_v39 = vld [vmem:[#allocation41 + $0x50] sm:$0xff]  }
 0x85a   :  { %v4886_v44 = vshrl.u32 %v4858_v62, 16  ;;  %v4920_v46 = vshll.u32 %v4861_v37, 16  ;;  %v4851_v51 = vor.u32 %v4849_v42, %v4848_v14  ;;  %v4889_v52 = vshll.u32 %v4858_v62, 16  ;;  %v9307_v37 = vld [vmem:[#allocation41 + $0xd8] sm:$0xff]   ;;  %v9312_v42 = vld [vmem:[#allocation41 + $0x60] sm:$0xff]  }
 0x85b   :  { %v4919_v45 = vrot.slane %v4917_v40, 7  ;;  %v4844_v28 = vor.u32 %v4842_v41, %v4841_v20  ;;  %v4866_v50 = vrot.slane %v4842_v41, 7  ;;  %v4884_v25 = vrot.slane %v4882_v43, 7  ;;  %v9309_v62 = vld [vmem:[#allocation41 + $0x98] sm:$0xff]   ;;  %v9311_v41 = vld [vmem:[#allocation41 + $0xe0] sm:$0xff]  }
 0x85c   :  { %v4888_v6 = vrot.slane %v4886_v44, 7  ;;  %v4905_v59 = vshrl.u32 %v4851_v51, 16  ;;  %v4870_v48 = vshrl.u32 %v4841_v20, 16  ;;  %v4915_v55 = vrot.slane %v4913_v27, 7  ;;  %v9310_v40 = vld [vmem:[#allocation41 + $0x18] sm:$0xff]   ;;  %v9313_v43 = vld [vmem:[#allocation41 + $0xa0] sm:$0xff]  }
 0x85d   :  { %v4922_v19 = vor.u32 %v4920_v46, %v4919_v45  ;;  %v4874_v53 = vshrl.u32 %v4844_v28, 16  ;;  %v4901_v13 = vshrl.u32 %v4848_v14, 16  ;;  %v4877_v47 = vshll.u32 %v4844_v28, 16  ;;  %v9308_v14 = vld [vmem:[#allocation41 + $0x58] sm:$0xff]   ;;  %v9314_v44 = vld [vmem:[#allocation41 + $0x20] sm:$0xff]   ;;  %v9315_v20 = vld [vmem:[#allocation41 + $0xe8] sm:$0xff]  }
 0x85e   :  { %v4891_v22 = vor.u32 %v4889_v52, %v4888_v6  ;;  %v4907_v56 = vrot.slane %v4905_v59, 7  ;;  %v4908_v21 = vshll.u32 %v4851_v51, 16  ;;  %v4867_v4 = vor.u32 %v4866_v50, %v4839_v32  ;;  %v9306_v32 = vld [vmem:[#allocation41 + $0x10] sm:$0xff]   ;;  %v9317_v27 = vld [vmem:[#allocation41 + $0xa8] sm:$0xff]   ;;  %v9323_v28 = vld [vmem:[#allocation41 + $0xf8] sm:$0xff]  }
 0x85f   :  { %v4876_v63 = vrot.slane %v4874_v53, 7  ;;  %v4923_v1 = vsel %vm2527_vm9, %v4915_v55, %v4922_v19  ;;  %v4872_v5 = vrot.slane %v4870_v48, 7  ;;  %v4903_v10 = vrot.slane %v4901_v13, 7  ;;  %v9318_v45 = vld [vmem:[#allocation41 + $0x28] sm:$0xff]   ;;  %v9319_v46 = vld [vmem:[#allocation41 + $0xf0] sm:$0xff]   ;;  %v9324_v19 = vld [vmem:[#allocation41 + $0x78] sm:$0xff]  }
 0x860   :  { %v4892_v57 = vsel %vm2527_vm9, %v4884_v25, %v4891_v22  ;;  %v4910_v8 = vor.u32 %v4908_v21, %v4907_v56  ;;  %v4868_v15 = vsel %vm2527_vm9, %v4865_v3, %v4867_v4  ;;  %v4898_v49 = vor.u32 %v4897_v16, %v4846_v30  ;;  %v9305_v30 = vld [vmem:[#allocation41 + $0x90] sm:$0xff]   ;;  %v9326_v50 = vld [vmem:[#allocation41 + $0x38] sm:$0xff]   ;;  %v9327_v59 = vld [vmem:[#allocation41 + $0x1c0] sm:$0xff]  }
 0x861   :  { %8882 = vmatprep.mubr.bf16.mxu1 %v4892_v57  ;;  %v4879_v7 = vor.u32 %v4877_v47, %v4876_v63  ;;  %v9320_v51 = vld [vmem:[#allocation41 + $0x70] sm:$0xff]   ;;  %v9328_v25 = vld [vmem:[#allocation41 + $0x140] sm:$0xff]   ;;  %v7806_v55 = vld [vmem:[#allocation38] ss:$0 sm:$0xff] }
 0x862   :  { %8883 = vmatmul.mubr.bf16.vlgmr.msra.gmra.mrb[60].mxu1 %v4923_v1  ;;  %v4911_v36 = vsel %vm2527_vm9, %v4903_v10, %v4910_v8  ;;  %v4899_v29 = vsel %vm2527_vm9, %v4896_v24, %v4898_v49  ;;  %v9321_v6 = vld [vmem:[#allocation41 + $0xb0] sm:$0xff]   ;;  %v5254_v53 = vld [vmem:[#allocation2] sm:$0xc0]  ;;  %v3044_v3 = vmul.f32 %v10976_v38, %v7806_v55  ;;  %v3042_v4 = vmul.f32 %v7806_v55, %v10978_v61  ;;  %v7807_v8 = vld [vmem:[#allocation39] ss:$0 sm:$0xff] }
 0x863   :  { %v4880_v9 = vsel %vm2527_vm9, %v4872_v5, %v4879_v7  ;;  %8570 = vmatpush3.bf16.msra.mxu1 %v9297_v34  ;;  %v9322_v52 = vld [vmem:[#allocation41 + $0x30] sm:$0xff]   ;;  %v11015_v56 = vld [vmem:[#allocation2] sm:$0x80]  ;;  %v5417_v21 = vshrl.u32 %v5254_v53, 16  ;;  %v5420_v1 = vshll.u32 %v5254_v53, 16  ;;  %v3045_v5 = vmul.f32 %v10980_v0, %v7806_v55 }
 0x864   :  { %5154 = vmatprep.mubr.bf16.mxu0 %v4880_v9  ;;  %8571 = vmatprep.subr.bf16.mxu1 %v9299_v35  ;;  %v5275_v63 = vshll.u32 %v11015_v56, 16  ;;  %v3043_v58 = vmul.f32 %v7806_v55, %v10982_v2  ;;  %v5273_v16 = vshrl.u32 %v11015_v56, 16  ;;  %v5256_v61 = vld [vmem:[#allocation2 + $0x18] sm:$0xc0]  ;;  %v11029_v0 = vld [vmem:[#allocation2 + $0x10] sm:$0x3]  ;;  %v11031_v31 = vadd.f32 %v7807_v8, %v3044_v3 }
 0x865   :  { %5155 = vmatmul.mubr.bf16.vlgmr.msra.gmra.mrb[64].mxu0 %v4868_v15  ;;  %v11022_v15 = vld [vmem:[#allocation35] ss:$0 sm:$0xff]  ;;  %v11027_v38 = vrot.slane %v5420_v1, 7  ;;  %v3053_v2 = vadd.f32 %v7807_v8, %v3042_v4  ;;  %v11033_v33 = vadd.f32 %v7807_v8, %v3045_v5  ;;  %v7943_v34 = vld [vmem:[#allocation36] ss:$0 sm:$0xff] }
 0x866   :  { %5162 = vmatprep.mubr.bf16.mxu0 %v4911_v36  ;;  %8542 = vmatpush3.bf16.msra.mxu0 %v9298_v18  ;;  %v5277_v36 = vrot.slane %v5275_v63, 1  ;;  %v3054_v18 = vadd.f32 %v7807_v8, %v3043_v58  ;;  %v11072_v8 = vld [vmem:[#allocation2 + $0x28] sm:$0x1] }
 0x867   :  { %8543 = vmatprep.subr.bf16.mxu0 %v9300_v60  ;;  %8572 = vmatpush3.bf16.msra.mxu1 %v9301_v26  ;;  %v5306_v26 = vrot.slane %v11015_v56, 1 }
 0x868   :  { %8573 = vmatprep.subr.bf16.mxu1 %v9303_v23 }
 0x86a   :  { %8544 = vmatpush3.bf16.msra.mxu0 %v9302_v11  ;;  %v11037_v11 = vld [vmem:[#allocation2 + $0x18] sm:$0x80] }
 0x86b   :  { %8545 = vmatprep.subr.bf16.mxu0 %v9304_v39  ;;  %8574 = vmatpush3.bf16.msra.mxu1 %v9305_v30  ;;  %v5290_v23 = vshll.u32 %v11037_v11, 16  ;;  %v5540_v39 = vshrl.u32 %v5256_v61, 16  ;;  %v5543_v30 = vshll.u32 %v5256_v61, 16  ;;  %v5377_v61 = vrot.slane %v11029_v0, 3 }
 0x86c   :  { %8575 = vmatprep.subr.bf16.mxu1 %v9307_v37 }
 0x86d   :  { %5163 = vmatmul.mubr.bf16.gmra.mrb[68].mxu0 %v4899_v29  ;;  %v11025_v29 = vrot.slane %v5417_v21, 6 }
 0x86e   :  { %8546 = vmatpush3.bf16.msra.mxu0 %v9306_v32  ;;  %v5391_v32 = vshrl.u32 %v11029_v0, 16 }
 0x86f   :  { %8547 = vmatprep.subr.bf16.mxu0 %v9308_v14  ;;  %8576 = vmatpush3.bf16.msra.mxu1 %v9309_v62 }
 0x870   :  { %8577 = vmatprep.subr.bf16.mxu1 %v9311_v41  ;;  %v5423_v41 = vor.u32 %v11027_v38, %v11025_v29 }
 0x872   :  { %8548 = vmatpush3.bf16.msra.mxu0 %v9310_v40  ;;  %v11042_v40 = vor.u32 %v5277_v36, %v5273_v16 }
 0x873   :  { %8549 = vmatprep.subr.bf16.mxu0 %v9312_v42  ;;  %8578 = vmatpush3.bf16.msra.mxu1 %v9313_v43  ;;  %v11046_v42 = vld [vmem:[#allocation2 + $0x10] sm:$0x1] }
 0x874   :  { %8579 = vmatprep.subr.bf16.mxu1 %v9315_v20  ;;  %v5394_v20 = vshll.u32 %v11029_v0, 16 }
 0x876   :  { %8550 = vmatpush3.bf16.msra.mxu0 %v9314_v44  ;;  %v5288_v44 = vshrl.u32 %v11037_v11, 16  ;;  %v11062_v63 = vrot.slane %v5394_v20, 4 }
 0x877   :  { %8551 = vmatprep.subr.bf16.mxu0 %v9316_v17  ;;  %8580 = vmatpush3.bf16.msra.mxu1 %v9317_v27  ;;  %v5347_v17 = vshrl.u32 %v11046_v42, 16  ;;  %v5350_v27 = vshll.u32 %v11046_v42, 16 }
 0x878   :  { %8581 = vmatprep.subr.bf16.mxu1 %v9319_v46 }
 0x879   :  { %v11066_v21 = vrot.slane %v5350_v27, 3 }
 0x87a   :  { %8552 = vmatpush3.bf16.msra.mxu0 %v9318_v45 }
 0x87b   :  { %8553 = vmatprep.subr.bf16.mxu0 %v9320_v51  ;;  %8582 = vmatpush3.bf16.msra.mxu1 %v9321_v6 }
 0x87c   :  { %8583 = vmatprep.subr.bf16.mxu1 %v9323_v28  ;;  %v11053_v28 = vld [vmem:[#allocation2 + $0x28] sm:$0x3] }
 0x87d   :  { %v5408_v1 = vshrl.u32 %v11053_v28, 16 }
 0x87e   :  { %8554 = vmatpush3.bf16.msra.mxu0 %v9322_v52  ;;  %v5309_v52 = vrot.slane %v11037_v11, 1 }
 0x87f   :  { %8555 = vmatprep.subr.bf16.mxu0 %v9324_v19  ;;  %8584 = vmatpush3.bf16.msra.mxu1 %v9325_v54  ;;  %v5292_v54 = vrot.slane %v5290_v23, 1 }
 0x880   :  { %8625 = vmatprep.subr.bf16.mxu1 %v9327_v59  ;;  %v11057_v59 = vrot.slane %v5543_v30, 7 }
 0x881   :  { %v11074_v58 = vor.u32 %v5292_v54, %v5288_v44 }
 0x882   :  { %8556 = vmatpush3.bf16.msra.mxu0 %v9326_v50  ;;  %v11055_v50 = vrot.slane %v5540_v39, 6 }
 0x883   :  { %8597 = vmatprep.subr.bf16.mxu0 %v9328_v25  ;;  %v11059_v25 = vrot.slane %v5391_v32, 3 }
 0x935   :  { %v11011_v22 = vpop.f32.mrb[60].mxu1 }
 0x936   :  { %v5205_v48 = vpop.f32.mrb[61].mxu1 }
 0x937   :  { %v11013_v13 = vpop.f32.mrb[62].mxu1 }
 0x938   :  { %v5208_v57 = vpop.f32.mrb[63].mxu1  ;;  %v8519_v47 = vpop.f32.mrb[64].mxu0 }
 0x939   :  { %v8520_v7 = vpop.f32.mrb[65].mxu0 }
 0x93a   :  { %v8521_v9 = vadd.f32 %v8520_v7, %v8519_v47  ;;  %v8522_v10 = vpop.f32.mrb[66].mxu0  ;;  %v11064_v47 = vrot.slane %v5347_v17, 2  ;;  %v5333_v7 = vrot.slane %v11046_v42, 2 }
 0x93b   :  { %v8523_v12 = vpop.f32.mrb[67].mxu0 }
 0x93c   :  { %v5206_v24 = vadd.f32 %v8521_v9, %v5205_v48  ;;  %v8524_v49 = vadd.f32 %v8523_v12, %v8522_v10  ;;  %v5364_v9 = vshrl.u32 %v11072_v8, 16  ;;  %v5367_v10 = vshll.u32 %v11072_v8, 16 }
 0x93e   :  { %v5227_v35 = vmul.f32 %v11022_v15, %v5206_v24  ;;  %v5209_v60 = vadd.f32 %v8524_v49, %v5208_v57  ;;  %v5546_v24 = vor.u32 %v11057_v59, %v11055_v50  ;;  %v5353_v49 = vor.u32 %v11066_v21, %v11064_v47 }
 0x93f   :  { %v11091_v30 = vrot.slane %v5364_v9, 2  ;;  %v11093_v32 = vrot.slane %v5367_v10, 3 }
 0x940   :  { %v5238_v37 = vadd.f32 %v7943_v34, %v5227_v35  ;;  %v5228_v14 = vmul.f32 %v11022_v15, %v5209_v60  ;;  %v8525_v62 = vpop.f32.mrb[68].mxu0 }
 0x941   :  { %v8526_v43 = vpop.f32.mrb[69].mxu0 }
 0x942   :  { %v5242_v45 = vmax.f32 %v5238_v37, 0.0  ;;  %v5239_v46 = vadd.f32 %v7943_v34, %v5228_v14  ;;  %v8527_v51 = vadd.f32 %v8526_v43, %v8525_v62  ;;  %v8528_v6 = vpop.f32.mrb[70].mxu0 }
 0x943   :  { %v8529_v19 = vpop.f32.mrb[71].mxu0 }
 0x944   :  { %v5246_v48 = vadd.f32 %v5242_v45, %v3053_v2  ;;  %v5243_v53 = vmax.f32 %v5239_v46, 0.0  ;;  %v5214_v55 = vadd.f32 %v11011_v22, %v8527_v51  ;;  %v8530_v57 = vadd.f32 %v8529_v19, %v8528_v6 }
 0x945   :  { %v5411_v22 = vshll.u32 %v11053_v28, 16  ;;  %v11087_v2 = vrot.slane %v5408_v1, 3  ;;  %v5380_v19 = vrot.slane %v11053_v28, 3  ;;  %v5370_v1 = vor.u32 %v11093_v32, %v11091_v30 }
 0x946   :  { %v5247_v3 = vadd.f32 %v5243_v53, %v3054_v18  ;;  %v5229_v4 = vmul.f32 %v11022_v15, %v5214_v55  ;;  %v5217_v5 = vadd.f32 %v11013_v13, %v8530_v57  ;;  %v5397_v13 = vor.u32 %v11062_v63, %v11059_v25 }
 0x948   :  { %v5250_v12 = vpack.c.bf16 %v5247_v3, %v5246_v48  ;;  %v5240_v16 = vadd.f32 %v7943_v34, %v5229_v4  ;;  %v5230_v36 = vmul.f32 %v11022_v15, %v5217_v5  ;;  %v11089_v15 = vrot.slane %v5411_v22, 4 }
 0x94a   :  { %5252 = vst [vmem:[#allocation2 + $0x8] sm:$0xff] %v5250_v12  ;;  %v5244_v18 = vmax.f32 %v5240_v16, 0.0  ;;  %v5241_v35 = vadd.f32 %v7943_v34, %v5230_v36  ;;  %v5313_v60 = vshrl.u32 %v5250_v12, 16  ;;  %v5316_v23 = vshll.u32 %v5250_v12, 16 }
 0x94b   :  { %v5307_v39 = vrot.slane %v5250_v12, 1  ;;  %v11099_v20 = vrot.slane %v5250_v12, 2 }
 0x94c   :  { %v5248_v37 = vadd.f32 %v5244_v18, %v11031_v31  ;;  %v5245_v14 = vmax.f32 %v5241_v35, 0.0  ;;  %v5315_v62 = vrot.slane %v5313_v60, 1  ;;  %v5318_v42 = vrot.slane %v5316_v23, 2  ;;  %v9329_v18 = vld [vmem:[#allocation41 + $0x180] sm:$0xff]   ;;  %v9331_v23 = vld [vmem:[#allocation41 + $0x1c8] sm:$0xff]  }
 0x94d   :  { %v5308_v43 = vsel %vm764_vm2, %v5306_v26, %v5307_v39  ;;  %v5454_v44 = vshrl.u32 %v5307_v39, 16  ;;  %v5457_v34 = vshll.u32 %v5307_v39, 16  ;;  %v5414_v31 = vor.u32 %v11089_v15, %v11087_v2 }
 0x94e   :  { %v5249_v17 = vadd.f32 %v5245_v14, %v11033_v33  ;;  %v5319_v27 = vor.u32 %v5318_v42, %v5315_v62  ;;  %v5446_v45 = vshrl.u32 %v5308_v43, 16  ;;  %v5449_v46 = vshll.u32 %v5308_v43, 16 }
 0x94f   :  { %v5456_v51 = vrot.slane %v5454_v44, 6  ;;  %v5459_v6 = vrot.slane %v5457_v34, 7  ;;  %v11109_v33 = vsel %vm791_vm3, %v11099_v20, %v5333_v7  ;;  %v5472_v62 = vshrl.u32 %v11099_v20, 16 }
 0x950   :  { %v11105_v54 = vpack.c.bf16 %v5249_v17, %v5248_v37  ;;  %v5463_v56 = vshrl.u32 %v5319_v27, 16  ;;  %v5466_v26 = vshll.u32 %v5319_v27, 16  ;;  %v5448_v48 = vrot.slane %v5446_v45, 6 }
 0x951   :  { %v5255_v53 = vld [vmem:[#allocation2 + $0x8] sm:$0x7f]  ;;  %v5451_v55 = vrot.slane %v5449_v46, 7  ;;  %v5460_v57 = vor.u32 %v5459_v6, %v5456_v51 }
 0x952   :  { %5253 = vst [vmem:[#allocation2 + $0x20] sm:$0xff] %v11105_v54  ;;  %v5465_v3 = vrot.slane %v5463_v56, 6  ;;  %v5468_v4 = vrot.slane %v5466_v26, 7  ;;  %v5280_v5 = vshll.u32 %v5255_v53, 16  ;;  %v5284_v22 = vshrl.u32 %v5255_v53, 16  ;;  %v9335_v56 = vld [vmem:[#allocation41 + $0x1d0] sm:$0xff]  }
 0x953   :  { %v5452_v9 = vor.u32 %v5451_v55, %v5448_v48  ;;  %v5321_v10 = vshrl.u32 %v11105_v54, 16  ;;  %v5324_v12 = vshll.u32 %v11105_v54, 16  ;;  %v11117_v16 = vrot.slane %v11105_v54, 1 }
 0x954   :  { %v5469_v36 = vor.u32 %v5468_v4, %v5465_v3  ;;  %v5282_v7 = vrot.slane %v5280_v5, 1  ;;  %v5424_v35 = vrot.slane %v5284_v22, 6  ;;  %v5425_v60 = vrot.slane %v5280_v5, 7 }
 0x955   :  { %v5323_v39 = vrot.slane %v5321_v10, 1  ;;  %v5326_v37 = vrot.slane %v5324_v12, 2  ;;  %v5311_v14 = vsel %vm764_vm2, %v5309_v52, %v11117_v16  ;;  %v5461_v44 = vsel %vm879_vm1, %v5452_v9, %v5460_v57  ;;  %v9333_v52 = vld [vmem:[#allocation41 + $0x188] sm:$0xff]  }
 0x956   :  { %6271 = vmatprep.mubr.bf16.mxu1 %v5469_v36  ;;  %v5283_v42 = vsel %vm729_vm0, %v11042_v40, %v5282_v7  ;;  %v5286_v43 = vor.u32 %v5284_v22, %v5282_v7  ;;  %v5569_v34 = vshrl.u32 %v5311_v14, 16  ;;  %v5572_v46 = vshll.u32 %v5311_v14, 16 }
 0x957   :  { %v5429_v17 = vshrl.u32 %v5283_v42, 16  ;;  %v5432_v27 = vshll.u32 %v5283_v42, 16  ;;  %6272 = vmatmul.mubr.bf16.vlgmr.msra.gmra.mrb[64].mxu1 %v5461_v44  ;;  %v5327_v45 = vor.u32 %v5326_v37, %v5323_v39  ;;  %v5426_v11 = vor.u32 %v5425_v60, %v5424_v35  ;;  %v9337_v39 = vld [vmem:[#allocation41 + $0x190] sm:$0xff]   ;;  %v9330_v37 = vld [vmem:[#allocation41 + $0x100] sm:$0xff]   ;;  %v5270_v44 = vld [vmem:[#allocation2 + $0x8] sm:$0xfc] }
 0x958   :  { %v5437_v51 = vshrl.u32 %v5286_v43, 16  ;;  %v5440_v6 = vshll.u32 %v5286_v43, 16  ;;  %8626 = vmatpush3.bf16.msra.mxu1 %v9329_v18  ;;  %v11127_v26 = vrot.slane %v5569_v34, 6  ;;  %v5574_v36 = vrot.slane %v5572_v46, 7  ;;  %v9339_v34 = vld [vmem:[#allocation41 + $0x1d8] sm:$0xff]  }
 0x959   :  { %v5431_v48 = vrot.slane %v5429_v17, 6  ;;  %v5434_v53 = vrot.slane %v5432_v27, 7  ;;  %8627 = vmatprep.subr.bf16.mxu1 %v9331_v23  ;;  %v5586_v40 = vshrl.u32 %v5327_v45, 16  ;;  %v5589_v55 = vshll.u32 %v5327_v45, 16  ;;  %v5257_v57 = vld [vmem:[#allocation2 + $0x20] sm:$0x7f] }
 0x95a   :  { %v5439_v3 = vrot.slane %v5437_v51, 6  ;;  %v5442_v4 = vrot.slane %v5440_v6, 7  ;;  %v5295_v5 = vshll.u32 %v5257_v57, 16  ;;  %v5299_v22 = vshrl.u32 %v5257_v57, 16  ;;  %v9332_v27 = vld [vmem:[#allocation41 + $0x148] sm:$0xff]  }
 0x95b   :  { %v5435_v9 = vor.u32 %v5434_v53, %v5431_v48  ;;  %v5588_v10 = vrot.slane %v5586_v40, 6  ;;  %v5591_v12 = vrot.slane %v5589_v55, 7  ;;  %v5577_v35 = vshrl.u32 %v11117_v16, 16  ;;  %v5266_v48 = vld [vmem:[#allocation2 + $0x8] sm:$0xfe] }
 0x95c   :  { %v5443_v7 = vor.u32 %v5442_v4, %v5439_v3  ;;  %8628 = vmatpush3.bf16.msra.mxu1 %v9333_v52  ;;  %v5297_v18 = vrot.slane %v5295_v5, 1  ;;  %v5580_v60 = vshll.u32 %v11117_v16, 16  ;;  %v5427_v23 = vsel %vm879_vm1, %v5423_v41, %v5426_v11  ;;  %v9334_v53 = vld [vmem:[#allocation41 + $0x108] sm:$0xff]   ;;  %v9341_v3 = vld [vmem:[#allocation41 + $0x198] sm:$0xff]  }
 0x95d   :  { %v5592_v14 = vor.u32 %v5591_v12, %v5588_v10  ;;  %8629 = vmatprep.subr.bf16.mxu1 %v9335_v56  ;;  %v5547_v42 = vrot.slane %v5299_v22, 6  ;;  %v5548_v43 = vrot.slane %v5295_v5, 7  ;;  %v5579_v46 = vrot.slane %v5577_v35, 6  ;;  %v9343_v10 = vld [vmem:[#allocation41 + $0x1e0] sm:$0xff]  }
 0x95e   :  { %v5444_v17 = vsel %vm879_vm1, %v5435_v9, %v5443_v7  ;;  %v5298_v45 = vsel %vm729_vm0, %v11074_v58, %v5297_v18  ;;  %v5301_v16 = vor.u32 %v5299_v22, %v5297_v18  ;;  %v5575_v41 = vor.u32 %v5574_v36, %v11127_v26  ;;  %v9336_v26 = vld [vmem:[#allocation41 + $0x150] sm:$0xff]  }
 0x95f   :  { %6222 = vmatprep.mubr.bf16.mxu0 %v5444_v17  ;;  %6279 = vmatprep.mubr.bf16.mxu1 %v5592_v14  ;;  %v5552_v29 = vshrl.u32 %v5298_v45, 16  ;;  %v5555_v38 = vshll.u32 %v5298_v45, 16  ;;  %v5582_v51 = vrot.slane %v5580_v60, 7  ;;  %v5383_v52 = vshrl.u32 %v5270_v44, 16  ;;  %v9338_v14 = vld [vmem:[#allocation41 + $0x110] sm:$0xff]   ;;  %v9347_v45 = vld [vmem:[#allocation41 + $0x1e8] sm:$0xff]  }
 0x960   :  { %6223 = vmatmul.mubr.bf16.vlgmr.msra.gmra.mrb[72].mxu0 %v5427_v23  ;;  %v5560_v6 = vshrl.u32 %v5301_v16, 16  ;;  %v5563_v11 = vshll.u32 %v5301_v16, 16  ;;  %8630 = vmatpush3.bf16.msra.mxu1 %v9337_v39  ;;  %v5386_v56 = vshll.u32 %v5270_v44, 16  ;;  %v5549_v57 = vor.u32 %v5548_v43, %v5547_v42  ;;  %v9345_v44 = vld [vmem:[#allocation41 + $0x1a0] sm:$0xff]  }
 0x961   :  { %8598 = vmatpush3.bf16.msra.mxu0 %v9330_v37  ;;  %v5554_v40 = vrot.slane %v5552_v29, 6  ;;  %v5557_v58 = vrot.slane %v5555_v38, 7  ;;  %v5583_v55 = vor.u32 %v5582_v51, %v5579_v46  ;;  %8631 = vmatprep.subr.bf16.mxu1 %v9339_v34  ;;  %v5385_v22 = vrot.slane %v5383_v52, 3  ;;  %v9349_v52 = vld [vmem:[#allocation41 + $0x1a8] sm:$0xff]  }
 0x962   :  { %8599 = vmatprep.subr.bf16.mxu0 %v9332_v27  ;;  %v5562_v4 = vrot.slane %v5560_v6, 6  ;;  %v5565_v5 = vrot.slane %v5563_v11, 7  ;;  %v5388_v9 = vrot.slane %v5386_v56, 4  ;;  %v5339_v7 = vshrl.u32 %v5266_v48, 16  ;;  %v9342_v11 = vld [vmem:[#allocation41 + $0x118] sm:$0xff]  }
 0x963   :  { %v5558_v12 = vor.u32 %v5557_v58, %v5554_v40  ;;  %v5584_v36 = vsel %vm879_vm1, %v5575_v41, %v5583_v55  ;;  %v5342_v18 = vshll.u32 %v5266_v48, 16  ;;  %v5376_v39 = vrot.slane %v5266_v48, 3  ;;  %v9351_v55 = vld [vmem:[#allocation41 + $0x1f0] sm:$0xff]  }
 0x964   :  { %v5566_v35 = vor.u32 %v5565_v5, %v5562_v4  ;;  %6280 = vmatmul.mubr.bf16.gmra.mrb[68].mxu1 %v5584_v36  ;;  %v5389_v60 = vor.u32 %v5388_v9, %v5385_v22  ;;  %v5475_v23 = vshll.u32 %v11099_v20, 16  ;;  %v5550_v37 = vsel %vm879_vm1, %v5546_v24, %v5549_v57  ;;  %v9340_v24 = vld [vmem:[#allocation41 + $0x158] sm:$0xff]   ;;  %v5271_v5 = vld [vmem:[#allocation2 + $0x20] sm:$0xfc] }
 0x965   :  { %8600 = vmatpush3.bf16.msra.mxu0 %v9334_v53  ;;  %v5341_v42 = vrot.slane %v5339_v7, 2  ;;  %v5344_v43 = vrot.slane %v5342_v18, 3  ;;  %8632 = vmatpush3.bf16.msra.mxu1 %v9341_v3  ;;  %v11147_v34 = vrot.slane %v5472_v62, 6  ;;  %v5378_v20 = vsel %vm837_vm5, %v5376_v39, %v5377_v61  ;;  %v9344_v53 = vld [vmem:[#allocation41 + $0x160] sm:$0xff]  }
 0x966   :  { %v5567_v17 = vsel %vm879_vm1, %v5558_v12, %v5566_v35  ;;  %8601 = vmatprep.subr.bf16.mxu0 %v9336_v26  ;;  %v5398_v27 = vsel %vm844_vm6, %v5389_v60, %v5397_v13  ;;  %v5523_v50 = vshrl.u32 %v5389_v60, 16  ;;  %v5526_v59 = vshll.u32 %v5389_v60, 16  ;;  %8633 = vmatprep.subr.bf16.mxu1 %v9343_v10  ;;  %v9346_v22 = vld [vmem:[#allocation41 + $0x120] sm:$0xff]   ;;  %v9348_v35 = vld [vmem:[#allocation41 + $0x168] sm:$0xff]   ;;  %v9353_v60 = vld [vmem:[#allocation41 + $0x1b0] sm:$0xff]  }
 0x967   :  { %6230 = vmatprep.mubr.bf16.mxu0 %v5567_v17  ;;  %v5531_v16 = vshrl.u32 %v5398_v27, 16  ;;  %v5534_v46 = vshll.u32 %v5398_v27, 16  ;;  %v5345_v29 = vor.u32 %v5344_v43, %v5341_v42  ;;  %v5506_v41 = vshrl.u32 %v5376_v39, 16  ;;  %v5267_v36 = vld [vmem:[#allocation2 + $0x20] sm:$0xfe] }
 0x968   :  { %6231 = vmatmul.mubr.bf16.gmra.mrb[76].mxu0 %v5550_v37  ;;  %v5525_v62 = vrot.slane %v5523_v50, 6  ;;  %v5528_v38 = vrot.slane %v5526_v59, 7  ;;  %v5509_v25 = vshll.u32 %v5376_v39, 16  ;;  %v5517_v9 = vshll.u32 %v5378_v20, 16 }
 0x969   :  { %8602 = vmatpush3.bf16.msra.mxu0 %v9338_v14  ;;  %v5533_v63 = vrot.slane %v5531_v16, 6  ;;  %v5536_v13 = vrot.slane %v5534_v46, 7  ;;  %v5354_v51 = vsel %vm798_vm4, %v5345_v29, %v5353_v49  ;;  %v5489_v6 = vshrl.u32 %v5345_v29, 16  ;;  %8634 = vmatpush3.bf16.msra.mxu1 %v9345_v44  ;;  %v9355_v14 = vld [vmem:[#allocation41 + $0x1f8] sm:$0xff]  }
 0x96a   :  { %v5529_v0 = vor.u32 %v5528_v38, %v5525_v62  ;;  %v5492_v56 = vshll.u32 %v5345_v29, 16  ;;  %v5497_v61 = vshrl.u32 %v5354_v51, 16  ;;  %v5500_v48 = vshll.u32 %v5354_v51, 16  ;;  %8603 = vmatprep.subr.bf16.mxu0 %v9340_v24  ;;  %8635 = vmatprep.subr.bf16.mxu1 %v9347_v45  ;;  %v9350_v24 = vld [vmem:[#allocation41 + $0x128] sm:$0xff]  }
 0x96b   :  { %v5537_v40 = vor.u32 %v5536_v13, %v5533_v63  ;;  %v5491_v58 = vrot.slane %v5489_v6, 6  ;;  %v5508_v57 = vrot.slane %v5506_v41, 6  ;;  %v5511_v3 = vrot.slane %v5509_v25, 7 }
 0x96c   :  { %v5494_v4 = vrot.slane %v5492_v56, 7  ;;  %v5499_v47 = vrot.slane %v5497_v61, 6  ;;  %v5502_v21 = vrot.slane %v5500_v48, 7  ;;  %v5514_v49 = vshrl.u32 %v5378_v20, 16  ;;  %v9357_v20 = vld [vmem:[#allocation41 + $0x1b8] sm:$0xff]   ;;  %v9354_v61 = vld [vmem:[#allocation41 + $0x130] sm:$0xff]  }
 0x96d   :  { %v5538_v26 = vsel %vm879_vm1, %v5529_v0, %v5537_v40  ;;  %8604 = vmatpush3.bf16.msra.mxu0 %v9342_v11  ;;  %8636 = vmatpush3.bf16.msra.mxu1 %v9349_v52  ;;  %v11162_v10 = vrot.slane %v5475_v23, 7  ;;  %v5480_v12 = vshrl.u32 %v11109_v33, 16  ;;  %v5483_v37 = vshll.u32 %v11109_v33, 16  ;;  %v9352_v33 = vld [vmem:[#allocation41 + $0x170] sm:$0xff]   ;;  %v9356_v40 = vld [vmem:[#allocation41 + $0x178] sm:$0xff]  }
 0x96e   :  { %6369 = vmatprep.mubr.bf16.mxu1 %v5538_v26  ;;  %v5495_v7 = vor.u32 %v5494_v4, %v5491_v58  ;;  %v5503_v18 = vor.u32 %v5502_v21, %v5499_v47  ;;  %8605 = vmatprep.subr.bf16.mxu0 %v9344_v53  ;;  %v5516_v39 = vrot.slane %v5514_v49, 6  ;;  %v5512_v42 = vor.u32 %v5511_v3, %v5508_v57  ;;  %v9358_v26 = vld [vmem:[#allocation41 + $0x138] sm:$0xff]  }
 0x96f   :  { %8637 = vmatprep.subr.bf16.mxu1 %v9351_v55  ;;  %v5519_v43 = vrot.slane %v5517_v9, 7  ;;  %v5400_v44 = vshrl.u32 %v5271_v5, 16  ;;  %v5403_v17 = vshll.u32 %v5271_v5, 16  ;;  %v5356_v27 = vshrl.u32 %v5267_v36, 16 }
 0x970   :  { %v5504_v23 = vsel %vm879_vm1, %v5495_v7, %v5503_v18  ;;  %v5359_v50 = vshll.u32 %v5267_v36, 16  ;;  %v5379_v59 = vrot.slane %v5267_v36, 3  ;;  %v11167_v16 = vrot.slane %v5480_v12, 6 }
 0x971   :  { %6320 = vmatprep.mubr.bf16.mxu0 %v5504_v23  ;;  %8606 = vmatpush3.bf16.msra.mxu0 %v9346_v22  ;;  %v5520_v45 = vor.u32 %v5519_v43, %v5516_v39  ;;  %v5402_v46 = vrot.slane %v5400_v44, 3  ;;  %v5405_v29 = vrot.slane %v5403_v17, 4  ;;  %v5358_v62 = vrot.slane %v5356_v27, 2 }
 0x972   :  { %8607 = vmatprep.subr.bf16.mxu0 %v9348_v35  ;;  %8638 = vmatpush3.bf16.msra.mxu1 %v9353_v60  ;;  %v5361_v38 = vrot.slane %v5359_v50, 3  ;;  %v5381_v41 = vsel %vm837_vm5, %v5379_v59, %v5380_v19  ;;  %v5629_v25 = vshrl.u32 %v5379_v59, 16  ;;  %v5485_v13 = vrot.slane %v5483_v37, 7 }
 0x973   :  { %8639 = vmatprep.subr.bf16.mxu1 %v9355_v14  ;;  %v5521_v63 = vsel %vm879_vm1, %v5512_v42, %v5520_v45  ;;  %v5406_v51 = vor.u32 %v5405_v29, %v5402_v46  ;;  %v5632_v6 = vshll.u32 %v5379_v59, 16  ;;  %v5637_v0 = vshrl.u32 %v5381_v41, 16 }
 0x974   :  { %v5362_v11 = vor.u32 %v5361_v38, %v5358_v62  ;;  %v5631_v52 = vrot.slane %v5629_v25, 6  ;;  %v5640_v56 = vshll.u32 %v5381_v41, 16  ;;  %v5336_v36 = vrot.slane %v11072_v8, 2  ;;  %v9361_v62 = vld [vmem:[#allocation45 + $0xc0] sm:$0xff]   ;;  %v9363_v41 = vld [vmem:[#allocation45 + $0x48] sm:$0xff]  }
 0x975   :  { %8608 = vmatpush3.bf16.msra.mxu0 %v9350_v24  ;;  %v5415_v28 = vsel %vm844_vm6, %v5406_v51, %v5414_v31  ;;  %v5646_v48 = vshrl.u32 %v5406_v51, 16  ;;  %v5649_v19 = vshll.u32 %v5406_v51, 16  ;;  %v5634_v53 = vrot.slane %v5632_v6, 7  ;;  %v9362_v38 = vld [vmem:[#allocation45 + $0x80] sm:$0xff]   ;;  %v9365_v25 = vld [vmem:[#allocation45 + $0xc8] sm:$0xff]   ;;  %v9367_v51 = vld [vmem:[#allocation45 + $0x50] sm:$0xff]  }
 0x976   :  { %8609 = vmatprep.subr.bf16.mxu0 %v9352_v33  ;;  %8640 = vmatpush3.bf16.msra.mxu1 %v9357_v20  ;;  %v5654_v58 = vshrl.u32 %v5415_v28, 16  ;;  %v5657_v55 = vshll.u32 %v5415_v28, 16  ;;  %v5371_v57 = vsel %vm798_vm4, %v5362_v11, %v5370_v1  ;;  %v5612_v3 = vshrl.u32 %v5362_v11, 16  ;;  %v9359_v33 = vld [vmem:[#allocation45 + $0x40] sm:$0xff]   ;;  %v9368_v6 = vld [vmem:[#allocation45 + $0x10] sm:$0xff]   ;;  %v9374_v28 = vld [vmem:[#allocation45 + $0x98] sm:$0xff]  }
 0x977   :  { %v5648_v4 = vrot.slane %v5646_v48, 6  ;;  %v5651_v47 = vrot.slane %v5649_v19, 7  ;;  %v5615_v21 = vshll.u32 %v5362_v11, 16  ;;  %v5620_v2 = vshrl.u32 %v5371_v57, 16  ;;  %v9360_v20 = vld [vmem:[#allocation45] sm:$0xff]   ;;  %8681 = vmatprep.subr.bf16.mxu1 %v9361_v62  ;;  %v9369_v11 = vld [vmem:[#allocation45 + $0xd0] sm:$0xff]  }
 0x978   :  { %v5656_v15 = vrot.slane %v5654_v58, 6  ;;  %v5659_v31 = vrot.slane %v5657_v55, 7  ;;  %v5614_v49 = vrot.slane %v5612_v3, 6  ;;  %v5623_v5 = vshll.u32 %v5371_v57, 16  ;;  %v9375_v48 = vld [vmem:[#allocation45 + $0x60] sm:$0xff]   ;;  %v9379_v58 = vld [vmem:[#allocation45 + $0x68] sm:$0xff]  }
 0x979   :  { %8610 = vmatpush3.bf16.msra.mxu0 %v9354_v61  ;;  %6370 = vmatmul.mubr.bf16.vlgmr.msra.gmra.mrb[72].mxu1 %v5521_v63  ;;  %v5652_v22 = vor.u32 %v5651_v47, %v5648_v4  ;;  %v5617_v9 = vrot.slane %v5615_v21, 7  ;;  %v5622_v12 = vrot.slane %v5620_v2, 6  ;;  %v5639_v1 = vrot.slane %v5637_v0, 6  ;;  %v9364_v63 = vld [vmem:[#allocation45 + $0x8] sm:$0xff]   ;;  %v9371_v0 = vld [vmem:[#allocation45 + $0x58] sm:$0xff]   ;;  %v9377_v19 = vld [vmem:[#allocation45 + $0xe0] sm:$0xff]  }
 0x97a   :  { %8611 = vmatprep.subr.bf16.mxu0 %v9356_v40  ;;  %v5660_v30 = vor.u32 %v5659_v31, %v5656_v15  ;;  %v5625_v32 = vrot.slane %v5623_v5, 7  ;;  %v5642_v7 = vrot.slane %v5640_v56, 7  ;;  %v5478_v18 = vor.u32 %v11162_v10, %v11147_v34  ;;  %8682 = vmatpush3.bf16.msra.mxu1 %v9362_v38  ;;  %v9373_v56 = vld [vmem:[#allocation45 + $0xd8] sm:$0xff]   ;;  %v9378_v40 = vld [vmem:[#allocation45 + $0xa0] sm:$0xff]   ;;  %v9381_v55 = vld [vmem:[#allocation45 + $0xe8] sm:$0xff]  }
 0x97b   :  { %v5486_v35 = vor.u32 %v5485_v13, %v11167_v16  ;;  %v5635_v60 = vor.u32 %v5634_v53, %v5631_v52  ;;  %v5335_v39 = vrot.slane %v11105_v54, 2  ;;  %v5618_v14 = vor.u32 %v5617_v9, %v5614_v49  ;;  %v9366_v13 = vld [vmem:[#allocation45 + $0x88] sm:$0xff]   ;;  %8683 = vmatprep.subr.bf16.mxu1 %v9365_v25  ;;  %v9370_v52 = vld [vmem:[#allocation45 + $0x90] sm:$0xff]   ;;  %v9372_v61 = vld [vmem:[#allocation45 + $0x18] sm:$0xff]  }
 0x97c   :  { %v5661_v37 = vsel %vm879_vm1, %v5652_v22, %v5660_v30  ;;  %v5626_v42 = vor.u32 %v5625_v32, %v5622_v12  ;;  %v5643_v43 = vor.u32 %v5642_v7, %v5639_v1  ;;  %v9376_v53 = vld [vmem:[#allocation45 + $0x20] sm:$0xff]   ;;  %v9380_v57 = vld [vmem:[#allocation45 + $0x28] sm:$0xff]   ;;  %v9383_v4 = vld [vmem:[#allocation45 + $0x70] sm:$0xff]  }
 0x97d   :  { %8612 = vmatpush3.bf16.msra.mxu0 %v9358_v26  ;;  %6377 = vmatprep.mubr.bf16.mxu1 %v5661_v37  ;;  %v5337_v8 = vsel %vm791_vm3, %v5335_v39, %v5336_v36  ;;  %v5595_v44 = vshrl.u32 %v5335_v39, 16  ;;  %v5598_v17 = vshll.u32 %v5335_v39, 16  ;;  %v5487_v34 = vsel %vm879_vm1, %v5478_v18, %v5486_v35  ;;  %v9382_v3 = vld [vmem:[#allocation45 + $0xa8] sm:$0xff]   ;;  %v9385_v47 = vld [vmem:[#allocation45 + $0xf0] sm:$0xff]   ;;  %v9387_v15 = vld [vmem:[#allocation45 + $0x78] sm:$0xff]  }
 0x97e   :  { %v5603_v23 = vshrl.u32 %v5337_v8, 16  ;;  %v5606_v27 = vshll.u32 %v5337_v8, 16  ;;  %v5627_v54 = vsel %vm879_vm1, %v5618_v14, %v5626_v42  ;;  %v5644_v59 = vsel %vm879_vm1, %v5635_v60, %v5643_v43  ;;  %8653 = vmatprep.subr.bf16.mxu0 %v9359_v33  ;;  %8684 = vmatpush3.bf16.msra.mxu1 %v9366_v13  ;;  %v9384_v21 = vld [vmem:[#allocation45 + $0x30] sm:$0xff]   ;;  %v9389_v31 = vld [vmem:[#allocation45 + $0xf8] sm:$0xff]   ;;  %v11192_v26 = vld [vmem:[#allocation45 + $0x100] sm:$0xff]  }
 0x97f   :  { %v5597_v10 = vrot.slane %v5595_v44, 6  ;;  %v5600_v50 = vrot.slane %v5598_v17, 7  ;;  %8685 = vmatprep.subr.bf16.mxu1 %v9369_v11  ;;  %v9386_v2 = vld [vmem:[#allocation45 + $0xb0] sm:$0xff]   ;;  %v9388_v49 = vld [vmem:[#allocation45 + $0x38] sm:$0xff]  }
 0x980   :  { %6321 = vmatmul.mubr.bf16.vlgmr.msra.gmra.mrb[80].mxu0 %v5487_v34  ;;  %v5605_v24 = vrot.slane %v5603_v23, 6  ;;  %v5608_v45 = vrot.slane %v5606_v27, 7  ;;  %v9390_v5 = vld [vmem:[#allocation45 + $0xb8] sm:$0xff]  }
 0x981   :  { %6328 = vmatprep.mubr.bf16.mxu0 %v5627_v54  ;;  %6378 = vmatmul.mubr.bf16.gmra.mrb[76].mxu1 %v5644_v59  ;;  %v5601_v16 = vor.u32 %v5600_v50, %v5597_v10 }
 0x982   :  { %v5609_v46 = vor.u32 %v5608_v45, %v5605_v24  ;;  %8654 = vmatpush3.bf16.msra.mxu0 %v9360_v20  ;;  %8686 = vmatpush3.bf16.msra.mxu1 %v9370_v52 }
 0x983   :  { %8655 = vmatprep.subr.bf16.mxu0 %v9363_v41  ;;  %8687 = vmatprep.subr.bf16.mxu1 %v9373_v56 }
 0x984   :  { %v5610_v29 = vsel %vm879_vm1, %v5601_v16, %v5609_v46 }
 0x986   :  { %8656 = vmatpush3.bf16.msra.mxu0 %v9364_v63  ;;  %8688 = vmatpush3.bf16.msra.mxu1 %v9374_v28  ;;  %v8008_v28 = vld [vmem:[#allocation42] ss:$0 sm:$0xff] }
 0x987   :  { %8657 = vmatprep.subr.bf16.mxu0 %v9367_v51  ;;  %8689 = vmatprep.subr.bf16.mxu1 %v9377_v19 }
 0x988   :  { %6329 = vmatmul.mubr.bf16.gmra.mrb[84].mxu0 %v5610_v29 }
 0x98a   :  { %8658 = vmatpush3.bf16.msra.mxu0 %v9368_v6  ;;  %8690 = vmatpush3.bf16.msra.mxu1 %v9378_v40  ;;  %v8009_v40 = vld [vmem:[#allocation44] ss:$0 sm:$0xff] }
 0x98b   :  { %8659 = vmatprep.subr.bf16.mxu0 %v9371_v0  ;;  %8691 = vmatprep.subr.bf16.mxu1 %v9381_v55 }
 0x98e   :  { %8660 = vmatpush3.bf16.msra.mxu0 %v9372_v61  ;;  %8692 = vmatpush3.bf16.msra.mxu1 %v9382_v3 }
 0x98f   :  { %8661 = vmatprep.subr.bf16.mxu0 %v9375_v48  ;;  %8693 = vmatprep.subr.bf16.mxu1 %v9385_v47 }
 0x992   :  { %8662 = vmatpush3.bf16.msra.mxu0 %v9376_v53  ;;  %8694 = vmatpush3.bf16.msra.mxu1 %v9386_v2 }
 0x993   :  { %8663 = vmatprep.subr.bf16.mxu0 %v9379_v58  ;;  %8695 = vmatprep.subr.bf16.mxu1 %v9389_v31 }
 0x996   :  { %8664 = vmatpush3.bf16.msra.mxu0 %v9380_v57  ;;  %8696 = vmatpush3.bf16.msra.mxu1 %v9390_v5 }
 0x997   :  { %8665 = vmatprep.subr.bf16.mxu0 %v9383_v4 }
 0x99a   :  { %8666 = vmatpush3.bf16.msra.mxu0 %v9384_v21 }
 0x99b   :  { %8667 = vmatprep.subr.bf16.mxu0 %v9387_v15 }
 0x99e   :  { %8668 = vmatpush3.bf16.msra.mxu0 %v9388_v49 }
 0x99f   :  { %8886 = vmatprep.subr.bf16.mxu0 %v11192_v26 }
 0xa2a   :  { %v8585_v22 = vpop.f32.mrb[64].mxu1 }
 0xa2b   :  { %v8586_v9 = vpop.f32.mrb[65].mxu1 }
 0xa2c   :  { %v8587_v12 = vadd.f32 %v8586_v9, %v8585_v22  ;;  %v8588_v36 = vpop.f32.mrb[66].mxu1 }
 0xa2d   :  { %v8589_v30 = vpop.f32.mrb[67].mxu1 }
 0xa2e   :  { %v8590_v32 = vadd.f32 %v8589_v30, %v8588_v36  ;;  %v6416_v30 = vld [vmem:[#allocation2] sm:$0x80] }
 0xa33   :  { %v8557_v1 = vpop.f32.mrb[72].mxu0 }
 0xa34   :  { %v8558_v7 = vpop.f32.mrb[73].mxu0 }
 0xa35   :  { %v8559_v18 = vadd.f32 %v8558_v7, %v8557_v1  ;;  %v8560_v35 = vpop.f32.mrb[74].mxu0 }
 0xa36   :  { %v8561_v60 = vpop.f32.mrb[75].mxu0 }
 0xa37   :  { %v6274_v39 = vadd.f32 %v8587_v12, %v8559_v18  ;;  %v8562_v37 = vadd.f32 %v8561_v60, %v8560_v35  ;;  %v8591_v14 = vpop.f32.mrb[68].mxu1  ;;  %v6429_v35 = vshrl.u32 %v6416_v30, 16 }
 0xa38   :  { %v8592_v42 = vpop.f32.mrb[69].mxu1 }
 0xa39   :  { %v6277_v43 = vadd.f32 %v8590_v32, %v8562_v37  ;;  %v8593_v8 = vadd.f32 %v8592_v42, %v8591_v14  ;;  %v8594_v44 = vpop.f32.mrb[70].mxu1  ;;  %v6423_v32 = vld [vmem:[#allocation2 + $0x10] sm:$0x1] }
 0xa3a   :  { %v8595_v17 = vpop.f32.mrb[71].mxu1  ;;  %v6463_v60 = vshll.u32 %v6423_v32, 16 }
 0xa3b   :  { %v8563_v23 = vpop.f32.mrb[76].mxu0  ;;  %v8596_v27 = vadd.f32 %v8595_v17, %v8594_v44 }
 0xa3c   :  { %v8564_v34 = vpop.f32.mrb[77].mxu0 }
 0xa3d   :  { %v8565_v10 = vadd.f32 %v8564_v34, %v8563_v23  ;;  %v8566_v50 = vpop.f32.mrb[78].mxu0  ;;  %v6465_v23 = vrot.slane %v6463_v60, 2  ;;  %v9397_v60 = vld [vmem:[#allocation45 + $0x130] sm:$0xff]  }
 0xa3e   :  { %v8567_v54 = vpop.f32.mrb[79].mxu0 }
 0xa3f   :  { %v6282_v59 = vadd.f32 %v8593_v8, %v8565_v10  ;;  %v8568_v24 = vadd.f32 %v8567_v54, %v8566_v50 }
 0xa41   :  { %v6285_v45 = vadd.f32 %v8596_v27, %v8568_v24  ;;  %v6418_v27 = vld [vmem:[#allocation2 + $0x18] sm:$0x80] }
 0xa4c   :  { %v8641_v16 = vpop.f32.mrb[72].mxu1 }
 0xa4d   :  { %v8642_v46 = vpop.f32.mrb[73].mxu1 }
 0xa4e   :  { %v8643_v29 = vadd.f32 %v8642_v46, %v8641_v16  ;;  %v8644_v33 = vpop.f32.mrb[74].mxu1 }
 0xa4f   :  { %v8645_v20 = vpop.f32.mrb[75].mxu1 }
 0xa50   :  { %v8646_v62 = vadd.f32 %v8645_v20, %v8644_v33  ;;  %v6440_v33 = vshrl.u32 %v6418_v27, 16 }
 0xa53   :  { %v8613_v38 = vpop.f32.mrb[80].mxu0 }
 0xa54   :  { %v8614_v41 = vpop.f32.mrb[81].mxu0  ;;  %v8647_v25 = vpop.f32.mrb[76].mxu1 }
 0xa55   :  { %v8615_v63 = vadd.f32 %v8614_v41, %v8613_v38  ;;  %v8616_v13 = vpop.f32.mrb[82].mxu0  ;;  %v8648_v51 = vpop.f32.mrb[77].mxu1 }
 0xa56   :  { %v8617_v6 = vpop.f32.mrb[83].mxu0  ;;  %v8649_v11 = vadd.f32 %v8648_v51, %v8647_v25  ;;  %v8650_v52 = vpop.f32.mrb[78].mxu1 }
 0xa57   :  { %v6323_v0 = vadd.f32 %v8615_v63, %v6274_v39  ;;  %v8618_v56 = vadd.f32 %v8617_v6, %v8616_v13  ;;  %v8651_v61 = vpop.f32.mrb[79].mxu1 }
 0xa58   :  { %v8652_v48 = vadd.f32 %v8651_v61, %v8650_v52 }
 0xa59   :  { %v6372_v19 = vadd.f32 %v8643_v29, %v6323_v0  ;;  %v6326_v53 = vadd.f32 %v8618_v56, %v6277_v43  ;;  %v6494_v29 = vrot.slane %v6416_v30, 7  ;;  %v6485_v56 = vrot.slane %v6423_v32, 2 }
 0xa5b   :  { %v6393_v58 = vmul.f32 %v8008_v28, %v6372_v19  ;;  %v6375_v55 = vadd.f32 %v8646_v62, %v6326_v53  ;;  %v8619_v57 = vpop.f32.mrb[84].mxu0 }
 0xa5c   :  { %v8620_v3 = vpop.f32.mrb[85].mxu0 }
 0xa5d   :  { %v6404_v4 = vadd.f32 %v8009_v40, %v6393_v58  ;;  %v6394_v47 = vmul.f32 %v8008_v28, %v6375_v55  ;;  %v8621_v21 = vadd.f32 %v8620_v3, %v8619_v57  ;;  %v8622_v2 = vpop.f32.mrb[86].mxu0  ;;  %v9393_v3 = vld [vmem:[#allocation45 + $0x110] sm:$0xff]  }
 0xa5e   :  { %v8623_v15 = vpop.f32.mrb[87].mxu0 }
 0xa5f   :  { %v6405_v31 = vadd.f32 %v8009_v40, %v6394_v47  ;;  %v6331_v49 = vadd.f32 %v8621_v21, %v6282_v59  ;;  %v8624_v5 = vadd.f32 %v8623_v15, %v8622_v2  ;;  %v6408_v22 = vmax.f32 %v6404_v4, 0.0  ;;  %v11196_v59 = vld [vmem:[#allocation2 + $0x28] sm:$0x1] }
 0xa60   :  { %v6476_v41 = vshll.u32 %v11196_v59, 16  ;;  %v6508_v2 = vrot.slane %v6418_v27, 7  ;;  %v9401_v27 = vld [vmem:[#allocation50] sm:$0xff]  }
 0xa61   :  { %v6409_v9 = vmax.f32 %v6405_v31, 0.0  ;;  %v6380_v12 = vadd.f32 %v8649_v11, %v6331_v49  ;;  %v6334_v36 = vadd.f32 %v8624_v5, %v6285_v45  ;;  %v9392_v11 = vld [vmem:[#allocation45 + $0x108] sm:$0xff]  }
 0xa63   :  { %v6412_v1 = vpack.c.bf16 %v6409_v9, %v6408_v22  ;;  %v6395_v7 = vmul.f32 %v8008_v28, %v6380_v12  ;;  %v6383_v18 = vadd.f32 %v8652_v48, %v6334_v36  ;;  %v9394_v36 = vld [vmem:[#allocation45 + $0x118] sm:$0xff]  }
 0xa65   :  { %6414 = vst [vmem:[#allocation2 + $0x8] sm:$0xff] %v6412_v1  ;;  %v6406_v39 = vadd.f32 %v8009_v40, %v6395_v7  ;;  %v6396_v37 = vmul.f32 %v8008_v28, %v6383_v18  ;;  %v6432_v14 = vshll.u32 %v6412_v1, 16  ;;  %v6436_v42 = vshrl.u32 %v6412_v1, 16  ;;  %v9395_v7 = vld [vmem:[#allocation45 + $0x120] sm:$0xff]   ;;  %v9396_v18 = vld [vmem:[#allocation45 + $0x128] sm:$0xff]  }
 0xa67   :  { %v6407_v43 = vadd.f32 %v8009_v40, %v6396_v37  ;;  %v6434_v8 = vrot.slane %v6432_v14, 1  ;;  %v6457_v44 = vrot.slane %v6436_v42, 1  ;;  %v6460_v17 = vrot.slane %v6432_v14, 2  ;;  %v9398_v14 = vld [vmem:[#allocation45 + $0x138] sm:$0xff]  }
 0xa68   :  { %v6410_v34 = vmax.f32 %v6406_v39, 0.0  ;;  %v6478_v40 = vrot.slane %v6476_v41, 2  ;;  %v6488_v39 = vrot.slane %v11196_v59, 2  ;;  %v9406_v59 = vld [vmem:[#allocation50 + $0x50] sm:$0xff]  }
 0xa69   :  { %v6411_v10 = vmax.f32 %v6407_v43, 0.0  ;;  %v6435_v50 = vsel %vm729_vm0, %v6429_v35, %v6434_v8  ;;  %v6438_v54 = vor.u32 %v6436_v42, %v6434_v8  ;;  %v6461_v45 = vor.u32 %v6460_v17, %v6457_v44  ;;  %v9399_v17 = vld [vmem:[#allocation50 + $0x80] sm:$0xff]   ;;  %v9417_v41 = vld [vmem:[#allocation50 + $0xb0] sm:$0xff]  }
 0xa6a   :  { %v6497_v24 = vrot.slane %v6435_v50, 7  ;;  %v9405_v50 = vld [vmem:[#allocation50 + $0x90] sm:$0xff]  }
 0xa6b   :  { %v6413_v16 = vpack.c.bf16 %v6411_v10, %v6410_v34  ;;  %v6498_v46 = vrot.slane %v6438_v54, 7  ;;  %v6466_v62 = vsel %vm1918_vm7, %v6461_v45, %v6465_v23  ;;  %v6502_v38 = vrot.slane %v6461_v45, 7  ;;  %v9400_v23 = vld [vmem:[#allocation50 + $0x40] sm:$0xff]   ;;  %v9402_v34 = vld [vmem:[#allocation50 + $0x88] sm:$0xff]   ;;  %v9407_v45 = vld [vmem:[#allocation50 + $0x10] sm:$0xff]  }
 0xa6c   :  { %v6417_v20 = vld [vmem:[#allocation2 + $0x8] sm:$0x7f]  ;;  %v6503_v51 = vrot.slane %v6466_v62, 7  ;;  %v9403_v10 = vld [vmem:[#allocation50 + $0x48] sm:$0xff]   ;;  %8719 = vmatprep.subr.bf16.mxu1 %v9400_v23 }
 0xa6d   :  { %v6426_v25 = vld [vmem:[#allocation2 + $0x8] sm:$0xfe]  ;;  %6415 = vst [vmem:[#allocation2 + $0x20] sm:$0xff] %v6413_v16  ;;  %v6499_v63 = vsel %vm1959_vm8, %v6497_v24, %v6498_v46  ;;  %v6495_v13 = vrot.slane %v6417_v20, 7  ;;  %v6443_v6 = vshll.u32 %v6413_v16, 16  ;;  %v6447_v52 = vshrl.u32 %v6413_v16, 16 }
 0xa6e   :  { %6884 = vmatprep.mubr.bf16.mxu0 %v6499_v63  ;;  %v6484_v0 = vrot.slane %v6426_v25, 2  ;;  %v6504_v28 = vsel %vm1959_vm8, %v6502_v38, %v6503_v51  ;;  %v9404_v54 = vld [vmem:[#allocation50 + $0x8] sm:$0xff]   ;;  %v9408_v24 = vld [vmem:[#allocation50 + $0x98] sm:$0xff]   ;;  %v9411_v46 = vld [vmem:[#allocation50 + $0xa0] sm:$0xff]  }
 0xa6f   :  { %v6496_v61 = vsel %vm1959_vm8, %v6494_v29, %v6495_v13  ;;  %v6445_v48 = vrot.slane %v6443_v6, 1  ;;  %v6473_v19 = vrot.slane %v6443_v6, 2  ;;  %6933 = vmatprep.mubr.bf16.mxu1 %v6504_v28  ;;  %v6470_v53 = vrot.slane %v6447_v52, 1  ;;  %v9410_v29 = vld [vmem:[#allocation50 + $0x18] sm:$0xff]   ;;  %v9414_v20 = vld [vmem:[#allocation50 + $0xa8] sm:$0xff]   ;;  %v9413_v62 = vld [vmem:[#allocation50 + $0x20] sm:$0xff]  }
 0xa70   :  { %6885 = vmatmul.mubr.bf16.vlgmr.msra.gmra.mrb[88].mxu0 %v6496_v61  ;;  %6934 = vmatmul.mubr.bf16.vlgmr.msra.gmra.mrb[80].mxu1 %v6412_v1  ;;  %v6486_v47 = vsel %vm791_vm3, %v6484_v0, %v6485_v56  ;;  %v6505_v5 = vrot.slane %v6484_v0, 7  ;;  %v9415_v38 = vld [vmem:[#allocation50 + $0x68] sm:$0xff]   ;;  %v9418_v63 = vld [vmem:[#allocation50 + $0x70] sm:$0xff]   ;;  %v9420_v13 = vld [vmem:[#allocation50 + $0xb8] sm:$0xff]  }
 0xa71   :  { %8887 = vmatpush3.bf16.msra.mxu0 %v11192_v26  ;;  %v6446_v58 = vsel %vm729_vm0, %v6440_v33, %v6445_v48  ;;  %v6449_v55 = vor.u32 %v6447_v52, %v6445_v48  ;;  %v6474_v4 = vor.u32 %v6473_v19, %v6470_v53  ;;  %v6506_v12 = vrot.slane %v6486_v47, 7  ;;  %8720 = vmatpush3.bf16.msra.mxu1 %v9401_v27  ;;  %v9412_v33 = vld [vmem:[#allocation50 + $0x60] sm:$0xff]   ;;  %v9416_v25 = vld [vmem:[#allocation50 + $0x28] sm:$0xff]   ;;  %v9419_v51 = vld [vmem:[#allocation50 + $0x30] sm:$0xff]  }
 0xa72   :  { %8888 = vmatprep.subr.bf16.mxu0 %v9392_v11  ;;  %v6511_v57 = vrot.slane %v6446_v58, 7  ;;  %8721 = vmatprep.subr.bf16.mxu1 %v9403_v10  ;;  %v9421_v6 = vld [vmem:[#allocation50 + $0x78] sm:$0xff]  }
 0xa73   :  { %v6512_v21 = vrot.slane %v6449_v55, 7  ;;  %v6479_v31 = vsel %vm1918_vm7, %v6474_v4, %v6478_v40  ;;  %v6516_v49 = vrot.slane %v6474_v4, 7  ;;  %v6507_v1 = vsel %vm1959_vm8, %v6505_v5, %v6506_v12 }
 0xa74   :  { %v6419_v15 = vld [vmem:[#allocation2 + $0x20] sm:$0x7f]  ;;  %v6517_v9 = vrot.slane %v6479_v31, 7 }
 0xa75   :  { %8889 = vmatpush3.bf16.msra.mxu0 %v9392_v11  ;;  %v6513_v26 = vsel %vm1959_vm8, %v6511_v57, %v6512_v21  ;;  %v6509_v22 = vrot.slane %v6419_v15, 7  ;;  %v6427_v35 = vld [vmem:[#allocation2 + $0x20] sm:$0xfe]  ;;  %8722 = vmatpush3.bf16.msra.mxu1 %v9404_v54  ;;  %v7036_v54 = vld [vmem:[#allocation2 + $0x28] sm:$0x1] }
 0xa76   :  { %6892 = vmatprep.mubr.bf16.mxu0 %v6513_v26  ;;  %8890 = vmatprep.subr.bf16.mxu0 %v9393_v3  ;;  %v6518_v32 = vsel %vm1959_vm8, %v6516_v49, %v6517_v9  ;;  %v6487_v37 = vrot.slane %v6427_v35, 2  ;;  %v9422_v11 = vld [vmem:[#allocation50 + $0x38] sm:$0xff]  }
 0xa77   :  { %v6510_v30 = vsel %vm1959_vm8, %v6508_v2, %v6509_v22  ;;  %6941 = vmatprep.mubr.bf16.mxu1 %v6518_v32  ;;  %8723 = vmatprep.subr.bf16.mxu1 %v9406_v59 }
 0xa78   :  { %6893 = vmatmul.mubr.bf16.gmra.mrb[92].mxu0 %v6510_v30  ;;  %6942 = vmatmul.mubr.bf16.gmra.mrb[84].mxu1 %v6413_v16  ;;  %v6489_v42 = vsel %vm791_vm3, %v6487_v37, %v6488_v39  ;;  %v6519_v43 = vrot.slane %v6487_v37, 7  ;;  %v9409_v16 = vld [vmem:[#allocation50 + $0x58] sm:$0xff]  }
 0xa79   :  { %8891 = vmatpush3.bf16.msra.mxu0 %v9393_v3  ;;  %8902 = vmatprep.mubr.bf16.mxu0 %v6507_v1  ;;  %v6520_v8 = vrot.slane %v6489_v42, 7 }
 0xa7a   :  { %8892 = vmatprep.subr.bf16.mxu0 %v9394_v36  ;;  %8724 = vmatpush3.bf16.msra.mxu1 %v9407_v45  ;;  %v7034_v45 = vld [vmem:[#allocation2 + $0x10] sm:$0x1] }
 0xa7b   :  { %v6521_v44 = vsel %vm1959_vm8, %v6519_v43, %v6520_v8  ;;  %8725 = vmatprep.subr.bf16.mxu1 %v9409_v16 }
 0xa7d   :  { %8893 = vmatpush3.bf16.msra.mxu0 %v9394_v36 }
 0xa7e   :  { %8894 = vmatprep.subr.bf16.mxu0 %v9395_v7  ;;  %8726 = vmatpush3.bf16.msra.mxu1 %v9410_v29 }
 0xa7f   :  { %8727 = vmatprep.subr.bf16.mxu1 %v9412_v33  ;;  %v7059_v33 = vrot.slane %v7036_v54, 1  ;;  %v9424_v54 = vld [vmem:[%s10468_s13 + $0x8] sm:$0xff]  }
 0xa81   :  { %8895 = vmatpush3.bf16.msra.mxu0 %v9395_v7  ;;  %v8052_v7 = vld [vmem:[#allocation47] ss:$0 sm:$0xff] }
 0xa82   :  { %8896 = vmatprep.subr.bf16.mxu0 %v9396_v18  ;;  %8728 = vmatpush3.bf16.msra.mxu1 %v9413_v62  ;;  %v7056_v62 = vrot.slane %v7034_v45, 1  ;;  %v9427_v45 = vld [vmem:[%s10468_s13 + $0x20] sm:$0xff]  }
 0xa83   :  { %8729 = vmatprep.subr.bf16.mxu1 %v9415_v38 }
 0xa85   :  { %8897 = vmatpush3.bf16.msra.mxu0 %v9396_v18 }
 0xa86   :  { %8898 = vmatprep.subr.bf16.mxu0 %v9397_v60  ;;  %8730 = vmatpush3.bf16.msra.mxu1 %v9416_v25 }
 0xa87   :  { %8731 = vmatprep.subr.bf16.mxu1 %v9418_v63 }
 0xa89   :  { %8899 = vmatpush3.bf16.msra.mxu0 %v9397_v60  ;;  %v8053_v60 = vld [vmem:[#allocation48] ss:$0 sm:$0xff] }
 0xa8a   :  { %8900 = vmatprep.subr.bf16.mxu0 %v9398_v14  ;;  %8732 = vmatpush3.bf16.msra.mxu1 %v9419_v51 }
 0xa8b   :  { %8733 = vmatprep.subr.bf16.mxu1 %v9421_v6 }
 0xa8d   :  { %8901 = vmatpush3.bf16.msra.mxu0 %v9398_v14 }
 0xa8e   :  { %8906 = vmatprep.subr.bf16.mxu0 %v9399_v17  ;;  %8734 = vmatpush3.bf16.msra.mxu1 %v9422_v11 }
 0xa90   :  { %8903 = vmatmul.mubr.bf16.vlgmr.msra.gmra.mrb[96].mxu0 %v6521_v44 }
 0xa91   :  { %8907 = vmatpush3.bf16.msra.mxu0 %v9399_v17 }
 0xa92   :  { %8908 = vmatprep.subr.bf16.mxu0 %v9402_v34 }
 0xa95   :  { %8909 = vmatpush3.bf16.msra.mxu0 %v9402_v34 }
 0xa96   :  { %8910 = vmatprep.subr.bf16.mxu0 %v9405_v50 }
 0xa99   :  { %8911 = vmatpush3.bf16.msra.mxu0 %v9405_v50 }
 0xa9a   :  { %8912 = vmatprep.subr.bf16.mxu0 %v9408_v24 }
 0xa9d   :  { %8913 = vmatpush3.bf16.msra.mxu0 %v9408_v24 }
 0xa9e   :  { %8914 = vmatprep.subr.bf16.mxu0 %v9411_v46 }
 0xaa1   :  { %8915 = vmatpush3.bf16.msra.mxu0 %v9411_v46 }
 0xaa2   :  { %8916 = vmatprep.subr.bf16.mxu0 %v9414_v20 }
 0xaa5   :  { %8917 = vmatpush3.bf16.msra.mxu0 %v9414_v20 }
 0xaa6   :  { %8918 = vmatprep.subr.bf16.mxu0 %v9417_v41 }
 0xaa9   :  { %8919 = vmatpush3.bf16.msra.mxu0 %v9417_v41 }
 0xaaa   :  { %8920 = vmatprep.subr.bf16.mxu0 %v9420_v13 }
 0xaad   :  { %8921 = vmatpush3.bf16.msra.mxu0 %v9420_v13 }
 0xb43   :  { %v8669_v52 = vpop.f32.mrb[88].mxu0  ;;  %v8697_v56 = vpop.f32.mrb[80].mxu1 }
 0xb44   :  { %v8670_v0 = vpop.f32.mrb[89].mxu0  ;;  %v8698_v48 = vpop.f32.mrb[81].mxu1 }
 0xb45   :  { %v8671_v61 = vadd.f32 %v8670_v0, %v8669_v52  ;;  %v8672_v28 = vpop.f32.mrb[90].mxu0  ;;  %v8699_v19 = vadd.f32 %v8698_v48, %v8697_v56  ;;  %v8700_v40 = vpop.f32.mrb[82].mxu1  ;;  %v7029_v48 = vld [vmem:[#allocation2] sm:$0x80] }
 0xb46   :  { %v8673_v53 = vpop.f32.mrb[91].mxu0  ;;  %v8701_v55 = vpop.f32.mrb[83].mxu1 }
 0xb47   :  { %v8674_v58 = vadd.f32 %v8673_v53, %v8672_v28  ;;  %v8702_v57 = vadd.f32 %v8701_v55, %v8700_v40  ;;  %v6936_v3 = vadd.f32 %v8699_v19, %v8671_v61 }
 0xb49   :  { %v6939_v4 = vadd.f32 %v8702_v57, %v8674_v58 }
 0xb4b   :  { %v8675_v47 = vpop.f32.mrb[92].mxu0  ;;  %v8703_v2 = vpop.f32.mrb[84].mxu1 }
 0xb4c   :  { %v8676_v21 = vpop.f32.mrb[93].mxu0  ;;  %v8704_v49 = vpop.f32.mrb[85].mxu1 }
 0xb4d   :  { %v8677_v15 = vadd.f32 %v8676_v21, %v8675_v47  ;;  %v8678_v31 = vpop.f32.mrb[94].mxu0  ;;  %v8705_v5 = vadd.f32 %v8704_v49, %v8703_v2  ;;  %v8706_v22 = vpop.f32.mrb[86].mxu1  ;;  %v7062_v47 = vshrl.u32 %v7029_v48, 16 }
 0xb4e   :  { %v8679_v26 = vpop.f32.mrb[95].mxu0  ;;  %v8707_v12 = vpop.f32.mrb[87].mxu1 }
 0xb4f   :  { %v8680_v9 = vadd.f32 %v8679_v26, %v8678_v31  ;;  %v8708_v36 = vadd.f32 %v8707_v12, %v8706_v22  ;;  %v6944_v30 = vadd.f32 %v8705_v5, %v8677_v15 }
 0xb51   :  { %v6947_v32 = vadd.f32 %v8708_v36, %v8680_v9 }
 0xb63   :  { %v8904_v1 = vpop.f32.mrb[96].mxu0 }
 0xb64   :  { %v6993_v18 = vadd.f32 %v8904_v1, %v6944_v30  ;;  %v6984_v35 = vpop.f32.mrb[97].mxu0 }
 0xb65   :  { %v6985_v39 = vadd.f32 %v6984_v35, %v6936_v3  ;;  %v8905_v37 = vpop.f32.mrb[98].mxu0 }
 0xb66   :  { %v7008_v14 = vmul.f32 %v8052_v7, %v6993_v18  ;;  %v6996_v42 = vadd.f32 %v8905_v37, %v6947_v32  ;;  %v6987_v43 = vpop.f32.mrb[99].mxu0  ;;  %v7031_v37 = vld [vmem:[#allocation2 + $0x18] sm:$0x80] }
 0xb67   :  { %v7006_v8 = vmul.f32 %v8052_v7, %v6985_v39  ;;  %v6988_v44 = vadd.f32 %v6987_v43, %v6939_v4 }
 0xb68   :  { %v7019_v17 = vadd.f32 %v8053_v60, %v7008_v14  ;;  %v7009_v23 = vmul.f32 %v8052_v7, %v6996_v42 }
 0xb69   :  { %v7017_v27 = vadd.f32 %v8053_v60, %v7006_v8  ;;  %v7007_v34 = vmul.f32 %v8052_v7, %v6988_v44  ;;  %v7064_v7 = vrot.slane %v7062_v47, 7  ;;  %v7093_v8 = vshrl.u32 %v7031_v37, 16 }
 0xb6a   :  { %v7020_v10 = vadd.f32 %v8053_v60, %v7009_v23  ;;  %v7023_v59 = vmax.f32 %v7019_v17, 0.0 }
 0xb6b   :  { %v7018_v50 = vadd.f32 %v8053_v60, %v7007_v34  ;;  %v7021_v16 = vmax.f32 %v7017_v27, 0.0  ;;  %v7095_v23 = vrot.slane %v7093_v8, 7 }
 0xb6c   :  { %v7024_v24 = vmax.f32 %v7020_v10, 0.0  ;;  %v9423_v10 = vld [vmem:[%s10468_s13] sm:$0xff]  }
 0xb6d   :  { %v7022_v46 = vmax.f32 %v7018_v50, 0.0  ;;  %v10287_v50 = vmov 0.0  }
 0xb6e   :  { %v7026_v29 = vpack.c.bf16 %v7024_v24, %v7023_v59  ;;  %8926 = vmatprep.subr.bf16.mxu1 %v10287_v50  ;;  %v9425_v59 = vld [vmem:[%s10468_s13 + $0x10] sm:$0xff]   ;;  %v9426_v24 = vld [vmem:[%s10468_s13 + $0x18] sm:$0xff]  }
 0xb6f   :  { %v7025_v20 = vpack.c.bf16 %v7022_v46, %v7021_v16  ;;  %v9428_v16 = vld [vmem:[%s10468_s13 + $0x28] sm:$0xff]   ;;  %v9429_v46 = vld [vmem:[%s10468_s13 + $0x30] sm:$0xff]  }
 0xb70   :  { %7028 = vst [vmem:[#allocation2 + $0x20] sm:$0xff] %v7026_v29  ;;  %v7058_v38 = vrot.slane %v7026_v29, 1  ;;  %v7045_v41 = vshll.u32 %v7026_v29, 16  ;;  %v7048_v0 = vshrl.u32 %v7026_v29, 16  ;;  %v9430_v29 = vld [vmem:[%s10468_s13 + $0x38] sm:$0xff]   ;;  %s10289_s13 = smov [#allocation54]  }
 0xb71   :  { %7027 = vst [vmem:[#allocation2 + $0x8] sm:$0xff] %v7025_v20  ;;  %v7055_v25 = vrot.slane %v7025_v20, 1  ;;  %v7038_v63 = vshll.u32 %v7025_v20, 16  ;;  %v7041_v52 = vshrl.u32 %v7025_v20, 16  ;;  %s7589_s11 = sshll.u32 %s10289_s13, 4  ;;  %s7590_s11 = int_to_ptr.vmem [resolvable:$true] %s7589_s11 }
 0xb72   :  { %v7060_v13 = vsel %vm764_vm2, %v7058_v38, %v7059_v33  ;;  %v7047_v51 = vrot.slane %v7045_v41, 1  ;;  %v7112_v19 = vshrl.u32 %v7058_v38, 16  ;;  %v7096_v44 = vrot.slane %v7048_v0, 7  ;;  %s10157_s15 = scalar_lea.vmem %s7590_s11, 32  ;;  %p10162_p13 = scmp.lt.s32.totalorder %s7590_s11, %s7590_s11 }
 0xb73   :  { %v7057_v6 = vsel %vm764_vm2, %v7055_v25, %v7056_v62  ;;  %v7116_v11 = vshrl.u32 %v7060_v13, 16  ;;  %v7081_v56 = vshrl.u32 %v7055_v25, 16  ;;  %v7040_v28 = vrot.slane %v7038_v63, 1  ;;  %p10158_p12 = scmp.ne.s32.totalorder %s7590_s11, %s10157_s15  ;;  %p10163_p0 = scmp.lt.s32.totalorder %s10157_s15, %s10157_s15 }
 0xb74   :  { %v7085_v61 = vshrl.u32 %v7057_v6, 16  ;;  %v7119_v40 = vshll.u32 %v7060_v13, 16  ;;  %v7050_v58 = vor.u32 %v7048_v0, %v7047_v51  ;;  %v7088_v57 = vshll.u32 %v7057_v6, 16  ;;  %v8079_v0 = vld [vmem:[#allocation53] ss:$0 sm:$0xff] }
 0xb75   :  { %v7118_v53 = vrot.slane %v7116_v11, 7  ;;  %v7043_v3 = vor.u32 %v7041_v52, %v7040_v28  ;;  %v7065_v21 = vrot.slane %v7041_v52, 7  ;;  %v7083_v15 = vrot.slane %v7081_v56, 7  ;;  %p10164_p1 = por %p10163_p0, %p10162_p13 }
 0xb76   :  { %v7087_v55 = vrot.slane %v7085_v61, 7  ;;  %v7104_v2 = vshrl.u32 %v7050_v58, 16  ;;  %v7069_v49 = vshrl.u32 %v7040_v28, 16  ;;  %v7114_v26 = vrot.slane %v7112_v19, 7 }
 0xb77   :  { %v7121_v4 = vor.u32 %v7119_v40, %v7118_v53  ;;  %v7073_v5 = vshrl.u32 %v7043_v3, 16  ;;  %v7100_v22 = vshrl.u32 %v7047_v51, 16  ;;  %v7076_v30 = vshll.u32 %v7043_v3, 16  ;;  %v8078_v51 = vld [vmem:[#allocation51] ss:$0 sm:$0xff]  ;;  %p10165_p2 = pnand %p10164_p1, %p10158_p12 }
 0xb78   :  { %v7090_v31 = vor.u32 %v7088_v57, %v7087_v55  ;;  %v7106_v9 = vrot.slane %v7104_v2, 7  ;;  %v7107_v32 = vshll.u32 %v7050_v58, 16  ;;  %v7066_v18 = vor.u32 %v7065_v21, %v7038_v63 }
 0xb79   :  { %v7075_v36 = vrot.slane %v7073_v5, 7  ;;  %v7122_v1 = vsel %vm2527_vm9, %v7114_v26, %v7121_v4  ;;  %v7071_v35 = vrot.slane %v7069_v49, 7  ;;  %v7102_v42 = vrot.slane %v7100_v22, 7 }
 0xb7a   :  { %v7091_v12 = vsel %vm2527_vm9, %v7083_v15, %v7090_v31  ;;  %v7109_v39 = vor.u32 %v7107_v32, %v7106_v9  ;;  %v7067_v43 = vsel %vm2527_vm9, %v7064_v7, %v7066_v18  ;;  %v7097_v27 = vor.u32 %v7096_v44, %v7045_v41 }
 0xb7b   :  { %8922 = vmatprep.mubr.bf16.mxu0 %v7091_v12  ;;  %v7078_v60 = vor.u32 %v7076_v30, %v7075_v36 }
 0xb7c   :  { %8923 = vmatmul.mubr.bf16.vlgmr.msra.gmra.mrb[100].mxu0 %v7122_v1  ;;  %v7110_v17 = vsel %vm2527_vm9, %v7102_v42, %v7109_v39  ;;  %v7098_v34 = vsel %vm2527_vm9, %v7095_v23, %v7097_v27 }
 0xb7d   :  { %v7079_v14 = vsel %vm2527_vm9, %v7071_v35, %v7078_v60 }
 0xb7e   :  { %7353 = vmatprep.mubr.bf16.mxu1 %v7079_v14 }
 0xb7f   :  { %7354 = vmatmul.mubr.bf16.vlgmr.msra.gmra.mrb[88].mxu1 %v7067_v43 }
 0xb80   :  { %7361 = vmatprep.mubr.bf16.mxu1 %v7110_v17  ;;  %8927 = vmatpush3.bf16.msra.mxu1 %v9423_v10 }
 0xb81   :  { %8928 = vmatprep.subr.bf16.mxu1 %v10287_v50 }
 0xb84   :  { %8929 = vmatpush3.bf16.msra.mxu1 %v9424_v54 }
 0xb85   :  { %8930 = vmatprep.subr.bf16.mxu1 %v10287_v50 }
 0xb87   :  { %7362 = vmatmul.mubr.bf16.gmra.mrb[92].mxu1 %v7098_v34 }
 0xb88   :  { %8942 = vmatprep.mubr.msk.bf16.mxu1 %vm10288_vm10, %v10287_v50  ;;  %8931 = vmatpush3.bf16.msra.mxu1 %v9425_v59 }
 0xb89   :  { %8932 = vmatprep.subr.bf16.mxu1 %v10287_v50 }
 0xb8c   :  { %8933 = vmatpush3.bf16.msra.mxu1 %v9426_v24 }
 0xb8d   :  { %8934 = vmatprep.subr.bf16.mxu1 %v10287_v50 }
 0xb90   :  { %8935 = vmatpush3.bf16.msra.mxu1 %v9427_v45 }
 0xb91   :  { %8936 = vmatprep.subr.bf16.mxu1 %v10287_v50 }
 0xb94   :  { %8937 = vmatpush3.bf16.msra.mxu1 %v9428_v16 }
 0xb95   :  { %8938 = vmatprep.subr.bf16.mxu1 %v10287_v50 }
 0xb98   :  { %8939 = vmatpush3.bf16.msra.mxu1 %v9429_v46 }
 0xb99   :  { %8940 = vmatprep.subr.bf16.mxu1 %v10287_v50  ;;  %v8080_v50 = vld [vmem:[%s10473_s8] ss:$0 sm:$0xff] }
 0xb9c   :  { %8941 = vmatpush3.bf16.msra.mxu1 %v9430_v29 }
 0xc4f   :  { %v8924_v33 = vpop.f32.mrb[100].mxu0 }
 0xc50   :  { %v7404_v20 = vpop.f32.mrb[101].mxu0 }
 0xc51   :  { %v8925_v62 = vpop.f32.mrb[102].mxu0 }
 0xc52   :  { %v7407_v38 = vpop.f32.mrb[103].mxu0  ;;  %v8735_v41 = vpop.f32.mrb[88].mxu1 }
 0xc53   :  { %v8736_v25 = vpop.f32.mrb[89].mxu1 }
 0xc54   :  { %v8737_v63 = vadd.f32 %v8736_v25, %v8735_v41  ;;  %v8738_v13 = vpop.f32.mrb[90].mxu1 }
 0xc55   :  { %v8739_v6 = vpop.f32.mrb[91].mxu1 }
 0xc56   :  { %v7405_v11 = vadd.f32 %v8737_v63, %v7404_v20  ;;  %v8740_v52 = vadd.f32 %v8739_v6, %v8738_v13 }
 0xc58   :  { %v7426_v56 = vmul.f32 %v8078_v51, %v7405_v11  ;;  %v7408_v61 = vadd.f32 %v8740_v52, %v7407_v38 }
 0xc5a   :  { %v7437_v28 = vadd.f32 %v8079_v0, %v7426_v56  ;;  %v7427_v48 = vmul.f32 %v8078_v51, %v7408_v61  ;;  %v8741_v19 = vpop.f32.mrb[92].mxu1 }
 0xc5b   :  { %v8742_v53 = vpop.f32.mrb[93].mxu1 }
 0xc5c   :  { %v7438_v40 = vadd.f32 %v8079_v0, %v7427_v48  ;;  %v8743_v58 = vadd.f32 %v8742_v53, %v8741_v19  ;;  %v8744_v55 = vpop.f32.mrb[94].mxu1  ;;  %v7441_v3 = vmax.f32 %v7437_v28, 0.0 }
 0xc5d   :  { %v8745_v57 = vpop.f32.mrb[95].mxu1 }
 0xc5e   :  { %v7442_v4 = vmax.f32 %v7438_v40, 0.0  ;;  %v7413_v47 = vadd.f32 %v8924_v33, %v8743_v58  ;;  %v8746_v21 = vadd.f32 %v8745_v57, %v8744_v55 }
 0xc60   :  { %v7445_v2 = vadd.f32 %v7442_v4, %v7441_v3  ;;  %v7428_v15 = vmul.f32 %v8078_v51, %v7413_v47  ;;  %v7416_v31 = vadd.f32 %v8925_v62, %v8746_v21 }
 0xc62   :  { %v7446_v49 = vrot.slane %v7445_v2, 4  ;;  %v7439_v5 = vadd.f32 %v8079_v0, %v7428_v15  ;;  %v7429_v26 = vmul.f32 %v8078_v51, %v7416_v31 }
 0xc64   :  { %v7447_v22 = vadd.f32 %v7446_v49, %v7445_v2  ;;  %v7440_v9 = vadd.f32 %v8079_v0, %v7429_v26  ;;  %v7443_v36 = vmax.f32 %v7439_v5, 0.0 }
 0xc66   :  { %v7448_v12 = vrot.slane %v7447_v22, 2  ;;  %v7444_v30 = vmax.f32 %v7440_v9, 0.0 }
 0xc68   :  { %v7449_v32 = vadd.f32 %v7448_v12, %v7447_v22  ;;  %v7452_v1 = vadd.f32 %v7444_v30, %v7443_v36 }
 0xc6a   :  { %v7450_v7 = vrot.slane %v7449_v32, 1  ;;  %v7453_v18 = vrot.slane %v7452_v1, 4 }
 0xc6c   :  { %v7454_v35 = vadd.f32 %v7453_v18, %v7452_v1  ;;  %v7451_v60 = vadd.f32 %v7450_v7, %v7449_v32 }
 0xc6e   :  { %v7455_v39 = vrot.slane %v7454_v35, 2  ;;  %v7459_v14 = vmul.f32 0.0625, %v7451_v60 }
 0xc70   :  { %v7456_v37 = vadd.f32 %v7455_v39, %v7454_v35  ;;  %v7461_v8 = vpack.c.bf16 %v7459_v14, %v7459_v14 }
 0xc72   :  { %v7457_v42 = vrot.slane %v7456_v37, 1  ;;  %v7488_v23 = vunpack.c.l.b16 %v7461_v8 }
 0xc74   :  { %v7458_v43 = vadd.f32 %v7457_v42, %v7456_v37 }
 0xc76   :  { %v7460_v44 = vmul.f32 0.0625, %v7458_v43 }
 0xc78   :  { %v7462_v17 = vpack.c.bf16 %v7460_v44, %v7460_v44 }
 0xc7a   :  { %v7489_v27 = vunpack.c.l.b16 %v7462_v17 }
 0xc7c   :  { %v7491_v34 = vsel %vm7490_vm11, %v7489_v27, %v7488_v23 }
 0xc7d   :  { %v7492_v10 = vpack.c.b16 %v7491_v34, %v7491_v34 }
 0xc7f   :  { %8943 = vmatmul.mubr.bf16.vlgmr.msra.gmra.mrb[96].mxu1 %v7492_v10 }
 0xd52   :  { %v7576_v54 = vpop.f32.mrb[96].mxu1 }
 0xd53   :  { %v7577_v59 = vadd.f32 %v8080_v50, %v7576_v54  ;;  %v8944_v24 = vpop.f32.mrb[97].mxu1 }
 0xd54   :  { %v7579_v45 = vpop.f32.mrb[98].mxu1 }
 0xd55   :  { %7582 = vst [vmem:[#allocation54] sm:$0x3] %v7577_v59  ;;  %v8945_v16 = vpop.f32.mrb[99].mxu1 }
 0xd56   :  { %10168 = shalt.err (!%p10165_p2)
}
 0xd57   :  { %s10169_s8 = scalar_lea.hbm %s10478_s5, 32 }
 0xd58   :  { %p10170_p3 = scmp.ne.s32.totalorder %s10478_s5, %s10169_s8  ;;  %p10173_p4 = scmp.lt.u32.totalorder %s10169_s8, %s10478_s5 }
 0xd5a   :  { %p10175_p5 = pnand %p10173_p4, %p10170_p3 }
 0xd5c   :  { %10178 = shalt.err (!%p10175_p5)
}
 0xd5d   :  { %7592 = dma.vmem_to_hbm [thread:$0]  %s7590_s11, 32, %s10478_s5, [#allocation5]  }
 0xd5e   :  { %10213 = dma.done.wait [#allocation5], 32  }
 0xd5f   :  { %10214 = vsyncadd [#allocation5], 4294967264 }
 0xd60   :  { %7596 = vsyncpa [#allocation4], 1 }
 0xd61   :  { %7597 = vsyncpa [#allocation7], 1 }
 0xd62   :  { %7598 = vsyncpa [#allocation10], 1 }
 0xd63   :  { %7599 = vsyncpa [#allocation13], 1 }
 0xd64   :  { %7600 = vsyncpa [#allocation16], 1 }
 0xd65   :  { %7601 = vsyncpa [#allocation19], 1 }
 0xd66   :  { %7602 = vsyncpa [#allocation22], 1 }
 0xd67   :  { %7603 = vsyncpa [#allocation25], 1 }
 0xd68   :  { %7604 = vsyncpa [#allocation28], 1 }
 0xd69   :  { %7605 = vsyncpa [#allocation31], 1 }
 0xd6a   :  { %7606 = vsyncpa [#allocation34], 1 }
 0xd6b   :  { %7607 = vsyncpa [#allocation37], 1 }
 0xd6c   :  { %7608 = vsyncpa [#allocation40], 1 }
 0xd6d   :  { %7609 = vsyncpa [#allocation43], 1 }
 0xd6e   :  { %7610 = vsyncpa [#allocation46], 1 }
 0xd6f   :  { %7611 = vsyncpa [#allocation49], 1 }
 0xd70   :  { %7612 = vsyncpa [#allocation52], 1 }
 0xd71   :  { %7613 = vsyncpa [#allocation5], 1 }

</bundles_post_ra>
